<compile_context>
chip_gen: v7x
topology: tpu7x:2x2x1
jax: 0.10.0
libtpu: 0.0.40
codegen_flags: <defaults>
</compile_context>

<pallas_src>
import functools

import jax
import jax.numpy as jnp
from jax.experimental import pallas as pl
from jax.experimental.pallas import tpu as pltpu

NUM_LAYERS = 2  # fixed by the module (num_layers=2)
BP = 8          # padded batch rows per timestep = one f32 sublane tile


def _lstm_fc_kernel(
    x2d_ref,    # (T*8, Dp)   bf16 VMEM; row t*8+b == x[b, t, :], rows 2..7 zero
    w0_ref,     # (Dp+H, 4H)  bf16 VMEM; [0:Dp] = W_ih0 (zero-padded), [Dp:] = W_hh0
    bias_ref,   # (3, 4H)     f32  VMEM; rows = b0, b1, bfc (zero-padded)
    w1_hbm,     # (2H, 4H)    bf16 HBM (pl.ANY); fused [W_ih1 ; W_hh1]
    wfc_hbm,    # (H, Cp)     bf16 HBM (pl.ANY); fc weight, classes padded to Cp
    out_ref,    # (8, Cp)     f32  VMEM
    xg0_scr,    # (T*8, 4H)   f32  VMEM scratch: hoisted layer-0 input projection
    w1_vmem,    # (2H, 4H)    bf16 VMEM scratch
    wfc_vmem,   # (H, Cp)     bf16 VMEM scratch
    sems,       # DMA semaphores, shape (2,)
    *,
    seq_len,
    hidden,
):
    T, H = seq_len, hidden
    Dp = x2d_ref.shape[1]
    Cp = out_ref.shape[1]

    # Kick off the weight DMAs immediately: w1 is hidden behind the input
    # projection + first layer-0 cell, wfc behind the whole recurrence.
    w1_copy = pltpu.make_async_copy(w1_hbm, w1_vmem, sems.at[0])
    wfc_copy = pltpu.make_async_copy(wfc_hbm, wfc_vmem, sems.at[1])
    w1_copy.start()
    wfc_copy.start()

    # Hoisted layer-0 input projection (no time dependence): one MXU matmul for
    # all timesteps, parked in VMEM scratch so it doesn't live in vregs across
    # the unrolled recurrence.
    xg0_scr[...] = (
        jnp.dot(x2d_ref[...], w0_ref[0:Dp, :], preferred_element_type=jnp.float32)
        + bias_ref[0:1, :])

    b1 = jnp.broadcast_to(bias_ref[1:2, :], (BP, 4 * H))   # hoisted broadcast

    def gates_to_hc(gates, c_prev):
        # gate-column order (i, f, o, g): one sigmoid over 3H lanes + one tanh.
        sfo = jax.nn.sigmoid(gates[:, : 3 * H])
        i_g = sfo[:, 0 * H:1 * H]
        f_g = sfo[:, 1 * H:2 * H]
        o_g = sfo[:, 2 * H:3 * H]
        g_g = jnp.tanh(gates[:, 3 * H:])
        c_new = f_g * c_prev + i_g * g_g
        return o_g * jnp.tanh(c_new), c_new

    zeros = jnp.zeros((BP, H), jnp.float32)   # h0 = c0 = 0, per the module

    # Step 0, layer 0: h0_prev == 0, so the recurrent matmul is exactly zero.
    h0, c0 = gates_to_hc(xg0_scr[0:BP, :], zeros)
    h0b = h0.astype(jnp.bfloat16)   # single bf16 cast, reused by both consumers
    h1, c1 = zeros, zeros

    # Layer-1 weights are needed from here on; the DMA has had the projection
    # and one full cell to land.
    w1_copy.wait()

    # Fully-unrolled, software-skewed recurrence (T is small & static):
    # layer-1 step t and layer-0 step t+1 depend only on h0(t), so both MXU
    # pushes / EUP chains per iteration are mutually independent. Weight tiles
    # are re-read from refs at each use so nothing big stays live in vregs.
    for t in range(T):
        h1b = h1.astype(jnp.bfloat16)
        cat = jnp.concatenate([h0b, h1b], axis=1)            # (8, 2H) bf16
        # TODO(synk): on v7x, split this into two dots against w1_vmem[:H] and
        # w1_vmem[H:] accumulating in the MRB to drop the per-step concat.
        g1 = jnp.dot(cat, w1_vmem[...], preferred_element_type=jnp.float32) + b1
        if t + 1 < T:
            g0 = xg0_scr[(t + 1) * BP:(t + 2) * BP, :] + jnp.dot(
                h0b, w0_ref[Dp:Dp + H, :], preferred_element_type=jnp.float32)
            h0, c0 = gates_to_hc(g0, c0)
            h0b = h0.astype(jnp.bfloat16)
        h1, c1 = gates_to_hc(g1, c1)

    # fc(out[:, -1, :]) — only the last timestep feeds the classifier.
    wfc_copy.wait()
    logits = jnp.dot(h1.astype(jnp.bfloat16), wfc_vmem[...],
                     preferred_element_type=jnp.float32) + bias_ref[2:3, :Cp]
    out_ref[...] = logits.astype(out_ref.dtype)


@functools.partial(jax.jit, static_argnames=("num_classes",))
def rnn_forward(x, kparams, *, num_classes):
    """x: (B, T, D) float32 (batch_first, like the PyTorch module)."""
    B, T, D = x.shape
    H = kparams["wfc"].shape[0]
    Cp = kparams["wfc"].shape[1]
    Dp = kparams["w0"].shape[0] - H

    # Layout plumbing in plain JAX: time-major, batch rows padded B -> 8 and
    # input features padded D -> Dp (both with zeros), bf16 feed to the MXU.
    xt = jnp.transpose(x, (1, 0, 2)).astype(jnp.bfloat16)          # (T, B, D)
    x2d = jnp.zeros((T, BP, Dp), jnp.bfloat16).at[:, :B, :D].set(xt)
    x2d = x2d.reshape(T * BP, Dp)

    kernel = functools.partial(_lstm_fc_kernel, seq_len=T, hidden=H)
    vmem = pl.BlockSpec(memory_space=pltpu.MemorySpace.VMEM)
    hbm = pl.BlockSpec(memory_space=pl.ANY)

    out = pl.pallas_call(
        kernel,
        out_shape=jax.ShapeDtypeStruct((BP, Cp), jnp.float32),
        in_specs=[vmem, vmem, vmem, hbm, hbm],
        out_specs=vmem,
        scratch_shapes=[
            pltpu.VMEM((T * BP, 4 * H), jnp.float32),      # xg0 projection
            pltpu.VMEM(kparams["w1"].shape, jnp.bfloat16),  # w1 landing buffer
            pltpu.VMEM(kparams["wfc"].shape, jnp.bfloat16), # wfc landing buffer
            pltpu.SemaphoreType.DMA((2,)),
        ],
        compiler_params=pltpu.CompilerParams(
            vmem_limit_bytes=32 * 1024 * 1024,   # explicit; tiny footprint here
        ),
    )(x2d, kparams["w0"], kparams["bias"], kparams["w1"], kparams["wfc"])
    return out[:B, :num_classes]


def init_params(key, input_size, hidden_size, num_classes):
    """PyTorch-shaped params, U(-1/sqrt(H), 1/sqrt(H)) like nn.LSTM/nn.Linear."""
    H, D, C = hidden_size, input_size, num_classes
    k = 1.0 / jnp.sqrt(jnp.float32(H))
    keys = jax.random.split(key, 10)
    u = lambda kk, shape: jax.random.uniform(kk, shape, jnp.float32, -k, k)
    return {
        "wih0": u(keys[0], (4 * H, D)),   # gate order (i, f, g, o)
        "whh0": u(keys[1], (4 * H, H)),
        "b_ih0": u(keys[2], (4 * H,)),
        "b_hh0": u(keys[3], (4 * H,)),
        "wih1": u(keys[4], (4 * H, H)),
        "whh1": u(keys[5], (4 * H, H)),
        "b_ih1": u(keys[6], (4 * H,)),
        "b_hh1": u(keys[7], (4 * H,)),
        "wfc": u(keys[8], (C, H)),
        "bfc": u(keys[9], (C,)),
    }


def pack_params(p):
    """PyTorch-shaped params -> kernel layout (offline, once):
    transpose for `inp @ W`, sum biases, reorder gates (i,f,g,o)->(i,f,o,g),
    fuse layer-1 [W_ih; W_hh], coalesce layer-0 weights / biases into slabs,
    zero-pad input-feature and class dims to tile multiples, cast to bf16."""
    def reorder_cols(w):                       # (..., 4H) in (i, f, g, o)
        i, f, g, o = jnp.split(w, 4, axis=-1)
        return jnp.concatenate([i, f, o, g], axis=-1)

    H = p["whh0"].shape[1]
    D = p["wih0"].shape[1]
    C = p["wfc"].shape[0]
    Dp = ((D + 15) // 16) * 16                 # bf16 sublane-tile multiple so
                                               # the W_hh0 block starts aligned
    Cp = max(128, ((C + 127) // 128) * 128)    # lane-dense fc output
    assert Cp <= 4 * H, "bfc row shares the (., 4H) bias slab"

    wih0 = reorder_cols(p["wih0"].T)                                   # (D, 4H)
    wih0 = jnp.zeros((Dp, 4 * H), jnp.float32).at[:D].set(wih0)
    whh0 = reorder_cols(p["whh0"].T)                                   # (H, 4H)
    w0 = jnp.concatenate([wih0, whh0], axis=0).astype(jnp.bfloat16)    # (Dp+H, 4H)

    w1 = reorder_cols(
        jnp.concatenate([p["wih1"].T, p["whh1"].T], axis=0)
    ).astype(jnp.bfloat16)                                             # (2H, 4H)

    b0 = reorder_cols((p["b_ih0"] + p["b_hh0"]).reshape(1, -1))
    b1 = reorder_cols((p["b_ih1"] + p["b_hh1"]).reshape(1, -1))
    bfc = jnp.zeros((1, 4 * H), jnp.float32).at[0, :C].set(p["bfc"])
    bias = jnp.concatenate([b0, b1, bfc], axis=0)                      # (3, 4H)

    wfc = jnp.zeros((H, Cp), jnp.float32).at[:, :C].set(p["wfc"].T)
    wfc = wfc.astype(jnp.bfloat16)                                     # (H, Cp)

    return {"w0": w0, "bias": bias, "w1": w1, "wfc": wfc}


def reference_forward(x, p):
    """Pure-JAX reference with torch.nn.LSTM + Linear semantics (PyTorch gate
    order), using the same bf16-operand / f32-accumulate matmul precision."""
    B, T, D = x.shape
    H = p["whh0"].shape[1]
    bf = lambda a: a.astype(jnp.bfloat16)

    wih0, whh0 = bf(p["wih0"].T), bf(p["whh0"].T)
    wih1, whh1 = bf(p["wih1"].T), bf(p["whh1"].T)
    b0 = (p["b_ih0"] + p["b_hh0"])[None, :]
    b1 = (p["b_ih1"] + p["b_hh1"])[None, :]
    wfc, bfc = bf(p["wfc"].T), p["bfc"][None, :]

    def cell(inp, h, c, wih, whh, b):
        gates = (jnp.dot(bf(inp), wih, preferred_element_type=jnp.float32)
                 + jnp.dot(bf(h), whh, preferred_element_type=jnp.float32) + b)
        i = jax.nn.sigmoid(gates[:, 0 * H:1 * H])
        f = jax.nn.sigmoid(gates[:, 1 * H:2 * H])
        g = jnp.tanh(gates[:, 2 * H:3 * H])
        o = jax.nn.sigmoid(gates[:, 3 * H:4 * H])
        c_new = f * c + i * g
        h_new = o * jnp.tanh(c_new)
        return h_new, c_new

    h0 = jnp.zeros((B, H), jnp.float32)
    c0 = jnp.zeros((B, H), jnp.float32)
    h1 = jnp.zeros((B, H), jnp.float32)
    c1 = jnp.zeros((B, H), jnp.float32)
    for t in range(T):
        h0, c0 = cell(x[:, t, :], h0, c0, wih0, whh0, b0)
        h1, c1 = cell(h0, h1, c1, wih1, whh1, b1)
    return jnp.dot(bf(h1), wfc, preferred_element_type=jnp.float32) + bfc


if __name__ == "__main__":
    # Small shapes consistent with the module's forward.
    batch, seq_len, input_size = 2, 8, 28
    hidden_size, num_classes = 128, 10

    key = jax.random.PRNGKey(0)
    k_x, k_p = jax.random.split(key)
    x = jax.random.normal(k_x, (batch, seq_len, input_size), jnp.float32)
    params = init_params(k_p, input_size, hidden_size, num_classes)
    kparams = pack_params(params)

    out = rnn_forward(x, kparams, num_classes=num_classes)
    out = jax.block_until_ready(out)

    ref = reference_forward(x, params)
    assert out.shape == (batch, num_classes)
    max_err = jnp.max(jnp.abs(out - ref))
    assert jnp.allclose(out, ref, atol=2e-3, rtol=2e-3), f"max abs err {max_err}"

    print("KERNEL_OK")
</pallas_src>

<mosaic_0001>
module attributes {stable_mosaic.version = 11 : i64} {
  func.func @_lstm_fc_kernel(%arg0: memref<64x32xbf16, #tpu.memory_space<vmem>>, %arg1: memref<160x512xbf16, #tpu.memory_space<vmem>>, %arg2: memref<3x512xf32, #tpu.memory_space<vmem>>, %arg3: memref<256x512xbf16, #tpu.memory_space<any>>, %arg4: memref<128x128xbf16, #tpu.memory_space<any>>, %arg5: memref<8x128xf32, #tpu.memory_space<vmem>>, %arg6: memref<64x512xf32, #tpu.memory_space<vmem>>, %arg7: memref<256x512xbf16, #tpu.memory_space<vmem>>, %arg8: memref<128x128xbf16, #tpu.memory_space<vmem>>, %arg9: memref<2x!tpu.dma_semaphore, #tpu.memory_space<semaphore_mem>>) attributes {dimension_semantics = [], scalar_prefetch = 0 : i64, scratch_operands = 4 : i64, tpu.core_type = #tpu.core_type<tc>} {
    %c0_i32 = arith.constant 0 : i32
    %0 = tpu.memref_slice %arg9[%c0_i32] : memref<2x!tpu.dma_semaphore, #tpu.memory_space<semaphore_mem>> -> memref<1x!tpu.dma_semaphore, #tpu.memory_space<semaphore_mem>>
    %1 = tpu.memref_squeeze %0 : memref<1x!tpu.dma_semaphore, #tpu.memory_space<semaphore_mem>> -> memref<!tpu.dma_semaphore, #tpu.memory_space<semaphore_mem>>
    tpu.enqueue_dma source(%arg3 : memref<256x512xbf16, #tpu.memory_space<any>>) target(%arg7 : memref<256x512xbf16, #tpu.memory_space<vmem>>) target_semaphore(%1 : memref<!tpu.dma_semaphore, #tpu.memory_space<semaphore_mem>>)
    %c1_i32 = arith.constant 1 : i32
    %2 = tpu.memref_slice %arg9[%c1_i32] : memref<2x!tpu.dma_semaphore, #tpu.memory_space<semaphore_mem>> -> memref<1x!tpu.dma_semaphore, #tpu.memory_space<semaphore_mem>>
    %3 = tpu.memref_squeeze %2 : memref<1x!tpu.dma_semaphore, #tpu.memory_space<semaphore_mem>> -> memref<!tpu.dma_semaphore, #tpu.memory_space<semaphore_mem>>
    tpu.enqueue_dma source(%arg4 : memref<128x128xbf16, #tpu.memory_space<any>>) target(%arg8 : memref<128x128xbf16, #tpu.memory_space<vmem>>) target_semaphore(%3 : memref<!tpu.dma_semaphore, #tpu.memory_space<semaphore_mem>>)
    %c0 = arith.constant 0 : index
    %c0_0 = arith.constant 0 : index
    %4 = vector.load %arg0[%c0, %c0_0] : memref<64x32xbf16, #tpu.memory_space<vmem>>, vector<64x32xbf16>
    %c0_1 = arith.constant 0 : index
    %c0_2 = arith.constant 0 : index
    %5 = vector.load %arg1[%c0_1, %c0_2] : memref<160x512xbf16, #tpu.memory_space<vmem>>, vector<32x512xbf16>
    %cst = arith.constant dense<0.000000e+00> : vector<64x512xf32>
    %6 = tpu.matmul %4, %5, %cst {dimension_numbers = #tpu.dot_dimension_numbers<[1], [0], [0], [1], [0, 0, 1, 1], [], []>} : vector<64x32xbf16>, vector<32x512xbf16>, vector<64x512xf32> -> vector<64x512xf32>
    %c0_3 = arith.constant 0 : index
    %c0_4 = arith.constant 0 : index
    %7 = vector.load %arg2[%c0_3, %c0_4] : memref<3x512xf32, #tpu.memory_space<vmem>>, vector<1x512xf32>
    %8 = vector.broadcast %7 : vector<1x512xf32> to vector<64x512xf32>
    %9 = arith.addf %6, %8 : vector<64x512xf32>
    %c0_5 = arith.constant 0 : index
    %c0_6 = arith.constant 0 : index
    %10 = vector.load %arg6[%c0_5, %c0_6] : memref<64x512xf32, #tpu.memory_space<vmem>>, vector<64x512xf32>
    tpu.vector_store %arg6[%c0_5, %c0_6], %9 {strides = array<i32>} : memref<64x512xf32, #tpu.memory_space<vmem>>, vector<64x512xf32>,
    %c1 = arith.constant 1 : index
    %c0_7 = arith.constant 0 : index
    %11 = vector.load %arg2[%c1, %c0_7] : memref<3x512xf32, #tpu.memory_space<vmem>>, vector<1x512xf32>
    %12 = vector.shape_cast %11 : vector<1x512xf32> to vector<1x512xf32>
    %13 = vector.broadcast %12 : vector<1x512xf32> to vector<8x512xf32>
    %cst_8 = arith.constant 0.000000e+00 : f32
    %14 = vector.broadcast %cst_8 : f32 to vector<8x128xf32>
    %c0_9 = arith.constant 0 : index
    %c0_10 = arith.constant 0 : index
    %15 = vector.load %arg6[%c0_9, %c0_10] : memref<64x512xf32, #tpu.memory_space<vmem>>, vector<8x512xf32>
    %16 = vector.extract_strided_slice %15 {offsets = [0, 0], sizes = [8, 384], strides = [1, 1]} : vector<8x512xf32> to vector<8x384xf32>
    %17 = arith.negf %16 : vector<8x384xf32>
    %18 = math.exp %17 : vector<8x384xf32>
    %cst_11 = arith.constant 1.000000e+00 : f32
    %19 = vector.broadcast %cst_11 : f32 to vector<8x384xf32>
    %20 = arith.addf %19, %18 : vector<8x384xf32>
    %21 = arith.divf %19, %20 : vector<8x384xf32>
    %22 = vector.extract_strided_slice %21 {offsets = [0, 0], sizes = [8, 128], strides = [1, 1]} : vector<8x384xf32> to vector<8x128xf32>
    %23 = vector.extract_strided_slice %21 {offsets = [0, 128], sizes = [8, 128], strides = [1, 1]} : vector<8x384xf32> to vector<8x128xf32>
    %24 = vector.extract_strided_slice %21 {offsets = [0, 256], sizes = [8, 128], strides = [1, 1]} : vector<8x384xf32> to vector<8x128xf32>
    %25 = vector.extract_strided_slice %15 {offsets = [0, 384], sizes = [8, 128], strides = [1, 1]} : vector<8x512xf32> to vector<8x128xf32>
    %26 = math.tanh %25 : vector<8x128xf32>
    %27 = arith.mulf %23, %14 : vector<8x128xf32>
    %28 = arith.mulf %22, %26 : vector<8x128xf32>
    %29 = arith.addf %27, %28 : vector<8x128xf32>
    %30 = math.tanh %29 : vector<8x128xf32>
    %31 = arith.mulf %24, %30 : vector<8x128xf32>
    %32 = arith.truncf %31 : vector<8x128xf32> to vector<8x128xbf16>
    %c0_i32_12 = arith.constant 0 : i32
    %33 = tpu.memref_slice %arg9[%c0_i32_12] : memref<2x!tpu.dma_semaphore, #tpu.memory_space<semaphore_mem>> -> memref<1x!tpu.dma_semaphore, #tpu.memory_space<semaphore_mem>>
    %34 = tpu.memref_squeeze %33 : memref<1x!tpu.dma_semaphore, #tpu.memory_space<semaphore_mem>> -> memref<!tpu.dma_semaphore, #tpu.memory_space<semaphore_mem>>
    tpu.wait_dma2 semaphore(%34 : memref<!tpu.dma_semaphore, #tpu.memory_space<semaphore_mem>>) src(%arg3 : memref<256x512xbf16, #tpu.memory_space<any>>) dst(%arg7 : memref<256x512xbf16, #tpu.memory_space<vmem>>)
    %35 = arith.truncf %14 : vector<8x128xf32> to vector<8x128xbf16>
    %36 = tpu.concatenate %32, %35 in 1 : vector<8x128xbf16>, vector<8x128xbf16> -> vector<8x256xbf16>
    %c0_13 = arith.constant 0 : index
    %c0_14 = arith.constant 0 : index
    %37 = vector.load %arg7[%c0_13, %c0_14] : memref<256x512xbf16, #tpu.memory_space<vmem>>, vector<256x512xbf16>
    %cst_15 = arith.constant dense<0.000000e+00> : vector<8x512xf32>
    %38 = tpu.matmul %36, %37, %cst_15 {dimension_numbers = #tpu.dot_dimension_numbers<[1], [0], [0], [1], [0, 0, 1, 1], [], []>} : vector<8x256xbf16>, vector<256x512xbf16>, vector<8x512xf32> -> vector<8x512xf32>
    %39 = arith.addf %38, %13 : vector<8x512xf32>
    %c8 = arith.constant 8 : index
    %c0_16 = arith.constant 0 : index
    %40 = vector.load %arg6[%c8, %c0_16] : memref<64x512xf32, #tpu.memory_space<vmem>>, vector<8x512xf32>
    %c32 = arith.constant 32 : index
    %c0_17 = arith.constant 0 : index
    %41 = vector.load %arg1[%c32, %c0_17] : memref<160x512xbf16, #tpu.memory_space<vmem>>, vector<128x512xbf16>
    %cst_18 = arith.constant dense<0.000000e+00> : vector<8x512xf32>
    %42 = tpu.matmul %32, %41, %cst_18 {dimension_numbers = #tpu.dot_dimension_numbers<[1], [0], [0], [1], [0, 0, 1, 1], [], []>} : vector<8x128xbf16>, vector<128x512xbf16>, vector<8x512xf32> -> vector<8x512xf32>
    %43 = arith.addf %40, %42 : vector<8x512xf32>
    %44 = vector.extract_strided_slice %43 {offsets = [0, 0], sizes = [8, 384], strides = [1, 1]} : vector<8x512xf32> to vector<8x384xf32>
    %45 = arith.negf %44 : vector<8x384xf32>
    %46 = math.exp %45 : vector<8x384xf32>
    %cst_19 = arith.constant 1.000000e+00 : f32
    %47 = vector.broadcast %cst_19 : f32 to vector<8x384xf32>
    %48 = arith.addf %47, %46 : vector<8x384xf32>
    %49 = arith.divf %47, %48 : vector<8x384xf32>
    %50 = vector.extract_strided_slice %49 {offsets = [0, 0], sizes = [8, 128], strides = [1, 1]} : vector<8x384xf32> to vector<8x128xf32>
    %51 = vector.extract_strided_slice %49 {offsets = [0, 128], sizes = [8, 128], strides = [1, 1]} : vector<8x384xf32> to vector<8x128xf32>
    %52 = vector.extract_strided_slice %49 {offsets = [0, 256], sizes = [8, 128], strides = [1, 1]} : vector<8x384xf32> to vector<8x128xf32>
    %53 = vector.extract_strided_slice %43 {offsets = [0, 384], sizes = [8, 128], strides = [1, 1]} : vector<8x512xf32> to vector<8x128xf32>
    %54 = math.tanh %53 : vector<8x128xf32>
    %55 = arith.mulf %51, %29 : vector<8x128xf32>
    %56 = arith.mulf %50, %54 : vector<8x128xf32>
    %57 = arith.addf %55, %56 : vector<8x128xf32>
    %58 = math.tanh %57 : vector<8x128xf32>
    %59 = arith.mulf %52, %58 : vector<8x128xf32>
    %60 = arith.truncf %59 : vector<8x128xf32> to vector<8x128xbf16>
    %61 = vector.extract_strided_slice %39 {offsets = [0, 0], sizes = [8, 384], strides = [1, 1]} : vector<8x512xf32> to vector<8x384xf32>
    %62 = arith.negf %61 : vector<8x384xf32>
    %63 = math.exp %62 : vector<8x384xf32>
    %cst_20 = arith.constant 1.000000e+00 : f32
    %64 = vector.broadcast %cst_20 : f32 to vector<8x384xf32>
    %65 = arith.addf %64, %63 : vector<8x384xf32>
    %66 = arith.divf %64, %65 : vector<8x384xf32>
    %67 = vector.extract_strided_slice %66 {offsets = [0, 0], sizes = [8, 128], strides = [1, 1]} : vector<8x384xf32> to vector<8x128xf32>
    %68 = vector.extract_strided_slice %66 {offsets = [0, 128], sizes = [8, 128], strides = [1, 1]} : vector<8x384xf32> to vector<8x128xf32>
    %69 = vector.extract_strided_slice %66 {offsets = [0, 256], sizes = [8, 128], strides = [1, 1]} : vector<8x384xf32> to vector<8x128xf32>
    %70 = vector.extract_strided_slice %39 {offsets = [0, 384], sizes = [8, 128], strides = [1, 1]} : vector<8x512xf32> to vector<8x128xf32>
    %71 = math.tanh %70 : vector<8x128xf32>
    %72 = arith.mulf %68, %14 : vector<8x128xf32>
    %73 = arith.mulf %67, %71 : vector<8x128xf32>
    %74 = arith.addf %72, %73 : vector<8x128xf32>
    %75 = math.tanh %74 : vector<8x128xf32>
    %76 = arith.mulf %69, %75 : vector<8x128xf32>
    %77 = arith.truncf %76 : vector<8x128xf32> to vector<8x128xbf16>
    %78 = tpu.concatenate %60, %77 in 1 : vector<8x128xbf16>, vector<8x128xbf16> -> vector<8x256xbf16>
    %c0_21 = arith.constant 0 : index
    %c0_22 = arith.constant 0 : index
    %79 = vector.load %arg7[%c0_21, %c0_22] : memref<256x512xbf16, #tpu.memory_space<vmem>>, vector<256x512xbf16>
    %cst_23 = arith.constant dense<0.000000e+00> : vector<8x512xf32>
    %80 = tpu.matmul %78, %79, %cst_23 {dimension_numbers = #tpu.dot_dimension_numbers<[1], [0], [0], [1], [0, 0, 1, 1], [], []>} : vector<8x256xbf16>, vector<256x512xbf16>, vector<8x512xf32> -> vector<8x512xf32>
    %81 = arith.addf %80, %13 : vector<8x512xf32>
    %c16 = arith.constant 16 : index
    %c0_24 = arith.constant 0 : index
    %82 = vector.load %arg6[%c16, %c0_24] : memref<64x512xf32, #tpu.memory_space<vmem>>, vector<8x512xf32>
    %c32_25 = arith.constant 32 : index
    %c0_26 = arith.constant 0 : index
    %83 = vector.load %arg1[%c32_25, %c0_26] : memref<160x512xbf16, #tpu.memory_space<vmem>>, vector<128x512xbf16>
    %cst_27 = arith.constant dense<0.000000e+00> : vector<8x512xf32>
    %84 = tpu.matmul %60, %83, %cst_27 {dimension_numbers = #tpu.dot_dimension_numbers<[1], [0], [0], [1], [0, 0, 1, 1], [], []>} : vector<8x128xbf16>, vector<128x512xbf16>, vector<8x512xf32> -> vector<8x512xf32>
    %85 = arith.addf %82, %84 : vector<8x512xf32>
    %86 = vector.extract_strided_slice %85 {offsets = [0, 0], sizes = [8, 384], strides = [1, 1]} : vector<8x512xf32> to vector<8x384xf32>
    %87 = arith.negf %86 : vector<8x384xf32>
    %88 = math.exp %87 : vector<8x384xf32>
    %cst_28 = arith.constant 1.000000e+00 : f32
    %89 = vector.broadcast %cst_28 : f32 to vector<8x384xf32>
    %90 = arith.addf %89, %88 : vector<8x384xf32>
    %91 = arith.divf %89, %90 : vector<8x384xf32>
    %92 = vector.extract_strided_slice %91 {offsets = [0, 0], sizes = [8, 128], strides = [1, 1]} : vector<8x384xf32> to vector<8x128xf32>
    %93 = vector.extract_strided_slice %91 {offsets = [0, 128], sizes = [8, 128], strides = [1, 1]} : vector<8x384xf32> to vector<8x128xf32>
    %94 = vector.extract_strided_slice %91 {offsets = [0, 256], sizes = [8, 128], strides = [1, 1]} : vector<8x384xf32> to vector<8x128xf32>
    %95 = vector.extract_strided_slice %85 {offsets = [0, 384], sizes = [8, 128], strides = [1, 1]} : vector<8x512xf32> to vector<8x128xf32>
    %96 = math.tanh %95 : vector<8x128xf32>
    %97 = arith.mulf %93, %57 : vector<8x128xf32>
    %98 = arith.mulf %92, %96 : vector<8x128xf32>
    %99 = arith.addf %97, %98 : vector<8x128xf32>
    %100 = math.tanh %99 : vector<8x128xf32>
    %101 = arith.mulf %94, %100 : vector<8x128xf32>
    %102 = arith.truncf %101 : vector<8x128xf32> to vector<8x128xbf16>
    %103 = vector.extract_strided_slice %81 {offsets = [0, 0], sizes = [8, 384], strides = [1, 1]} : vector<8x512xf32> to vector<8x384xf32>
    %104 = arith.negf %103 : vector<8x384xf32>
    %105 = math.exp %104 : vector<8x384xf32>
    %cst_29 = arith.constant 1.000000e+00 : f32
    %106 = vector.broadcast %cst_29 : f32 to vector<8x384xf32>
    %107 = arith.addf %106, %105 : vector<8x384xf32>
    %108 = arith.divf %106, %107 : vector<8x384xf32>
    %109 = vector.extract_strided_slice %108 {offsets = [0, 0], sizes = [8, 128], strides = [1, 1]} : vector<8x384xf32> to vector<8x128xf32>
    %110 = vector.extract_strided_slice %108 {offsets = [0, 128], sizes = [8, 128], strides = [1, 1]} : vector<8x384xf32> to vector<8x128xf32>
    %111 = vector.extract_strided_slice %108 {offsets = [0, 256], sizes = [8, 128], strides = [1, 1]} : vector<8x384xf32> to vector<8x128xf32>
    %112 = vector.extract_strided_slice %81 {offsets = [0, 384], sizes = [8, 128], strides = [1, 1]} : vector<8x512xf32> to vector<8x128xf32>
    %113 = math.tanh %112 : vector<8x128xf32>
    %114 = arith.mulf %110, %74 : vector<8x128xf32>
    %115 = arith.mulf %109, %113 : vector<8x128xf32>
    %116 = arith.addf %114, %115 : vector<8x128xf32>
    %117 = math.tanh %116 : vector<8x128xf32>
    %118 = arith.mulf %111, %117 : vector<8x128xf32>
    %119 = arith.truncf %118 : vector<8x128xf32> to vector<8x128xbf16>
    %120 = tpu.concatenate %102, %119 in 1 : vector<8x128xbf16>, vector<8x128xbf16> -> vector<8x256xbf16>
    %c0_30 = arith.constant 0 : index
    %c0_31 = arith.constant 0 : index
    %121 = vector.load %arg7[%c0_30, %c0_31] : memref<256x512xbf16, #tpu.memory_space<vmem>>, vector<256x512xbf16>
    %cst_32 = arith.constant dense<0.000000e+00> : vector<8x512xf32>
    %122 = tpu.matmul %120, %121, %cst_32 {dimension_numbers = #tpu.dot_dimension_numbers<[1], [0], [0], [1], [0, 0, 1, 1], [], []>} : vector<8x256xbf16>, vector<256x512xbf16>, vector<8x512xf32> -> vector<8x512xf32>
    %123 = arith.addf %122, %13 : vector<8x512xf32>
    %c24 = arith.constant 24 : index
    %c0_33 = arith.constant 0 : index
    %124 = vector.load %arg6[%c24, %c0_33] : memref<64x512xf32, #tpu.memory_space<vmem>>, vector<8x512xf32>
    %c32_34 = arith.constant 32 : index
    %c0_35 = arith.constant 0 : index
    %125 = vector.load %arg1[%c32_34, %c0_35] : memref<160x512xbf16, #tpu.memory_space<vmem>>, vector<128x512xbf16>
    %cst_36 = arith.constant dense<0.000000e+00> : vector<8x512xf32>
    %126 = tpu.matmul %102, %125, %cst_36 {dimension_numbers = #tpu.dot_dimension_numbers<[1], [0], [0], [1], [0, 0, 1, 1], [], []>} : vector<8x128xbf16>, vector<128x512xbf16>, vector<8x512xf32> -> vector<8x512xf32>
    %127 = arith.addf %124, %126 : vector<8x512xf32>
    %128 = vector.extract_strided_slice %127 {offsets = [0, 0], sizes = [8, 384], strides = [1, 1]} : vector<8x512xf32> to vector<8x384xf32>
    %129 = arith.negf %128 : vector<8x384xf32>
    %130 = math.exp %129 : vector<8x384xf32>
    %cst_37 = arith.constant 1.000000e+00 : f32
    %131 = vector.broadcast %cst_37 : f32 to vector<8x384xf32>
    %132 = arith.addf %131, %130 : vector<8x384xf32>
    %133 = arith.divf %131, %132 : vector<8x384xf32>
    %134 = vector.extract_strided_slice %133 {offsets = [0, 0], sizes = [8, 128], strides = [1, 1]} : vector<8x384xf32> to vector<8x128xf32>
    %135 = vector.extract_strided_slice %133 {offsets = [0, 128], sizes = [8, 128], strides = [1, 1]} : vector<8x384xf32> to vector<8x128xf32>
    %136 = vector.extract_strided_slice %133 {offsets = [0, 256], sizes = [8, 128], strides = [1, 1]} : vector<8x384xf32> to vector<8x128xf32>
    %137 = vector.extract_strided_slice %127 {offsets = [0, 384], sizes = [8, 128], strides = [1, 1]} : vector<8x512xf32> to vector<8x128xf32>
    %138 = math.tanh %137 : vector<8x128xf32>
    %139 = arith.mulf %135, %99 : vector<8x128xf32>
    %140 = arith.mulf %134, %138 : vector<8x128xf32>
    %141 = arith.addf %139, %140 : vector<8x128xf32>
    %142 = math.tanh %141 : vector<8x128xf32>
    %143 = arith.mulf %136, %142 : vector<8x128xf32>
    %144 = arith.truncf %143 : vector<8x128xf32> to vector<8x128xbf16>
    %145 = vector.extract_strided_slice %123 {offsets = [0, 0], sizes = [8, 384], strides = [1, 1]} : vector<8x512xf32> to vector<8x384xf32>
    %146 = arith.negf %145 : vector<8x384xf32>
    %147 = math.exp %146 : vector<8x384xf32>
    %cst_38 = arith.constant 1.000000e+00 : f32
    %148 = vector.broadcast %cst_38 : f32 to vector<8x384xf32>
    %149 = arith.addf %148, %147 : vector<8x384xf32>
    %150 = arith.divf %148, %149 : vector<8x384xf32>
    %151 = vector.extract_strided_slice %150 {offsets = [0, 0], sizes = [8, 128], strides = [1, 1]} : vector<8x384xf32> to vector<8x128xf32>
    %152 = vector.extract_strided_slice %150 {offsets = [0, 128], sizes = [8, 128], strides = [1, 1]} : vector<8x384xf32> to vector<8x128xf32>
    %153 = vector.extract_strided_slice %150 {offsets = [0, 256], sizes = [8, 128], strides = [1, 1]} : vector<8x384xf32> to vector<8x128xf32>
    %154 = vector.extract_strided_slice %123 {offsets = [0, 384], sizes = [8, 128], strides = [1, 1]} : vector<8x512xf32> to vector<8x128xf32>
    %155 = math.tanh %154 : vector<8x128xf32>
    %156 = arith.mulf %152, %116 : vector<8x128xf32>
    %157 = arith.mulf %151, %155 : vector<8x128xf32>
    %158 = arith.addf %156, %157 : vector<8x128xf32>
    %159 = math.tanh %158 : vector<8x128xf32>
    %160 = arith.mulf %153, %159 : vector<8x128xf32>
    %161 = arith.truncf %160 : vector<8x128xf32> to vector<8x128xbf16>
    %162 = tpu.concatenate %144, %161 in 1 : vector<8x128xbf16>, vector<8x128xbf16> -> vector<8x256xbf16>
    %c0_39 = arith.constant 0 : index
    %c0_40 = arith.constant 0 : index
    %163 = vector.load %arg7[%c0_39, %c0_40] : memref<256x512xbf16, #tpu.memory_space<vmem>>, vector<256x512xbf16>
    %cst_41 = arith.constant dense<0.000000e+00> : vector<8x512xf32>
    %164 = tpu.matmul %162, %163, %cst_41 {dimension_numbers = #tpu.dot_dimension_numbers<[1], [0], [0], [1], [0, 0, 1, 1], [], []>} : vector<8x256xbf16>, vector<256x512xbf16>, vector<8x512xf32> -> vector<8x512xf32>
    %165 = arith.addf %164, %13 : vector<8x512xf32>
    %c32_42 = arith.constant 32 : index
    %c0_43 = arith.constant 0 : index
    %166 = vector.load %arg6[%c32_42, %c0_43] : memref<64x512xf32, #tpu.memory_space<vmem>>, vector<8x512xf32>
    %c32_44 = arith.constant 32 : index
    %c0_45 = arith.constant 0 : index
    %167 = vector.load %arg1[%c32_44, %c0_45] : memref<160x512xbf16, #tpu.memory_space<vmem>>, vector<128x512xbf16>
    %cst_46 = arith.constant dense<0.000000e+00> : vector<8x512xf32>
    %168 = tpu.matmul %144, %167, %cst_46 {dimension_numbers = #tpu.dot_dimension_numbers<[1], [0], [0], [1], [0, 0, 1, 1], [], []>} : vector<8x128xbf16>, vector<128x512xbf16>, vector<8x512xf32> -> vector<8x512xf32>
    %169 = arith.addf %166, %168 : vector<8x512xf32>
    %170 = vector.extract_strided_slice %169 {offsets = [0, 0], sizes = [8, 384], strides = [1, 1]} : vector<8x512xf32> to vector<8x384xf32>
    %171 = arith.negf %170 : vector<8x384xf32>
    %172 = math.exp %171 : vector<8x384xf32>
    %cst_47 = arith.constant 1.000000e+00 : f32
    %173 = vector.broadcast %cst_47 : f32 to vector<8x384xf32>
    %174 = arith.addf %173, %172 : vector<8x384xf32>
    %175 = arith.divf %173, %174 : vector<8x384xf32>
    %176 = vector.extract_strided_slice %175 {offsets = [0, 0], sizes = [8, 128], strides = [1, 1]} : vector<8x384xf32> to vector<8x128xf32>
    %177 = vector.extract_strided_slice %175 {offsets = [0, 128], sizes = [8, 128], strides = [1, 1]} : vector<8x384xf32> to vector<8x128xf32>
    %178 = vector.extract_strided_slice %175 {offsets = [0, 256], sizes = [8, 128], strides = [1, 1]} : vector<8x384xf32> to vector<8x128xf32>
    %179 = vector.extract_strided_slice %169 {offsets = [0, 384], sizes = [8, 128], strides = [1, 1]} : vector<8x512xf32> to vector<8x128xf32>
    %180 = math.tanh %179 : vector<8x128xf32>
    %181 = arith.mulf %177, %141 : vector<8x128xf32>
    %182 = arith.mulf %176, %180 : vector<8x128xf32>
    %183 = arith.addf %181, %182 : vector<8x128xf32>
    %184 = math.tanh %183 : vector<8x128xf32>
    %185 = arith.mulf %178, %184 : vector<8x128xf32>
    %186 = arith.truncf %185 : vector<8x128xf32> to vector<8x128xbf16>
    %187 = vector.extract_strided_slice %165 {offsets = [0, 0], sizes = [8, 384], strides = [1, 1]} : vector<8x512xf32> to vector<8x384xf32>
    %188 = arith.negf %187 : vector<8x384xf32>
    %189 = math.exp %188 : vector<8x384xf32>
    %cst_48 = arith.constant 1.000000e+00 : f32
    %190 = vector.broadcast %cst_48 : f32 to vector<8x384xf32>
    %191 = arith.addf %190, %189 : vector<8x384xf32>
    %192 = arith.divf %190, %191 : vector<8x384xf32>
    %193 = vector.extract_strided_slice %192 {offsets = [0, 0], sizes = [8, 128], strides = [1, 1]} : vector<8x384xf32> to vector<8x128xf32>
    %194 = vector.extract_strided_slice %192 {offsets = [0, 128], sizes = [8, 128], strides = [1, 1]} : vector<8x384xf32> to vector<8x128xf32>
    %195 = vector.extract_strided_slice %192 {offsets = [0, 256], sizes = [8, 128], strides = [1, 1]} : vector<8x384xf32> to vector<8x128xf32>
    %196 = vector.extract_strided_slice %165 {offsets = [0, 384], sizes = [8, 128], strides = [1, 1]} : vector<8x512xf32> to vector<8x128xf32>
    %197 = math.tanh %196 : vector<8x128xf32>
    %198 = arith.mulf %194, %158 : vector<8x128xf32>
    %199 = arith.mulf %193, %197 : vector<8x128xf32>
    %200 = arith.addf %198, %199 : vector<8x128xf32>
    %201 = math.tanh %200 : vector<8x128xf32>
    %202 = arith.mulf %195, %201 : vector<8x128xf32>
    %203 = arith.truncf %202 : vector<8x128xf32> to vector<8x128xbf16>
    %204 = tpu.concatenate %186, %203 in 1 : vector<8x128xbf16>, vector<8x128xbf16> -> vector<8x256xbf16>
    %c0_49 = arith.constant 0 : index
    %c0_50 = arith.constant 0 : index
    %205 = vector.load %arg7[%c0_49, %c0_50] : memref<256x512xbf16, #tpu.memory_space<vmem>>, vector<256x512xbf16>
    %cst_51 = arith.constant dense<0.000000e+00> : vector<8x512xf32>
    %206 = tpu.matmul %204, %205, %cst_51 {dimension_numbers = #tpu.dot_dimension_numbers<[1], [0], [0], [1], [0, 0, 1, 1], [], []>} : vector<8x256xbf16>, vector<256x512xbf16>, vector<8x512xf32> -> vector<8x512xf32>
    %207 = arith.addf %206, %13 : vector<8x512xf32>
    %c40 = arith.constant 40 : index
    %c0_52 = arith.constant 0 : index
    %208 = vector.load %arg6[%c40, %c0_52] : memref<64x512xf32, #tpu.memory_space<vmem>>, vector<8x512xf32>
    %c32_53 = arith.constant 32 : index
    %c0_54 = arith.constant 0 : index
    %209 = vector.load %arg1[%c32_53, %c0_54] : memref<160x512xbf16, #tpu.memory_space<vmem>>, vector<128x512xbf16>
    %cst_55 = arith.constant dense<0.000000e+00> : vector<8x512xf32>
    %210 = tpu.matmul %186, %209, %cst_55 {dimension_numbers = #tpu.dot_dimension_numbers<[1], [0], [0], [1], [0, 0, 1, 1], [], []>} : vector<8x128xbf16>, vector<128x512xbf16>, vector<8x512xf32> -> vector<8x512xf32>
    %211 = arith.addf %208, %210 : vector<8x512xf32>
    %212 = vector.extract_strided_slice %211 {offsets = [0, 0], sizes = [8, 384], strides = [1, 1]} : vector<8x512xf32> to vector<8x384xf32>
    %213 = arith.negf %212 : vector<8x384xf32>
    %214 = math.exp %213 : vector<8x384xf32>
    %cst_56 = arith.constant 1.000000e+00 : f32
    %215 = vector.broadcast %cst_56 : f32 to vector<8x384xf32>
    %216 = arith.addf %215, %214 : vector<8x384xf32>
    %217 = arith.divf %215, %216 : vector<8x384xf32>
    %218 = vector.extract_strided_slice %217 {offsets = [0, 0], sizes = [8, 128], strides = [1, 1]} : vector<8x384xf32> to vector<8x128xf32>
    %219 = vector.extract_strided_slice %217 {offsets = [0, 128], sizes = [8, 128], strides = [1, 1]} : vector<8x384xf32> to vector<8x128xf32>
    %220 = vector.extract_strided_slice %217 {offsets = [0, 256], sizes = [8, 128], strides = [1, 1]} : vector<8x384xf32> to vector<8x128xf32>
    %221 = vector.extract_strided_slice %211 {offsets = [0, 384], sizes = [8, 128], strides = [1, 1]} : vector<8x512xf32> to vector<8x128xf32>
    %222 = math.tanh %221 : vector<8x128xf32>
    %223 = arith.mulf %219, %183 : vector<8x128xf32>
    %224 = arith.mulf %218, %222 : vector<8x128xf32>
    %225 = arith.addf %223, %224 : vector<8x128xf32>
    %226 = math.tanh %225 : vector<8x128xf32>
    %227 = arith.mulf %220, %226 : vector<8x128xf32>
    %228 = arith.truncf %227 : vector<8x128xf32> to vector<8x128xbf16>
    %229 = vector.extract_strided_slice %207 {offsets = [0, 0], sizes = [8, 384], strides = [1, 1]} : vector<8x512xf32> to vector<8x384xf32>
    %230 = arith.negf %229 : vector<8x384xf32>
    %231 = math.exp %230 : vector<8x384xf32>
    %cst_57 = arith.constant 1.000000e+00 : f32
    %232 = vector.broadcast %cst_57 : f32 to vector<8x384xf32>
    %233 = arith.addf %232, %231 : vector<8x384xf32>
    %234 = arith.divf %232, %233 : vector<8x384xf32>
    %235 = vector.extract_strided_slice %234 {offsets = [0, 0], sizes = [8, 128], strides = [1, 1]} : vector<8x384xf32> to vector<8x128xf32>
    %236 = vector.extract_strided_slice %234 {offsets = [0, 128], sizes = [8, 128], strides = [1, 1]} : vector<8x384xf32> to vector<8x128xf32>
    %237 = vector.extract_strided_slice %234 {offsets = [0, 256], sizes = [8, 128], strides = [1, 1]} : vector<8x384xf32> to vector<8x128xf32>
    %238 = vector.extract_strided_slice %207 {offsets = [0, 384], sizes = [8, 128], strides = [1, 1]} : vector<8x512xf32> to vector<8x128xf32>
    %239 = math.tanh %238 : vector<8x128xf32>
    %240 = arith.mulf %236, %200 : vector<8x128xf32>
    %241 = arith.mulf %235, %239 : vector<8x128xf32>
    %242 = arith.addf %240, %241 : vector<8x128xf32>
    %243 = math.tanh %242 : vector<8x128xf32>
    %244 = arith.mulf %237, %243 : vector<8x128xf32>
    %245 = arith.truncf %244 : vector<8x128xf32> to vector<8x128xbf16>
    %246 = tpu.concatenate %228, %245 in 1 : vector<8x128xbf16>, vector<8x128xbf16> -> vector<8x256xbf16>
    %c0_58 = arith.constant 0 : index
    %c0_59 = arith.constant 0 : index
    %247 = vector.load %arg7[%c0_58, %c0_59] : memref<256x512xbf16, #tpu.memory_space<vmem>>, vector<256x512xbf16>
    %cst_60 = arith.constant dense<0.000000e+00> : vector<8x512xf32>
    %248 = tpu.matmul %246, %247, %cst_60 {dimension_numbers = #tpu.dot_dimension_numbers<[1], [0], [0], [1], [0, 0, 1, 1], [], []>} : vector<8x256xbf16>, vector<256x512xbf16>, vector<8x512xf32> -> vector<8x512xf32>
    %249 = arith.addf %248, %13 : vector<8x512xf32>
    %c48 = arith.constant 48 : index
    %c0_61 = arith.constant 0 : index
    %250 = vector.load %arg6[%c48, %c0_61] : memref<64x512xf32, #tpu.memory_space<vmem>>, vector<8x512xf32>
    %c32_62 = arith.constant 32 : index
    %c0_63 = arith.constant 0 : index
    %251 = vector.load %arg1[%c32_62, %c0_63] : memref<160x512xbf16, #tpu.memory_space<vmem>>, vector<128x512xbf16>
    %cst_64 = arith.constant dense<0.000000e+00> : vector<8x512xf32>
    %252 = tpu.matmul %228, %251, %cst_64 {dimension_numbers = #tpu.dot_dimension_numbers<[1], [0], [0], [1], [0, 0, 1, 1], [], []>} : vector<8x128xbf16>, vector<128x512xbf16>, vector<8x512xf32> -> vector<8x512xf32>
    %253 = arith.addf %250, %252 : vector<8x512xf32>
    %254 = vector.extract_strided_slice %253 {offsets = [0, 0], sizes = [8, 384], strides = [1, 1]} : vector<8x512xf32> to vector<8x384xf32>
    %255 = arith.negf %254 : vector<8x384xf32>
    %256 = math.exp %255 : vector<8x384xf32>
    %cst_65 = arith.constant 1.000000e+00 : f32
    %257 = vector.broadcast %cst_65 : f32 to vector<8x384xf32>
    %258 = arith.addf %257, %256 : vector<8x384xf32>
    %259 = arith.divf %257, %258 : vector<8x384xf32>
    %260 = vector.extract_strided_slice %259 {offsets = [0, 0], sizes = [8, 128], strides = [1, 1]} : vector<8x384xf32> to vector<8x128xf32>
    %261 = vector.extract_strided_slice %259 {offsets = [0, 128], sizes = [8, 128], strides = [1, 1]} : vector<8x384xf32> to vector<8x128xf32>
    %262 = vector.extract_strided_slice %259 {offsets = [0, 256], sizes = [8, 128], strides = [1, 1]} : vector<8x384xf32> to vector<8x128xf32>
    %263 = vector.extract_strided_slice %253 {offsets = [0, 384], sizes = [8, 128], strides = [1, 1]} : vector<8x512xf32> to vector<8x128xf32>
    %264 = math.tanh %263 : vector<8x128xf32>
    %265 = arith.mulf %261, %225 : vector<8x128xf32>
    %266 = arith.mulf %260, %264 : vector<8x128xf32>
    %267 = arith.addf %265, %266 : vector<8x128xf32>
    %268 = math.tanh %267 : vector<8x128xf32>
    %269 = arith.mulf %262, %268 : vector<8x128xf32>
    %270 = arith.truncf %269 : vector<8x128xf32> to vector<8x128xbf16>
    %271 = vector.extract_strided_slice %249 {offsets = [0, 0], sizes = [8, 384], strides = [1, 1]} : vector<8x512xf32> to vector<8x384xf32>
    %272 = arith.negf %271 : vector<8x384xf32>
    %273 = math.exp %272 : vector<8x384xf32>
    %cst_66 = arith.constant 1.000000e+00 : f32
    %274 = vector.broadcast %cst_66 : f32 to vector<8x384xf32>
    %275 = arith.addf %274, %273 : vector<8x384xf32>
    %276 = arith.divf %274, %275 : vector<8x384xf32>
    %277 = vector.extract_strided_slice %276 {offsets = [0, 0], sizes = [8, 128], strides = [1, 1]} : vector<8x384xf32> to vector<8x128xf32>
    %278 = vector.extract_strided_slice %276 {offsets = [0, 128], sizes = [8, 128], strides = [1, 1]} : vector<8x384xf32> to vector<8x128xf32>
    %279 = vector.extract_strided_slice %276 {offsets = [0, 256], sizes = [8, 128], strides = [1, 1]} : vector<8x384xf32> to vector<8x128xf32>
    %280 = vector.extract_strided_slice %249 {offsets = [0, 384], sizes = [8, 128], strides = [1, 1]} : vector<8x512xf32> to vector<8x128xf32>
    %281 = math.tanh %280 : vector<8x128xf32>
    %282 = arith.mulf %278, %242 : vector<8x128xf32>
    %283 = arith.mulf %277, %281 : vector<8x128xf32>
    %284 = arith.addf %282, %283 : vector<8x128xf32>
    %285 = math.tanh %284 : vector<8x128xf32>
    %286 = arith.mulf %279, %285 : vector<8x128xf32>
    %287 = arith.truncf %286 : vector<8x128xf32> to vector<8x128xbf16>
    %288 = tpu.concatenate %270, %287 in 1 : vector<8x128xbf16>, vector<8x128xbf16> -> vector<8x256xbf16>
    %c0_67 = arith.constant 0 : index
    %c0_68 = arith.constant 0 : index
    %289 = vector.load %arg7[%c0_67, %c0_68] : memref<256x512xbf16, #tpu.memory_space<vmem>>, vector<256x512xbf16>
    %cst_69 = arith.constant dense<0.000000e+00> : vector<8x512xf32>
    %290 = tpu.matmul %288, %289, %cst_69 {dimension_numbers = #tpu.dot_dimension_numbers<[1], [0], [0], [1], [0, 0, 1, 1], [], []>} : vector<8x256xbf16>, vector<256x512xbf16>, vector<8x512xf32> -> vector<8x512xf32>
    %291 = arith.addf %290, %13 : vector<8x512xf32>
    %c56 = arith.constant 56 : index
    %c0_70 = arith.constant 0 : index
    %292 = vector.load %arg6[%c56, %c0_70] : memref<64x512xf32, #tpu.memory_space<vmem>>, vector<8x512xf32>
    %c32_71 = arith.constant 32 : index
    %c0_72 = arith.constant 0 : index
    %293 = vector.load %arg1[%c32_71, %c0_72] : memref<160x512xbf16, #tpu.memory_space<vmem>>, vector<128x512xbf16>
    %cst_73 = arith.constant dense<0.000000e+00> : vector<8x512xf32>
    %294 = tpu.matmul %270, %293, %cst_73 {dimension_numbers = #tpu.dot_dimension_numbers<[1], [0], [0], [1], [0, 0, 1, 1], [], []>} : vector<8x128xbf16>, vector<128x512xbf16>, vector<8x512xf32> -> vector<8x512xf32>
    %295 = arith.addf %292, %294 : vector<8x512xf32>
    %296 = vector.extract_strided_slice %295 {offsets = [0, 0], sizes = [8, 384], strides = [1, 1]} : vector<8x512xf32> to vector<8x384xf32>
    %297 = arith.negf %296 : vector<8x384xf32>
    %298 = math.exp %297 : vector<8x384xf32>
    %cst_74 = arith.constant 1.000000e+00 : f32
    %299 = vector.broadcast %cst_74 : f32 to vector<8x384xf32>
    %300 = arith.addf %299, %298 : vector<8x384xf32>
    %301 = arith.divf %299, %300 : vector<8x384xf32>
    %302 = vector.extract_strided_slice %301 {offsets = [0, 0], sizes = [8, 128], strides = [1, 1]} : vector<8x384xf32> to vector<8x128xf32>
    %303 = vector.extract_strided_slice %301 {offsets = [0, 128], sizes = [8, 128], strides = [1, 1]} : vector<8x384xf32> to vector<8x128xf32>
    %304 = vector.extract_strided_slice %301 {offsets = [0, 256], sizes = [8, 128], strides = [1, 1]} : vector<8x384xf32> to vector<8x128xf32>
    %305 = vector.extract_strided_slice %295 {offsets = [0, 384], sizes = [8, 128], strides = [1, 1]} : vector<8x512xf32> to vector<8x128xf32>
    %306 = math.tanh %305 : vector<8x128xf32>
    %307 = arith.mulf %303, %267 : vector<8x128xf32>
    %308 = arith.mulf %302, %306 : vector<8x128xf32>
    %309 = arith.addf %307, %308 : vector<8x128xf32>
    %310 = math.tanh %309 : vector<8x128xf32>
    %311 = arith.mulf %304, %310 : vector<8x128xf32>
    %312 = arith.truncf %311 : vector<8x128xf32> to vector<8x128xbf16>
    %313 = vector.extract_strided_slice %291 {offsets = [0, 0], sizes = [8, 384], strides = [1, 1]} : vector<8x512xf32> to vector<8x384xf32>
    %314 = arith.negf %313 : vector<8x384xf32>
    %315 = math.exp %314 : vector<8x384xf32>
    %cst_75 = arith.constant 1.000000e+00 : f32
    %316 = vector.broadcast %cst_75 : f32 to vector<8x384xf32>
    %317 = arith.addf %316, %315 : vector<8x384xf32>
    %318 = arith.divf %316, %317 : vector<8x384xf32>
    %319 = vector.extract_strided_slice %318 {offsets = [0, 0], sizes = [8, 128], strides = [1, 1]} : vector<8x384xf32> to vector<8x128xf32>
    %320 = vector.extract_strided_slice %318 {offsets = [0, 128], sizes = [8, 128], strides = [1, 1]} : vector<8x384xf32> to vector<8x128xf32>
    %321 = vector.extract_strided_slice %318 {offsets = [0, 256], sizes = [8, 128], strides = [1, 1]} : vector<8x384xf32> to vector<8x128xf32>
    %322 = vector.extract_strided_slice %291 {offsets = [0, 384], sizes = [8, 128], strides = [1, 1]} : vector<8x512xf32> to vector<8x128xf32>
    %323 = math.tanh %322 : vector<8x128xf32>
    %324 = arith.mulf %320, %284 : vector<8x128xf32>
    %325 = arith.mulf %319, %323 : vector<8x128xf32>
    %326 = arith.addf %324, %325 : vector<8x128xf32>
    %327 = math.tanh %326 : vector<8x128xf32>
    %328 = arith.mulf %321, %327 : vector<8x128xf32>
    %329 = arith.truncf %328 : vector<8x128xf32> to vector<8x128xbf16>
    %330 = tpu.concatenate %312, %329 in 1 : vector<8x128xbf16>, vector<8x128xbf16> -> vector<8x256xbf16>
    %c0_76 = arith.constant 0 : index
    %c0_77 = arith.constant 0 : index
    %331 = vector.load %arg7[%c0_76, %c0_77] : memref<256x512xbf16, #tpu.memory_space<vmem>>, vector<256x512xbf16>
    %cst_78 = arith.constant dense<0.000000e+00> : vector<8x512xf32>
    %332 = tpu.matmul %330, %331, %cst_78 {dimension_numbers = #tpu.dot_dimension_numbers<[1], [0], [0], [1], [0, 0, 1, 1], [], []>} : vector<8x256xbf16>, vector<256x512xbf16>, vector<8x512xf32> -> vector<8x512xf32>
    %333 = arith.addf %332, %13 : vector<8x512xf32>
    %334 = vector.extract_strided_slice %333 {offsets = [0, 0], sizes = [8, 384], strides = [1, 1]} : vector<8x512xf32> to vector<8x384xf32>
    %335 = arith.negf %334 : vector<8x384xf32>
    %336 = math.exp %335 : vector<8x384xf32>
    %cst_79 = arith.constant 1.000000e+00 : f32
    %337 = vector.broadcast %cst_79 : f32 to vector<8x384xf32>
    %338 = arith.addf %337, %336 : vector<8x384xf32>
    %339 = arith.divf %337, %338 : vector<8x384xf32>
    %340 = vector.extract_strided_slice %339 {offsets = [0, 0], sizes = [8, 128], strides = [1, 1]} : vector<8x384xf32> to vector<8x128xf32>
    %341 = vector.extract_strided_slice %339 {offsets = [0, 128], sizes = [8, 128], strides = [1, 1]} : vector<8x384xf32> to vector<8x128xf32>
    %342 = vector.extract_strided_slice %339 {offsets = [0, 256], sizes = [8, 128], strides = [1, 1]} : vector<8x384xf32> to vector<8x128xf32>
    %343 = vector.extract_strided_slice %333 {offsets = [0, 384], sizes = [8, 128], strides = [1, 1]} : vector<8x512xf32> to vector<8x128xf32>
    %344 = math.tanh %343 : vector<8x128xf32>
    %345 = arith.mulf %341, %326 : vector<8x128xf32>
    %346 = arith.mulf %340, %344 : vector<8x128xf32>
    %347 = arith.addf %345, %346 : vector<8x128xf32>
    %348 = math.tanh %347 : vector<8x128xf32>
    %349 = arith.mulf %342, %348 : vector<8x128xf32>
    %c1_i32_80 = arith.constant 1 : i32
    %350 = tpu.memref_slice %arg9[%c1_i32_80] : memref<2x!tpu.dma_semaphore, #tpu.memory_space<semaphore_mem>> -> memref<1x!tpu.dma_semaphore, #tpu.memory_space<semaphore_mem>>
    %351 = tpu.memref_squeeze %350 : memref<1x!tpu.dma_semaphore, #tpu.memory_space<semaphore_mem>> -> memref<!tpu.dma_semaphore, #tpu.memory_space<semaphore_mem>>
    tpu.wait_dma2 semaphore(%351 : memref<!tpu.dma_semaphore, #tpu.memory_space<semaphore_mem>>) src(%arg4 : memref<128x128xbf16, #tpu.memory_space<any>>) dst(%arg8 : memref<128x128xbf16, #tpu.memory_space<vmem>>)
    %352 = arith.truncf %349 : vector<8x128xf32> to vector<8x128xbf16>
    %c0_81 = arith.constant 0 : index
    %c0_82 = arith.constant 0 : index
    %353 = vector.load %arg8[%c0_81, %c0_82] : memref<128x128xbf16, #tpu.memory_space<vmem>>, vector<128x128xbf16>
    %cst_83 = arith.constant dense<0.000000e+00> : vector<8x128xf32>
    %354 = tpu.matmul %352, %353, %cst_83 {dimension_numbers = #tpu.dot_dimension_numbers<[1], [0], [0], [1], [0, 0, 1, 1], [], []>} : vector<8x128xbf16>, vector<128x128xbf16>, vector<8x128xf32> -> vector<8x128xf32>
    %c2 = arith.constant 2 : index
    %c0_84 = arith.constant 0 : index
    %355 = vector.load %arg2[%c2, %c0_84] : memref<3x512xf32, #tpu.memory_space<vmem>>, vector<1x128xf32>
    %356 = vector.broadcast %355 : vector<1x128xf32> to vector<8x128xf32>
    %357 = arith.addf %354, %356 : vector<8x128xf32>
    %c0_85 = arith.constant 0 : index
    %c0_86 = arith.constant 0 : index
    %358 = vector.load %arg5[%c0_85, %c0_86] : memref<8x128xf32, #tpu.memory_space<vmem>>, vector<8x128xf32>
    tpu.vector_store %arg5[%c0_85, %c0_86], %357 {strides = array<i32>} : memref<8x128xf32, #tpu.memory_space<vmem>>, vector<8x128xf32>,
    return
  }
}

</mosaic_0001>

<bundles_post_ra>
// kernel: rnn_forward.1
= control target key start
LH: loop header
LB: loop body
LE: loop exit
PB: predicated region body
PF: predicated region fallthrough
CT: control target
= control target key end

     0   :  { %10 = vsyncpa [#allocation7], 0  ;;  %s3156_s18 = smov [#allocation6]   ;;  %s4739_s0 = inlined_call_operand.vmem [shape: bf16[64,32], index: 0, kind: input, shape index: {}]   ;;  %s4740_s1 = inlined_call_operand.hbm [shape: bf16[160,512], index: 1, kind: input, shape index: {}]   ;;  %s4741_s2 = inlined_call_operand.vmem [shape: f32[3,512], index: 2, kind: input, shape index: {}]   ;;  %s4742_s3 = inlined_call_operand.hbm [shape: bf16[256,512], index: 3, kind: input, shape index: {}]   ;;  %s4743_s4 = inlined_call_operand.vmem [shape: bf16[128,128], index: 4, kind: input, shape index: {}]   ;;  %s4744_s5 = inlined_call_operand.vmem [shape: f32[8,128], index: 5, kind: output, shape index: {}]  }
   0x1   :  { %s18_s19 = sshll.u32 %s3156_s18, 4  ;;  %s3128_s22 = scalar_lea.hbm %s4740_s1, 5120  ;;  %s19_s19 = int_to_ptr.vmem [resolvable:$true] %s18_s19 }
   0x2   :  { %p3129_p0 = scmp.ne.s32.totalorder %s4740_s1, %s3128_s22  ;;  %p3132_p1 = scmp.lt.u32.totalorder %s3128_s22, %s4740_s1 }
   0x4   :  { %p3134_p2 = pnand %p3132_p1, %p3129_p0 }
   0x6   :  { %3137 = shalt.err (!%p3134_p2)
}
   0x7   :  { %s3138_s27 = scalar_lea.vmem %s19_s19, 5120  ;;  %p3143_p4 = scmp.lt.s32.totalorder %s19_s19, %s19_s19 }
   0x8   :  { %p3139_p3 = scmp.ne.s32.totalorder %s19_s19, %s3138_s27  ;;  %p3144_p5 = scmp.lt.s32.totalorder %s3138_s27, %s3138_s27 }
   0xa   :  { %p3145_p6 = por %p3144_p5, %p3143_p4 }
   0xc   :  { %p3146_p7 = pnand %p3145_p6, %p3139_p3 }
   0xe   :  { %3149 = shalt.err (!%p3146_p7)
}
   0xf   :  { %s3157_s28 = smov 256   ;;  %s3158_s29 = smov 16  }
  0x10   :  { %24 = dma.hbm_to_vmem [thread:$0]  %s4740_s1, 5120, %s19_s19, [#allocation7], %s3157_s28, %s3157_s28, %s3158_s29  }
  0x11   :  { %3150 = dma.done.wait [#allocation7], 5120  }
  0x12   :  { %3151 = vsyncadd [#allocation7], 4294962176  ;;  %s35_s7 = sld [smem:[#allocation0]]   ;;  %s3159_s8 = smov 512  }
  0x13   :  { %47 = sst [smem:[#allocation9]] %s3159_s8  ;;  %s3160_s9 = smov 4  }
  0x14   :  { %49 = sst [smem:[#allocation9 + $0x1]] %s3159_s8  ;;  %s3161_s10 = smov 64  }
  0x15   :  { %51 = sst [smem:[#allocation9 + $0x2]] %s3160_s9  ;;  %s3162_s11 = smov 128  }
  0x16   :  { %53 = sst [smem:[#allocation9 + $0x3]] %s3161_s10  ;;  %s3163_s12 = smov 2  }
  0x17   :  { %55 = sst [smem:[#allocation9 + $0x4]] %s3162_s11  ;;  %s3164_s13 = smov [#allocation3]  }
  0x18   :  { %57 = sst [smem:[#allocation9 + $0x5]] %s3163_s12  ;;  %s43_s14 = sshll.u32 %s3164_s13, 4  ;;  %s44_s14 = int_to_ptr.vmem [resolvable:$true] %s43_s14 }
  0x19   :  { %s2469_s15 = sshll.u32 %s35_s7, 26  ;;  %59 = sst [smem:[#allocation9 + $0x6]] %s3157_s28 }
  0x1a   :  { %s2470_s16 = sadd.s32 134217728, %s2469_s15  ;;  %61 = sst [smem:[#allocation9 + $0x7]] %s3161_s10 }
  0x1b   :  { %63 = sst [smem:[#allocation9 + $0x8]] %s3160_s9  ;;  %s3165_s1 = smov [#allocation5]  }
  0x1c   :  { %s3166_s17 = smov [#allocation8]  }
  0x1d   :  { %65 = dma.general %s4742_s3, 8192, %s44_s14, %s3165_s1, %s3166_s17, [#allocation9], %s2470_s16, 0  }
  0x1e   :  { %v3218_v0 = vld [vmem:[%s4743_s4] sm:$0xff]  ;;  %v3223_v1 = vld [vmem:[%s4743_s4 + $0x8] sm:$0xff]  ;;  %v3228_v2 = vld [vmem:[%s4743_s4 + $0x10] sm:$0xff] }
  0x1f   :  { %4944 = vst [vmem:[#allocation14_spill] sm:$0xff] %v3218_v0  ;;  %4945 = vst [vmem:[#allocation15_spill] sm:$0xff] %v3223_v1  ;;  %v3233_v3 = vld [vmem:[%s4743_s4 + $0x18] sm:$0xff]  ;;  %v3238_v4 = vld [vmem:[%s4743_s4 + $0x20] sm:$0xff] }
  0x20   :  { %4946 = vst [vmem:[#allocation16_spill] sm:$0xff] %v3228_v2  ;;  %4947 = vst [vmem:[#allocation17_spill] sm:$0xff] %v3233_v3  ;;  %v3243_v5 = vld [vmem:[%s4743_s4 + $0x28] sm:$0xff]  ;;  %v3248_v6 = vld [vmem:[%s4743_s4 + $0x30] sm:$0xff] }
  0x21   :  { %4948 = vst [vmem:[#allocation18_spill] sm:$0xff] %v3238_v4  ;;  %4949 = vst [vmem:[#allocation19_spill] sm:$0xff] %v3243_v5  ;;  %v3253_v7 = vld [vmem:[%s4743_s4 + $0x38] sm:$0xff] }
  0x22   :  { %4950 = vst [vmem:[#allocation20_spill] sm:$0xff] %v3248_v6  ;;  %4951 = vst [vmem:[#allocation21_spill] sm:$0xff] %v3253_v7 }
  0x23   :  { %122 = vsyncadd [#allocation5 + $0x1], 1024  ;;  %v2618_v8 = vld [vmem:[#allocation6 + $0x4] ss:$16 sps:$4 sm:$0xff]   ;;  %v2620_v9 = vld [vmem:[#allocation6] ss:$16 sps:$4 sm:$0xff]   ;;  %v141_v21 = vlaneseq }
  0x24   :  { %v4745_v10 = vmov 0   ;;  %v2621_v11 = vld [vmem:[#allocation6 + $0x24] ss:$16 sps:$4 sm:$0xff]   ;;  %234 = vmatprep.subr.bf16.mxu0 %v2618_v8  ;;  %v2623_v12 = vld [vmem:[#allocation6 + $0x20] ss:$16 sps:$4 sm:$0xff]   ;;  %vm221_vm0 = vcmask 261120  }
  0x25   :  { %266 = vmatprep.mubr.bf16.mxu0 %v4745_v10  ;;  %339 = vmatprep.mubr.bf16.mxu1 %v4745_v10  ;;  %v2625_v13 = vld [vmem:[#allocation6 + $0xc] ss:$16 sps:$4 sm:$0xff]   ;;  %v2627_v14 = vld [vmem:[#allocation6 + $0x8] ss:$16 sps:$4 sm:$0xff]   ;;  %v2624_v15 = vld [vmem:[%s4739_s0] sm:$0xff]   ;;  %v142_v22 = vshrl.u32 %v141_v21, 7 }
  0x26   :  { %235 = vmatpush1.bf16.msra.mxu0 %v2620_v9  ;;  %307 = vmatprep.subr.bf16.mxu1 %v2625_v13  ;;  %v2628_v16 = vld [vmem:[#allocation6 + $0x2c] ss:$16 sps:$4 sm:$0xff]   ;;  %v2630_v17 = vld [vmem:[#allocation6 + $0x28] ss:$16 sps:$4 sm:$0xff]   ;;  %v2632_v19 = vld [vmem:[%s4739_s0 + $0x10] sm:$0xff]  }
  0x27   :  { %236 = vmatprep.subr.bf16.mxu0 %v2621_v11  ;;  %308 = vmatpush1.bf16.msra.mxu1 %v2627_v14  ;;  %v2631_v18 = vld [vmem:[%s4739_s0 + $0x8] sm:$0xff]   ;;  %v2633_v20 = vld [vmem:[%s4739_s0 + $0x18] sm:$0xff]   ;;  %v143_v23 = vsub.s32 0, %v142_v22  ;;  %v147_v26 = vsub.s32 1, %v142_v22  ;;  %v151_v28 = vsub.s32 2, %v142_v22  ;;  %v155_v29 = vsub.s32 3, %v142_v22 }
  0x28   :  { %309 = vmatprep.subr.bf16.mxu1 %v2628_v16  ;;  %v2491_v24 = vld [vmem:[%s4741_s2 + $0x1] ss:$4 sm:$0xf]  ;;  %v139_v32 = vld [vmem:[%s4741_s2] ss:$4 sm:$0xf] }
  0x29   :  { %v3286_v25 = vrot.slane %v2491_v24, %v143_v23  ;;  %v3288_v27 = vrot.slane %v2491_v24, %v147_v26  ;;  %v3290_v30 = vrot.slane %v2491_v24, %v151_v28  ;;  %v3292_v31 = vrot.slane %v2491_v24, %v155_v29 }
  0x2a   :  { %237 = vmatpush1.bf16.msra.mxu0 %v2623_v12  ;;  %v3297_v33 = vrot.slane %v139_v32, %v143_v23  ;;  %v3299_v34 = vrot.slane %v139_v32, %v147_v26  ;;  %v3303_v40 = vrot.slane %v139_v32, %v151_v28  ;;  %v3308_v45 = vrot.slane %v139_v32, %v155_v29 }
  0x2b   :  { %310 = vmatpush1.bf16.msra.mxu1 %v2630_v17  ;;  %4952 = vst [vmem:[#allocation22_spill] sm:$0xff] %v3286_v25  ;;  %4953 = vst [vmem:[#allocation23_spill] sm:$0xff] %v3288_v27 }
  0x2c   :  { %4954 = vst [vmem:[#allocation24_spill] sm:$0xff] %v3290_v30  ;;  %4955 = vst [vmem:[#allocation25_spill] sm:$0xff] %v3292_v31 }
  0x2d   :  { %2483 = vmatmul.mubr.msk.bf16.vlgmr.msra.gmra.mrb[0].mxu0 %vm221_vm0, %v2624_v15 }
  0x2e   :  { %276 = vmatprep.mubr.bf16.mxu0 %v4745_v10  ;;  %2487 = vmatmul.mubr.msk.bf16.vlgmr.msra.gmra.mrb[0].mxu1 %vm221_vm0, %v2624_v15 }
  0x2f   :  { %349 = vmatprep.mubr.bf16.mxu1 %v4745_v10 }
  0x35   :  { %2484 = vmatmul.mubr.msk.bf16.gmra.mrb[4].mxu0 %vm221_vm0, %v2631_v18 }
  0x36   :  { %286 = vmatprep.mubr.bf16.mxu0 %v4745_v10  ;;  %2488 = vmatmul.mubr.msk.bf16.gmra.mrb[4].mxu1 %vm221_vm0, %v2631_v18 }
  0x37   :  { %359 = vmatprep.mubr.bf16.mxu1 %v4745_v10 }
  0x3d   :  { %2485 = vmatmul.mubr.msk.bf16.gmra.mrb[8].mxu0 %vm221_vm0, %v2632_v19 }
  0x3e   :  { %296 = vmatprep.mubr.bf16.mxu0 %v4745_v10  ;;  %2489 = vmatmul.mubr.msk.bf16.gmra.mrb[8].mxu1 %vm221_vm0, %v2632_v19 }
  0x3f   :  { %369 = vmatprep.mubr.bf16.mxu1 %v4745_v10 }
  0x45   :  { %2486 = vmatmul.mubr.msk.bf16.gmra.mrb[12].mxu0 %vm221_vm0, %v2633_v20 }
  0x46   :  { %2490 = vmatmul.mubr.msk.bf16.gmra.mrb[12].mxu1 %vm221_vm0, %v2633_v20 }
 0x100   :  { %v268_v35 = vpop.f32.mrb[0].mxu0 }
 0x101   :  { %v269_v36 = vadd.f32 %v268_v35, %v3297_v33  ;;  %v270_v37 = vpop.f32.mrb[1].mxu0  ;;  %v341_v44 = vpop.f32.mrb[0].mxu1 }
 0x102   :  { %v271_v38 = vadd.f32 %v270_v37, %v3299_v34  ;;  %v272_v39 = vpop.f32.mrb[2].mxu0  ;;  %v343_v48 = vpop.f32.mrb[1].mxu1  ;;  %v342_v52 = vadd.f32 %v341_v44, %v3303_v40 }
 0x103   :  { %v2492_v41 = vmul.f32 -1.442695, %v269_v36  ;;  %v3306_v42 = vadd.f32 %v272_v39, %v3297_v33  ;;  %v274_v43 = vpop.f32.mrb[3].mxu0  ;;  %v345_v49 = vpop.f32.mrb[2].mxu1  ;;  %v344_v63 = vadd.f32 %v343_v48, %v3308_v45 }
 0x104   :  { %v2493_v46 = vmul.f32 -1.442695, %v271_v38  ;;  %v3311_v47 = vadd.f32 %v274_v43, %v3299_v34  ;;  %v3314_v50 = vadd.f32 %v345_v49, %v3303_v40  ;;  %v347_v51 = vpop.f32.mrb[3].mxu1  ;;  %v2494_v59 = vmul.f32 -1.442695, %v342_v52 }
 0x105   :  { %4956 = vst [vmem:[#allocation26_spill] sm:$0xff] %v3306_v42  ;;  %2634 = vpow2.f32 %v2492_v41  ;;  %v3318_v53 = vadd.f32 %v347_v51, %v3308_v45 }
 0x106   :  { %4957 = vst [vmem:[#allocation27_spill] sm:$0xff] %v3311_v47  ;;  %2636 = vpow2.f32 %v2493_v46  ;;  %4958 = vst [vmem:[#allocation28_spill] sm:$0xff] %v3314_v50 }
 0x107   :  { %4959 = vst [vmem:[#allocation29_spill] sm:$0xff] %v3318_v53  ;;  %2638 = vpow2.f32 %v2494_v59 }
 0x108   :  { %v278_v54 = vpop.f32.mrb[4].mxu0  ;;  %2640 = vtanh.f32 %v344_v63 }
 0x109   :  { %v3321_v55 = vadd.f32 %v278_v54, %v3297_v33  ;;  %v280_v56 = vpop.f32.mrb[5].mxu0  ;;  %v351_v60 = vpop.f32.mrb[4].mxu1 }
 0x10a   :  { %v3324_v57 = vadd.f32 %v280_v56, %v3299_v34  ;;  %v282_v58 = vpop.f32.mrb[6].mxu0  ;;  %v3331_v8 = vadd.f32 %v351_v60, %v3303_v40  ;;  %v353_v9 = vpop.f32.mrb[5].mxu1 }
 0x10b   :  { %4960 = vst [vmem:[#allocation30_spill] sm:$0xff] %v3321_v55  ;;  %v3327_v61 = vadd.f32 %v282_v58, %v3297_v33  ;;  %v284_v62 = vpop.f32.mrb[7].mxu0  ;;  %v3337_v12 = vadd.f32 %v353_v9, %v3308_v45  ;;  %v355_v13 = vpop.f32.mrb[6].mxu1 }
 0x10c   :  { %4961 = vst [vmem:[#allocation31_spill] sm:$0xff] %v3324_v57  ;;  %4963 = vst [vmem:[#allocation33_spill] sm:$0xff] %v3331_v8  ;;  %v3334_v11 = vadd.f32 %v284_v62, %v3299_v34  ;;  %v3340_v14 = vadd.f32 %v355_v13, %v3303_v40  ;;  %v357_v15 = vpop.f32.mrb[7].mxu1 }
 0x10d   :  { %4962 = vst [vmem:[#allocation32_spill] sm:$0xff] %v3327_v61  ;;  %4965 = vst [vmem:[#allocation35_spill] sm:$0xff] %v3337_v12  ;;  %v3343_v17 = vadd.f32 %v357_v15, %v3308_v45 }
 0x10e   :  { %4964 = vst [vmem:[#allocation34_spill] sm:$0xff] %v3334_v11  ;;  %4966 = vst [vmem:[#allocation36_spill] sm:$0xff] %v3340_v14 }
 0x10f   :  { %v2635_v16 = vpop.eup %2634  ;;  %4967 = vst [vmem:[#allocation37_spill] sm:$0xff] %v3343_v17 }
 0x110   :  { %v2637_v18 = vpop.eup %2636  ;;  %v448_v19 = vadd.f32 1.0, %v2635_v16  ;;  %v288_v20 = vpop.f32.mrb[8].mxu0 }
 0x111   :  { %v449_v21 = vadd.f32 1.0, %v2637_v18  ;;  %v3346_v22 = vadd.f32 %v288_v20, %v3297_v33  ;;  %v290_v23 = vpop.f32.mrb[9].mxu0  ;;  %v361_v28 = vpop.f32.mrb[8].mxu1 }
 0x112   :  { %2642 = vrcp.f32 %v448_v19  ;;  %v3349_v24 = vadd.f32 %v290_v23, %v3299_v34  ;;  %v292_v26 = vpop.f32.mrb[10].mxu0  ;;  %v3355_v35 = vadd.f32 %v361_v28, %v3303_v40  ;;  %v363_v36 = vpop.f32.mrb[9].mxu1 }
 0x113   :  { %4968 = vst [vmem:[#allocation38_spill] sm:$0xff] %v3346_v22  ;;  %2644 = vrcp.f32 %v449_v21  ;;  %v3352_v29 = vadd.f32 %v292_v26, %v3297_v33  ;;  %v294_v32 = vpop.f32.mrb[11].mxu0  ;;  %v3361_v38 = vadd.f32 %v363_v36, %v3308_v45  ;;  %v365_v39 = vpop.f32.mrb[10].mxu1 }
 0x114   :  { %4969 = vst [vmem:[#allocation39_spill] sm:$0xff] %v3349_v24  ;;  %4971 = vst [vmem:[#allocation41_spill] sm:$0xff] %v3355_v35  ;;  %v3358_v37 = vadd.f32 %v294_v32, %v3299_v34  ;;  %v3364_v41 = vadd.f32 %v365_v39, %v3303_v40  ;;  %v367_v43 = vpop.f32.mrb[11].mxu1  ;;  %v2639_v48 = vpop.eup %2638 }
 0x115   :  { %4970 = vst [vmem:[#allocation40_spill] sm:$0xff] %v3352_v29  ;;  %4973 = vst [vmem:[#allocation43_spill] sm:$0xff] %v3361_v38  ;;  %v3367_v44 = vadd.f32 %v367_v43, %v3308_v45  ;;  %v2641_v52 = vpop.eup %2640  ;;  %v450_v63 = vadd.f32 1.0, %v2639_v48 }
 0x116   :  { %4972 = vst [vmem:[#allocation42_spill] sm:$0xff] %v3358_v37  ;;  %4974 = vst [vmem:[#allocation44_spill] sm:$0xff] %v3364_v41 }
 0x117   :  { %4975 = vst [vmem:[#allocation45_spill] sm:$0xff] %v3367_v44  ;;  %2646 = vrcp.f32 %v450_v63 }
 0x118   :  { %v298_v46 = vpop.f32.mrb[12].mxu0 }
 0x119   :  { %v3370_v49 = vadd.f32 %v298_v46, %v3297_v33  ;;  %v300_v51 = vpop.f32.mrb[13].mxu0  ;;  %v371_v58 = vpop.f32.mrb[12].mxu1 }
 0x11a   :  { %v3373_v54 = vadd.f32 %v300_v51, %v3299_v34  ;;  %v302_v56 = vpop.f32.mrb[14].mxu0  ;;  %v3379_v9 = vadd.f32 %v371_v58, %v3303_v40  ;;  %v373_v13 = vpop.f32.mrb[13].mxu1 }
 0x11b   :  { %4976 = vst [vmem:[#allocation46_spill] sm:$0xff] %v3370_v49  ;;  %v3376_v59 = vadd.f32 %v302_v56, %v3297_v33  ;;  %v304_v60 = vpop.f32.mrb[15].mxu0  ;;  %v3385_v19 = vadd.f32 %v373_v13, %v3308_v45  ;;  %v375_v20 = vpop.f32.mrb[14].mxu1 }
 0x11c   :  { %4977 = vst [vmem:[#allocation47_spill] sm:$0xff] %v3373_v54  ;;  %v2643_v62 = vpop.eup %2642  ;;  %4979 = vst [vmem:[#allocation49_spill] sm:$0xff] %v3379_v9  ;;  %v3382_v15 = vadd.f32 %v304_v60, %v3299_v34  ;;  %v3388_v33 = vadd.f32 %v375_v20, %v3303_v40  ;;  %v377_v23 = vpop.f32.mrb[15].mxu1 }
 0x11d   :  { %4978 = vst [vmem:[#allocation48_spill] sm:$0xff] %v3376_v59  ;;  %v2645_v16 = vpop.eup %2644  ;;  %v459_v18 = vmul.f32 %v2643_v62, %v2641_v52  ;;  %4981 = vst [vmem:[#allocation51_spill] sm:$0xff] %v3385_v19  ;;  %v3391_v26 = vadd.f32 %v377_v23, %v3308_v45 }
 0x11e   :  { %4980 = vst [vmem:[#allocation50_spill] sm:$0xff] %v3382_v15  ;;  %v458_v21 = vmul.f32 0.0, %v2645_v16  ;;  %4982 = vst [vmem:[#allocation52_spill] sm:$0xff] %v3388_v33 }
 0x11f   :  { %4983 = vst [vmem:[#allocation53_spill] sm:$0xff] %v3391_v26 }
 0x120   :  { %v3393_v28 = vadd.f32 %v459_v18, %v458_v21 }
 0x121   :  { %v2647_v34 = vpop.eup %2646 }
 0x122   :  { %4984 = vst [vmem:[#allocation54_spill] sm:$0xff] %v3393_v28  ;;  %2648 = vtanh.f32 %v3393_v28 }
 0x12c   :  { %v2649_v32 = vpop.eup %2648 }
 0x12d   :  { %v462_v36 = vmul.f32 %v2649_v32, %v2647_v34 }
 0x12f   :  { %v3396_v39 = vpack.c.bf16 %v462_v36, %v462_v36 }
 0x130   :  { %3152 = dma.done.wait [#allocation5], 8192 }
 0x131   :  { %3153 = vsyncadd [#allocation5], 4294959104  ;;  %564 = vmatprep.mubr.bf16.mxu0 %v4745_v10  ;;  %605 = vmatprep.mubr.bf16.mxu1 %v4745_v10  ;;  %v3400_v40 = vld [vmem:[#allocation3 + $0x8] sm:$0xff]  ;;  %v3402_v45 = vld [vmem:[#allocation3] sm:$0xff] }
 0x132   :  { %v3404_v43 = vld [vmem:[#allocation3 + $0x28] sm:$0xff]  ;;  %532 = vmatprep.subr.bf16.mxu0 %v3400_v40  ;;  %v3408_v46 = vld [vmem:[#allocation3 + $0x18] sm:$0xff]  ;;  %v3411_v48 = vld [vmem:[#allocation3 + $0x20] sm:$0xff] }
 0x133   :  { %533 = vmatpush1.bf16.msra.mxu0 %v3402_v45  ;;  %573 = vmatprep.subr.bf16.mxu1 %v3408_v46  ;;  %v3414_v51 = vld [vmem:[#allocation3 + $0x10] sm:$0xff]  ;;  %v3416_v52 = vld [vmem:[#allocation3 + $0x38] sm:$0xff]  ;;  %v3418_v56 = vld [vmem:[#allocation3 + $0x48] sm:$0xff] }
 0x134   :  { %534 = vmatprep.subr.bf16.mxu0 %v3404_v43  ;;  %574 = vmatpush1.bf16.msra.mxu1 %v3414_v51  ;;  %v3422_v58 = vld [vmem:[#allocation3 + $0x30] sm:$0xff]  ;;  %v3425_v60 = vld [vmem:[#allocation3 + $0x58] sm:$0xff]  ;;  %v3428_v62 = vld [vmem:[#allocation3 + $0x40] sm:$0xff] }
 0x135   :  { %575 = vmatprep.subr.bf16.mxu1 %v3416_v52  ;;  %v3430_v63 = vld [vmem:[#allocation3 + $0x68] sm:$0xff]  ;;  %v3434_v13 = vld [vmem:[#allocation3 + $0x50] sm:$0xff]  ;;  %v3437_v16 = vld [vmem:[#allocation3 + $0x78] sm:$0xff] }
 0x136   :  { %v3440_v18 = vld [vmem:[#allocation3 + $0x60] sm:$0xff]  ;;  %v3442_v20 = vld [vmem:[#allocation3 + $0x88] sm:$0xff]  ;;  %v3446_v21 = vld [vmem:[#allocation3 + $0x70] sm:$0xff] }
 0x137   :  { %535 = vmatpush1.bf16.msra.mxu0 %v3411_v48  ;;  %v3449_v23 = vld [vmem:[#allocation3 + $0x98] sm:$0xff]  ;;  %v3452_v34 = vld [vmem:[#allocation3 + $0x80] sm:$0xff]  ;;  %v3454_v32 = vld [vmem:[#allocation3 + $0xa8] sm:$0xff] }
 0x138   :  { %536 = vmatprep.subr.bf16.mxu0 %v3418_v56  ;;  %576 = vmatpush1.bf16.msra.mxu1 %v3422_v58  ;;  %v3458_v36 = vld [vmem:[#allocation3 + $0x90] sm:$0xff]  ;;  %v3461_v10 = vld [vmem:[#allocation3 + $0xb8] sm:$0xff]  ;;  %v3464_v7 = vld [vmem:[#allocation3 + $0xa0] sm:$0xff] }
 0x139   :  { %577 = vmatprep.subr.bf16.mxu1 %v3425_v60  ;;  %v3466_v6 = vld [vmem:[#allocation3 + $0xc8] sm:$0xff]  ;;  %v3470_v5 = vld [vmem:[#allocation3 + $0xb0] sm:$0xff]  ;;  %v3473_v4 = vld [vmem:[#allocation3 + $0xd8] sm:$0xff] }
 0x13a   :  { %v3476_v3 = vld [vmem:[#allocation3 + $0xc0] sm:$0xff]  ;;  %v3478_v2 = vld [vmem:[#allocation3 + $0xe8] sm:$0xff]  ;;  %v3482_v1 = vld [vmem:[#allocation3 + $0xd0] sm:$0xff] }
 0x13b   :  { %537 = vmatpush1.bf16.msra.mxu0 %v3428_v62  ;;  %v3485_v0 = vld [vmem:[#allocation3 + $0xf8] sm:$0xff]  ;;  %v3488_v26 = vld [vmem:[#allocation3 + $0xe0] sm:$0xff]  ;;  %v3490_v33 = vld [vmem:[#allocation3 + $0x108] sm:$0xff] }
 0x13c   :  { %538 = vmatprep.subr.bf16.mxu0 %v3430_v63  ;;  %578 = vmatpush1.bf16.msra.mxu1 %v3434_v13  ;;  %v3494_v15 = vld [vmem:[#allocation3 + $0xf0] sm:$0xff]  ;;  %v3497_v59 = vld [vmem:[#allocation3 + $0x118] sm:$0xff]  ;;  %v3500_v19 = vld [vmem:[#allocation3 + $0x100] sm:$0xff] }
 0x13d   :  { %579 = vmatprep.subr.bf16.mxu1 %v3437_v16  ;;  %4985 = vst [vmem:[#allocation55_spill] sm:$0xff] %v3500_v19  ;;  %v3502_v9 = vld [vmem:[#allocation3 + $0x128] sm:$0xff]  ;;  %v3506_v54 = vld [vmem:[#allocation3 + $0x110] sm:$0xff]  ;;  %v3509_v49 = vld [vmem:[#allocation3 + $0x138] sm:$0xff] }
 0x13e   :  { %4986 = vst [vmem:[#allocation56_spill] sm:$0xff] %v3502_v9  ;;  %4987 = vst [vmem:[#allocation57_spill] sm:$0xff] %v3506_v54  ;;  %v3512_v44 = vld [vmem:[#allocation3 + $0x120] sm:$0xff]  ;;  %v3514_v41 = vld [vmem:[#allocation3 + $0x148] sm:$0xff] }
 0x13f   :  { %539 = vmatpush1.bf16.msra.mxu0 %v3440_v18  ;;  %4988 = vst [vmem:[#allocation58_spill] sm:$0xff] %v3509_v49  ;;  %4989 = vst [vmem:[#allocation59_spill] sm:$0xff] %v3512_v44  ;;  %v3518_v37 = vld [vmem:[#allocation3 + $0x130] sm:$0xff]  ;;  %v3521_v29 = vld [vmem:[#allocation3 + $0x158] sm:$0xff] }
 0x140   :  { %540 = vmatprep.subr.bf16.mxu0 %v3442_v20  ;;  %580 = vmatpush1.bf16.msra.mxu1 %v3446_v21  ;;  %4990 = vst [vmem:[#allocation60_spill] sm:$0xff] %v3514_v41  ;;  %4991 = vst [vmem:[#allocation61_spill] sm:$0xff] %v3518_v37  ;;  %v3524_v38 = vld [vmem:[#allocation3 + $0x140] sm:$0xff]  ;;  %v3526_v35 = vld [vmem:[#allocation3 + $0x168] sm:$0xff] }
 0x141   :  { %581 = vmatprep.subr.bf16.mxu1 %v3449_v23  ;;  %4992 = vst [vmem:[#allocation62_spill] sm:$0xff] %v3521_v29  ;;  %4993 = vst [vmem:[#allocation63_spill] sm:$0xff] %v3524_v38  ;;  %v3530_v24 = vld [vmem:[#allocation3 + $0x150] sm:$0xff]  ;;  %v3533_v22 = vld [vmem:[#allocation3 + $0x178] sm:$0xff] }
 0x142   :  { %4994 = vst [vmem:[#allocation64_spill] sm:$0xff] %v3526_v35  ;;  %4995 = vst [vmem:[#allocation65_spill] sm:$0xff] %v3530_v24  ;;  %v3536_v17 = vld [vmem:[#allocation3 + $0x160] sm:$0xff]  ;;  %v3538_v14 = vld [vmem:[#allocation3 + $0x188] sm:$0xff] }
 0x143   :  { %541 = vmatpush1.bf16.msra.mxu0 %v3452_v34  ;;  %4996 = vst [vmem:[#allocation66_spill] sm:$0xff] %v3533_v22  ;;  %4997 = vst [vmem:[#allocation67_spill] sm:$0xff] %v3536_v17  ;;  %v3542_v11 = vld [vmem:[#allocation3 + $0x170] sm:$0xff]  ;;  %v3545_v61 = vld [vmem:[#allocation3 + $0x198] sm:$0xff] }
 0x144   :  { %542 = vmatprep.subr.bf16.mxu0 %v3454_v32  ;;  %582 = vmatpush1.bf16.msra.mxu1 %v3458_v36  ;;  %4998 = vst [vmem:[#allocation68_spill] sm:$0xff] %v3538_v14  ;;  %4999 = vst [vmem:[#allocation69_spill] sm:$0xff] %v3542_v11  ;;  %v3548_v12 = vld [vmem:[#allocation3 + $0x180] sm:$0xff]  ;;  %v3550_v8 = vld [vmem:[#allocation3 + $0x1a8] sm:$0xff] }
 0x145   :  { %583 = vmatprep.subr.bf16.mxu1 %v3461_v10  ;;  %5000 = vst [vmem:[#allocation70_spill] sm:$0xff] %v3545_v61  ;;  %5001 = vst [vmem:[#allocation71_spill] sm:$0xff] %v3548_v12  ;;  %v3554_v57 = vld [vmem:[#allocation3 + $0x190] sm:$0xff]  ;;  %v3557_v55 = vld [vmem:[#allocation3 + $0x1b8] sm:$0xff] }
 0x146   :  { %5002 = vst [vmem:[#allocation72_spill] sm:$0xff] %v3550_v8  ;;  %5003 = vst [vmem:[#allocation73_spill] sm:$0xff] %v3554_v57  ;;  %v3560_v28 = vld [vmem:[#allocation3 + $0x1a0] sm:$0xff]  ;;  %v3562_v53 = vld [vmem:[#allocation3 + $0x1c8] sm:$0xff] }
 0x147   :  { %543 = vmatpush1.bf16.msra.mxu0 %v3464_v7  ;;  %5004 = vst [vmem:[#allocation74_spill] sm:$0xff] %v3557_v55  ;;  %5005 = vst [vmem:[#allocation75_spill] sm:$0xff] %v3560_v28  ;;  %v3566_v50 = vld [vmem:[#allocation3 + $0x1b0] sm:$0xff]  ;;  %v3569_v47 = vld [vmem:[#allocation3 + $0x1d8] sm:$0xff] }
 0x148   :  { %544 = vmatprep.subr.bf16.mxu0 %v3466_v6  ;;  %584 = vmatpush1.bf16.msra.mxu1 %v3470_v5  ;;  %5006 = vst [vmem:[#allocation76_spill] sm:$0xff] %v3562_v53  ;;  %5007 = vst [vmem:[#allocation77_spill] sm:$0xff] %v3566_v50  ;;  %v3572_v42 = vld [vmem:[#allocation3 + $0x1c0] sm:$0xff]  ;;  %v3574_v31 = vld [vmem:[#allocation3 + $0x1e8] sm:$0xff] }
 0x149   :  { %585 = vmatprep.subr.bf16.mxu1 %v3473_v4  ;;  %5008 = vst [vmem:[#allocation78_spill] sm:$0xff] %v3569_v47  ;;  %5009 = vst [vmem:[#allocation79_spill] sm:$0xff] %v3572_v42  ;;  %v3578_v30 = vld [vmem:[#allocation3 + $0x1d0] sm:$0xff]  ;;  %v3581_v27 = vld [vmem:[#allocation3 + $0x1f8] sm:$0xff] }
 0x14a   :  { %5010 = vst [vmem:[#allocation80_spill] sm:$0xff] %v3574_v31  ;;  %5011 = vst [vmem:[#allocation81_spill] sm:$0xff] %v3578_v30  ;;  %v3584_v25 = vld [vmem:[#allocation3 + $0x1e0] sm:$0xff] }
 0x14b   :  { %545 = vmatpush1.bf16.msra.mxu0 %v3476_v3  ;;  %5012 = vst [vmem:[#allocation82_spill] sm:$0xff] %v3581_v27  ;;  %5013 = vst [vmem:[#allocation83_spill] sm:$0xff] %v3584_v25 }
 0x14c   :  { %546 = vmatprep.subr.bf16.mxu0 %v3478_v2  ;;  %586 = vmatpush1.bf16.msra.mxu1 %v3482_v1 }
 0x14d   :  { %587 = vmatprep.subr.bf16.mxu1 %v3485_v0 }
 0x14f   :  { %547 = vmatpush1.bf16.msra.mxu0 %v3488_v26 }
 0x150   :  { %548 = vmatprep.subr.bf16.mxu0 %v3490_v33  ;;  %588 = vmatpush1.bf16.msra.mxu1 %v3494_v15 }
 0x151   :  { %589 = vmatprep.subr.bf16.mxu1 %v3497_v59 }
 0x153   :  { %549 = vmatpush1.bf16.msra.mxu0 %v3500_v19 }
 0x154   :  { %550 = vmatprep.subr.bf16.mxu0 %v3502_v9  ;;  %590 = vmatpush1.bf16.msra.mxu1 %v3506_v54 }
 0x155   :  { %591 = vmatprep.subr.bf16.mxu1 %v3509_v49 }
 0x157   :  { %551 = vmatpush1.bf16.msra.mxu0 %v3512_v44 }
 0x158   :  { %552 = vmatprep.subr.bf16.mxu0 %v3514_v41  ;;  %592 = vmatpush1.bf16.msra.mxu1 %v3518_v37 }
 0x159   :  { %593 = vmatprep.subr.bf16.mxu1 %v3521_v29 }
 0x15b   :  { %553 = vmatpush1.bf16.msra.mxu0 %v3524_v38 }
 0x15c   :  { %554 = vmatprep.subr.bf16.mxu0 %v3526_v35  ;;  %594 = vmatpush1.bf16.msra.mxu1 %v3530_v24 }
 0x15d   :  { %595 = vmatprep.subr.bf16.mxu1 %v3533_v22 }
 0x15f   :  { %555 = vmatpush1.bf16.msra.mxu0 %v3536_v17 }
 0x160   :  { %556 = vmatprep.subr.bf16.mxu0 %v3538_v14  ;;  %596 = vmatpush1.bf16.msra.mxu1 %v3542_v11 }
 0x161   :  { %597 = vmatprep.subr.bf16.mxu1 %v3545_v61 }
 0x163   :  { %557 = vmatpush1.bf16.msra.mxu0 %v3548_v12 }
 0x164   :  { %558 = vmatprep.subr.bf16.mxu0 %v3550_v8  ;;  %598 = vmatpush1.bf16.msra.mxu1 %v3554_v57 }
 0x165   :  { %599 = vmatprep.subr.bf16.mxu1 %v3557_v55  ;;  %v3629_v55 = vld [vmem:[#allocation6 + $0x88] ss:$16 sps:$4 sm:$0xff]  }
 0x166   :  { %5027 = vst [vmem:[#allocation96_spill] sm:$0xff] %v3629_v55 }
 0x167   :  { %559 = vmatpush1.bf16.msra.mxu0 %v3560_v28  ;;  %v3586_v28 = vld [vmem:[#allocation6 + $0x44] ss:$16 sps:$4 sm:$0xff]  }
 0x168   :  { %560 = vmatprep.subr.bf16.mxu0 %v3562_v53  ;;  %600 = vmatpush1.bf16.msra.mxu1 %v3566_v50  ;;  %5014 = vst [vmem:[#allocation84_spill] sm:$0xff] %v3586_v28  ;;  %v3590_v53 = vld [vmem:[#allocation3 + $0x1f0] sm:$0xff]  ;;  %v3592_v50 = vld [vmem:[#allocation6 + $0x4c] ss:$16 sps:$4 sm:$0xff]  }
 0x169   :  { %601 = vmatprep.subr.bf16.mxu1 %v3569_v47  ;;  %5015 = vst [vmem:[#allocation85_spill] sm:$0xff] %v3590_v53  ;;  %5016 = vst [vmem:[#allocation86_spill] sm:$0xff] %v3592_v50  ;;  %v3595_v47 = vld [vmem:[#allocation6 + $0x40] ss:$16 sps:$4 sm:$0xff]  }
 0x16a   :  { %5017 = vst [vmem:[#allocation87_spill] sm:$0xff] %v3595_v47 }
 0x16b   :  { %561 = vmatpush1.bf16.msra.mxu0 %v3572_v42  ;;  %v3598_v42 = vld [vmem:[#allocation6 + $0x64] ss:$16 sps:$4 sm:$0xff]  }
 0x16c   :  { %562 = vmatprep.subr.bf16.mxu0 %v3574_v31  ;;  %602 = vmatpush1.bf16.msra.mxu1 %v3578_v30  ;;  %5018 = vst [vmem:[#allocation88_spill] sm:$0xff] %v3598_v42  ;;  %v3601_v31 = vld [vmem:[#allocation6 + $0x48] ss:$16 sps:$4 sm:$0xff]   ;;  %v3608_v30 = vld [vmem:[#allocation6 + $0x60] ss:$16 sps:$4 sm:$0xff]  }
 0x16d   :  { %603 = vmatprep.subr.bf16.mxu1 %v3581_v27  ;;  %5019 = vst [vmem:[#allocation89_spill] sm:$0xff] %v3601_v31  ;;  %v3605_v27 = vld [vmem:[#allocation6 + $0x6c] ss:$16 sps:$4 sm:$0xff]   ;;  %5020 = vst [vmem:[#allocation90_spill] sm:$0xff] %v3608_v30 }
 0x16f   :  { %563 = vmatpush1.bf16.msra.mxu0 %v3584_v25  ;;  %v5021_v25 = vmov 0  }
 0x170   :  { %810 = vmatprep.subr.bf16.mxu0 %v3586_v28  ;;  %604 = vmatpush1.bf16.msra.mxu1 %v3590_v53  ;;  %v3612_v28 = vld [vmem:[#allocation6 + $0x84] ss:$16 sps:$4 sm:$0xff]   ;;  %v3616_v53 = vld [vmem:[#allocation6 + $0x68] ss:$16 sps:$4 sm:$0xff]  }
 0x171   :  { %851 = vmatprep.subr.bf16.mxu1 %v3592_v50  ;;  %5022 = vst [vmem:[#allocation91_spill] sm:$0xff] %v3612_v28  ;;  %5023 = vst [vmem:[#allocation92_spill] sm:$0xff] %v3616_v53  ;;  %v3620_v50 = vld [vmem:[#allocation6 + $0x8c] ss:$16 sps:$4 sm:$0xff]  }
 0x172   :  { %565 = vmatmul.mubr.bf16.vlgmr.msra.gmra.mrb[16].mxu0 %v3396_v39  ;;  %5024 = vst [vmem:[#allocation93_spill] sm:$0xff] %v3620_v50 }
 0x173   :  { %811 = vmatpush1.bf16.msra.mxu0 %v3595_v47  ;;  %842 = vmatprep.mubr.bf16.mxu0 %v5021_v25  ;;  %v3623_v47 = vld [vmem:[#allocation6 + $0x80] ss:$16 sps:$4 sm:$0xff]  }
 0x174   :  { %812 = vmatprep.subr.bf16.mxu0 %v3598_v42  ;;  %606 = vmatmul.mubr.bf16.vlgmr.msra.gmra.mrb[16].mxu1 %v3396_v39  ;;  %5025 = vst [vmem:[#allocation94_spill] sm:$0xff] %v3623_v47  ;;  %v3626_v42 = vld [vmem:[#allocation6 + $0xa4] ss:$16 sps:$4 sm:$0xff]  }
 0x175   :  { %852 = vmatpush1.bf16.msra.mxu1 %v3601_v31  ;;  %883 = vmatprep.mubr.bf16.mxu1 %v5021_v25  ;;  %5026 = vst [vmem:[#allocation95_spill] sm:$0xff] %v3626_v42  ;;  %v3632_v31 = vld [vmem:[#allocation6 + $0xac] ss:$16 sps:$4 sm:$0xff]   ;;  %v3635_v25 = vld [vmem:[#allocation6 + $0xa0] ss:$16 sps:$4 sm:$0xff]  }
 0x176   :  { %853 = vmatprep.subr.bf16.mxu1 %v3605_v27  ;;  %5028 = vst [vmem:[#allocation97_spill] sm:$0xff] %v3632_v31  ;;  %5029 = vst [vmem:[#allocation98_spill] sm:$0xff] %v3635_v25 }
 0x177   :  { %813 = vmatpush1.bf16.msra.mxu0 %v3608_v30  ;;  %v3638_v30 = vld [vmem:[#allocation6 + $0xc4] ss:$16 sps:$4 sm:$0xff]  }
 0x178   :  { %814 = vmatprep.subr.bf16.mxu0 %v3612_v28  ;;  %5030 = vst [vmem:[#allocation99_spill] sm:$0xff] %v3638_v30  ;;  %v3641_v28 = vld [vmem:[#allocation6 + $0xa8] ss:$16 sps:$4 sm:$0xff]  }
 0x179   :  { %854 = vmatpush1.bf16.msra.mxu1 %v3616_v53  ;;  %5031 = vst [vmem:[#allocation100_spill] sm:$0xff] %v3641_v28  ;;  %v3644_v53 = vld [vmem:[#allocation6 + $0xcc] ss:$16 sps:$4 sm:$0xff]  }
 0x17a   :  { %855 = vmatprep.subr.bf16.mxu1 %v3620_v50  ;;  %5032 = vst [vmem:[#allocation101_spill] sm:$0xff] %v3644_v53  ;;  %v3647_v50 = vld [vmem:[#allocation6 + $0xc0] ss:$16 sps:$4 sm:$0xff]  }
 0x17b   :  { %815 = vmatpush1.bf16.msra.mxu0 %v3623_v47  ;;  %5033 = vst [vmem:[#allocation102_spill] sm:$0xff] %v3647_v50  ;;  %v3650_v47 = vld [vmem:[#allocation6 + $0xe4] ss:$16 sps:$4 sm:$0xff]  }
 0x17c   :  { %816 = vmatprep.subr.bf16.mxu0 %v3626_v42  ;;  %5034 = vst [vmem:[#allocation103_spill] sm:$0xff] %v3650_v47  ;;  %v3653_v42 = vld [vmem:[#allocation6 + $0xc8] ss:$16 sps:$4 sm:$0xff]  }
 0x17d   :  { %856 = vmatpush1.bf16.msra.mxu1 %v3629_v55  ;;  %5035 = vst [vmem:[#allocation104_spill] sm:$0xff] %v3653_v42  ;;  %v3656_v55 = vld [vmem:[#allocation6 + $0xec] ss:$16 sps:$4 sm:$0xff]  }
 0x17e   :  { %857 = vmatprep.subr.bf16.mxu1 %v3632_v31  ;;  %5036 = vst [vmem:[#allocation105_spill] sm:$0xff] %v3656_v55  ;;  %v3659_v31 = vld [vmem:[#allocation6 + $0xe0] ss:$16 sps:$4 sm:$0xff]  }
 0x17f   :  { %817 = vmatpush1.bf16.msra.mxu0 %v3635_v25  ;;  %5037 = vst [vmem:[#allocation106_spill] sm:$0xff] %v3659_v31  ;;  %v3662_v25 = vld [vmem:[#allocation6 + $0x104] ss:$16 sps:$4 sm:$0xff]  }
 0x180   :  { %818 = vmatprep.subr.bf16.mxu0 %v3638_v30  ;;  %v3665_v30 = vld [vmem:[#allocation6 + $0xe8] ss:$16 sps:$4 sm:$0xff]  }
 0x181   :  { %858 = vmatpush1.bf16.msra.mxu1 %v3641_v28  ;;  %v3668_v28 = vld [vmem:[#allocation6 + $0x10c] ss:$16 sps:$4 sm:$0xff]  }
 0x182   :  { %859 = vmatprep.subr.bf16.mxu1 %v3644_v53  ;;  %v3671_v53 = vld [vmem:[#allocation6 + $0x100] ss:$16 sps:$4 sm:$0xff]  }
 0x183   :  { %819 = vmatpush1.bf16.msra.mxu0 %v3647_v50  ;;  %v3674_v50 = vld [vmem:[#allocation6 + $0x124] ss:$16 sps:$4 sm:$0xff]  }
 0x184   :  { %820 = vmatprep.subr.bf16.mxu0 %v3650_v47  ;;  %v3677_v47 = vld [vmem:[#allocation6 + $0x108] ss:$16 sps:$4 sm:$0xff]  }
 0x185   :  { %860 = vmatpush1.bf16.msra.mxu1 %v3653_v42  ;;  %v3680_v42 = vld [vmem:[#allocation6 + $0x12c] ss:$16 sps:$4 sm:$0xff]  }
 0x186   :  { %861 = vmatprep.subr.bf16.mxu1 %v3656_v55  ;;  %v3683_v55 = vld [vmem:[#allocation6 + $0x120] ss:$16 sps:$4 sm:$0xff]  }
 0x187   :  { %821 = vmatpush1.bf16.msra.mxu0 %v3659_v31  ;;  %v3687_v31 = vld [vmem:[#allocation6 + $0x128] ss:$16 sps:$4 sm:$0xff]  }
 0x188   :  { %822 = vmatprep.subr.bf16.mxu0 %v3662_v25 }
 0x189   :  { %862 = vmatpush1.bf16.msra.mxu1 %v3665_v30 }
 0x18a   :  { %863 = vmatprep.subr.bf16.mxu1 %v3668_v28 }
 0x18b   :  { %823 = vmatpush1.bf16.msra.mxu0 %v3671_v53 }
 0x18c   :  { %824 = vmatprep.subr.bf16.mxu0 %v3674_v50 }
 0x18d   :  { %864 = vmatpush1.bf16.msra.mxu1 %v3677_v47 }
 0x18e   :  { %865 = vmatprep.subr.bf16.mxu1 %v3680_v42 }
 0x18f   :  { %825 = vmatpush1.bf16.msra.mxu0 %v3683_v55 }
 0x190   :  { %946 = vmatprep.subr.bf16.mxu0 %v3400_v40 }
 0x191   :  { %866 = vmatpush1.bf16.msra.mxu1 %v3687_v31 }
 0x192   :  { %843 = vmatmul.mubr.bf16.vlgmr.msra.gmra.mrb[20].mxu0 %v3396_v39  ;;  %987 = vmatprep.subr.bf16.mxu1 %v3408_v46 }
 0x193   :  { %947 = vmatpush1.bf16.msra.mxu0 %v3402_v45 }
 0x194   :  { %884 = vmatmul.mubr.bf16.vlgmr.msra.gmra.mrb[20].mxu1 %v3396_v39  ;;  %948 = vmatprep.subr.bf16.mxu0 %v3404_v43  ;;  %v5038_v39 = vld [vmem:[#allocation74_spill] sm:$0xff] }
 0x195   :  { %988 = vmatpush1.bf16.msra.mxu1 %v3414_v51 }
 0x196   :  { %989 = vmatprep.subr.bf16.mxu1 %v3416_v52 }
 0x197   :  { %949 = vmatpush1.bf16.msra.mxu0 %v3411_v48 }
 0x198   :  { %950 = vmatprep.subr.bf16.mxu0 %v3418_v56 }
 0x199   :  { %990 = vmatpush1.bf16.msra.mxu1 %v3422_v58 }
 0x19a   :  { %991 = vmatprep.subr.bf16.mxu1 %v3425_v60 }
 0x19b   :  { %951 = vmatpush1.bf16.msra.mxu0 %v3428_v62 }
 0x19c   :  { %952 = vmatprep.subr.bf16.mxu0 %v3430_v63 }
 0x19d   :  { %992 = vmatpush1.bf16.msra.mxu1 %v3434_v13 }
 0x19e   :  { %993 = vmatprep.subr.bf16.mxu1 %v3437_v16 }
 0x19f   :  { %953 = vmatpush1.bf16.msra.mxu0 %v3440_v18 }
 0x1a0   :  { %954 = vmatprep.subr.bf16.mxu0 %v3442_v20 }
 0x1a1   :  { %994 = vmatpush1.bf16.msra.mxu1 %v3446_v21 }
 0x1a2   :  { %995 = vmatprep.subr.bf16.mxu1 %v3449_v23 }
 0x1a3   :  { %955 = vmatpush1.bf16.msra.mxu0 %v3452_v34 }
 0x1a4   :  { %956 = vmatprep.subr.bf16.mxu0 %v3454_v32 }
 0x1a5   :  { %996 = vmatpush1.bf16.msra.mxu1 %v3458_v36 }
 0x1a6   :  { %997 = vmatprep.subr.bf16.mxu1 %v3461_v10 }
 0x1a7   :  { %957 = vmatpush1.bf16.msra.mxu0 %v3464_v7 }
 0x1a8   :  { %958 = vmatprep.subr.bf16.mxu0 %v3466_v6 }
 0x1a9   :  { %998 = vmatpush1.bf16.msra.mxu1 %v3470_v5 }
 0x1aa   :  { %999 = vmatprep.subr.bf16.mxu1 %v3473_v4 }
 0x1ab   :  { %959 = vmatpush1.bf16.msra.mxu0 %v3476_v3 }
 0x1ac   :  { %960 = vmatprep.subr.bf16.mxu0 %v3478_v2 }
 0x1ad   :  { %1000 = vmatpush1.bf16.msra.mxu1 %v3482_v1 }
 0x1ae   :  { %1001 = vmatprep.subr.bf16.mxu1 %v3485_v0 }
 0x1af   :  { %961 = vmatpush1.bf16.msra.mxu0 %v3488_v26 }
 0x1b0   :  { %962 = vmatprep.subr.bf16.mxu0 %v3490_v33 }
 0x1b1   :  { %1002 = vmatpush1.bf16.msra.mxu1 %v3494_v15 }
 0x1b2   :  { %1003 = vmatprep.subr.bf16.mxu1 %v3497_v59 }
 0x1b3   :  { %963 = vmatpush1.bf16.msra.mxu0 %v3500_v19 }
 0x1b4   :  { %964 = vmatprep.subr.bf16.mxu0 %v3502_v9 }
 0x1b5   :  { %1004 = vmatpush1.bf16.msra.mxu1 %v3506_v54 }
 0x1b6   :  { %1005 = vmatprep.subr.bf16.mxu1 %v3509_v49 }
 0x1b7   :  { %965 = vmatpush1.bf16.msra.mxu0 %v3512_v44 }
 0x1b8   :  { %966 = vmatprep.subr.bf16.mxu0 %v3514_v41 }
 0x1b9   :  { %1006 = vmatpush1.bf16.msra.mxu1 %v3518_v37 }
 0x1ba   :  { %1007 = vmatprep.subr.bf16.mxu1 %v3521_v29  ;;  %v5052_v29 = vld [vmem:[#allocation23_spill] sm:$0xff] }
 0x1bb   :  { %967 = vmatpush1.bf16.msra.mxu0 %v3524_v38 }
 0x1bc   :  { %968 = vmatprep.subr.bf16.mxu0 %v3526_v35  ;;  %v5039_v35 = vld [vmem:[#allocation75_spill] sm:$0xff] }
 0x1bd   :  { %1008 = vmatpush1.bf16.msra.mxu1 %v3530_v24  ;;  %v5040_v24 = vld [vmem:[#allocation76_spill] sm:$0xff] }
 0x1be   :  { %1009 = vmatprep.subr.bf16.mxu1 %v3533_v22  ;;  %v5041_v22 = vld [vmem:[#allocation77_spill] sm:$0xff] }
 0x1bf   :  { %969 = vmatpush1.bf16.msra.mxu0 %v3536_v17  ;;  %v5042_v17 = vld [vmem:[#allocation78_spill] sm:$0xff] }
 0x1c0   :  { %970 = vmatprep.subr.bf16.mxu0 %v3538_v14  ;;  %v5043_v14 = vld [vmem:[#allocation79_spill] sm:$0xff] }
 0x1c1   :  { %1010 = vmatpush1.bf16.msra.mxu1 %v3542_v11  ;;  %v5044_v11 = vld [vmem:[#allocation80_spill] sm:$0xff] }
 0x1c2   :  { %1011 = vmatprep.subr.bf16.mxu1 %v3545_v61  ;;  %v5045_v61 = vld [vmem:[#allocation81_spill] sm:$0xff] }
 0x1c3   :  { %971 = vmatpush1.bf16.msra.mxu0 %v3548_v12  ;;  %v5046_v12 = vld [vmem:[#allocation82_spill] sm:$0xff] }
 0x1c4   :  { %972 = vmatprep.subr.bf16.mxu0 %v3550_v8  ;;  %v5047_v8 = vld [vmem:[#allocation83_spill] sm:$0xff] }
 0x1c5   :  { %1012 = vmatpush1.bf16.msra.mxu1 %v3554_v57  ;;  %v5048_v57 = vld [vmem:[#allocation84_spill] sm:$0xff] }
 0x1c6   :  { %1013 = vmatprep.subr.bf16.mxu1 %v5038_v39  ;;  %v5049_v39 = vld [vmem:[#allocation85_spill] sm:$0xff] }
 0x1c7   :  { %973 = vmatpush1.bf16.msra.mxu0 %v5039_v35  ;;  %v5050_v35 = vld [vmem:[#allocation86_spill] sm:$0xff] }
 0x1c8   :  { %974 = vmatprep.subr.bf16.mxu0 %v5040_v24 }
 0x1c9   :  { %1014 = vmatpush1.bf16.msra.mxu1 %v5041_v22  ;;  %v5051_v22 = vld [vmem:[#allocation22_spill] sm:$0xff] }
 0x1ca   :  { %1015 = vmatprep.subr.bf16.mxu1 %v5042_v17 }
 0x1cb   :  { %975 = vmatpush1.bf16.msra.mxu0 %v5043_v14 }
 0x1cc   :  { %976 = vmatprep.subr.bf16.mxu0 %v5044_v11 }
 0x1cd   :  { %1016 = vmatpush1.bf16.msra.mxu1 %v5045_v61 }
 0x1ce   :  { %1017 = vmatprep.subr.bf16.mxu1 %v5046_v12 }
 0x1cf   :  { %977 = vmatpush1.bf16.msra.mxu0 %v5047_v8 }
 0x1d0   :  { %1032 = vmatprep.subr.bf16.mxu0 %v5048_v57  ;;  %v5053_v57 = vld [vmem:[#allocation24_spill] sm:$0xff] }
 0x1d1   :  { %1018 = vmatpush1.bf16.msra.mxu1 %v5049_v39 }
 0x1d2   :  { %1073 = vmatprep.subr.bf16.mxu1 %v5050_v35  ;;  %v5054_v35 = vld [vmem:[#allocation25_spill] sm:$0xff] }
 0x245   :  { %v566_v24 = vpop.f32.mrb[16].mxu0 }
 0x246   :  { %v567_v38 = vadd.f32 %v566_v24, %v5051_v22  ;;  %v568_v17 = vpop.f32.mrb[17].mxu0 }
 0x247   :  { %v569_v14 = vadd.f32 %v568_v17, %v5052_v29  ;;  %v570_v41 = vpop.f32.mrb[18].mxu0  ;;  %v607_v11 = vpop.f32.mrb[16].mxu1 }
 0x248   :  { %v2530_v37 = vmul.f32 -1.442695, %v567_v38  ;;  %v571_v61 = vpop.f32.mrb[19].mxu0  ;;  %v609_v44 = vpop.f32.mrb[17].mxu1  ;;  %v608_v39 = vadd.f32 %v607_v11, %v5053_v57 }
 0x249   :  { %v2531_v12 = vmul.f32 -1.442695, %v569_v14  ;;  %v611_v49 = vpop.f32.mrb[18].mxu1  ;;  %v610_v54 = vadd.f32 %v609_v44, %v5054_v35  ;;  %v5056_v44 = vld [vmem:[#allocation26_spill] sm:$0xff]  ;;  %v5057_v35 = vld [vmem:[#allocation27_spill] sm:$0xff] }
 0x24a   :  { %2698 = vpow2.f32 %v2530_v37  ;;  %v612_v8 = vpop.f32.mrb[19].mxu1  ;;  %v2532_v9 = vmul.f32 -1.442695, %v608_v39 }
 0x24b   :  { %2700 = vpow2.f32 %v2531_v12 }
 0x24c   :  { %2702 = vpow2.f32 %v2532_v9 }
 0x24d   :  { %2704 = vtanh.f32 %v610_v54 }
 0x254   :  { %v2699_v19 = vpop.eup %2698 }
 0x255   :  { %v2701_v24 = vpop.eup %2700  ;;  %v930_v22 = vadd.f32 1.0, %v2699_v19 }
 0x256   :  { %v931_v17 = vadd.f32 1.0, %v2701_v24  ;;  %v2703_v61 = vpop.eup %2702 }
 0x257   :  { %2706 = vrcp.f32 %v930_v22  ;;  %v2705_v38 = vpop.eup %2704  ;;  %v932_v41 = vadd.f32 1.0, %v2703_v61 }
 0x258   :  { %2708 = vrcp.f32 %v931_v17 }
 0x259   :  { %2710 = vrcp.f32 %v932_v41 }
 0x261   :  { %v2707_v14 = vpop.eup %2706 }
 0x262   :  { %v2709_v37 = vpop.eup %2708  ;;  %v941_v8 = vmul.f32 %v2707_v14, %v2705_v38  ;;  %v5058_v14 = vld [vmem:[#allocation28_spill] sm:$0xff] }
 0x263   :  { %v940_v12 = vmul.f32 0.0, %v2709_v37  ;;  %v2711_v37 = vpop.eup %2710 }
 0x265   :  { %v3764_v11 = vadd.f32 %v941_v8, %v940_v12  ;;  %v844_v49 = vpop.f32.mrb[20].mxu0 }
 0x266   :  { %v892_v39 = vadd.f32 %v844_v49, %v5056_v44  ;;  %v846_v9 = vpop.f32.mrb[21].mxu0  ;;  %v5059_v49 = vld [vmem:[#allocation29_spill] sm:$0xff] }
 0x267   :  { %5055 = vst [vmem:[#allocation107_spill] sm:$0xff] %v3764_v11  ;;  %v893_v19 = vadd.f32 %v846_v9, %v5057_v35  ;;  %v848_v54 = vpop.f32.mrb[22].mxu0  ;;  %v885_v24 = vpop.f32.mrb[20].mxu1  ;;  %2712 = vtanh.f32 %v3764_v11 }
 0x268   :  { %v2527_v22 = vmul.f32 -1.442695, %v892_v39  ;;  %v849_v17 = vpop.f32.mrb[23].mxu0  ;;  %v887_v57 = vpop.f32.mrb[21].mxu1  ;;  %v894_v41 = vadd.f32 %v885_v24, %v5058_v14  ;;  %v5060_v14 = vld [vmem:[#allocation54_spill] sm:$0xff] }
 0x269   :  { %v2528_v61 = vmul.f32 -1.442695, %v893_v19  ;;  %v889_v29 = vpop.f32.mrb[22].mxu1  ;;  %v895_v44 = vadd.f32 %v887_v57, %v5059_v49  ;;  %v5061_v49 = vld [vmem:[#allocation87_spill] sm:$0xff] }
 0x26a   :  { %2714 = vpow2.f32 %v2527_v22  ;;  %v890_v38 = vpop.f32.mrb[23].mxu1  ;;  %v2529_v8 = vmul.f32 -1.442695, %v894_v41 }
 0x26b   :  { %2716 = vpow2.f32 %v2528_v61 }
 0x26c   :  { %2718 = vpow2.f32 %v2529_v8 }
 0x26d   :  { %2720 = vtanh.f32 %v895_v44  ;;  %v5062_v44 = vld [vmem:[#allocation89_spill] sm:$0xff] }
 0x271   :  { %v2713_v12 = vpop.eup %2712 }
 0x272   :  { %v944_v35 = vmul.f32 %v2713_v12, %v2711_v37 }
 0x274   :  { %v2715_v9 = vpop.eup %2714  ;;  %v945_v54 = vpack.c.bf16 %v944_v35, %v944_v35  ;;  %v5063_v35 = vld [vmem:[#allocation88_spill] sm:$0xff] }
 0x275   :  { %v2717_v11 = vpop.eup %2716  ;;  %v905_v39 = vadd.f32 1.0, %v2715_v9  ;;  %v5064_v9 = vmov 0  }
 0x276   :  { %v906_v17 = vadd.f32 1.0, %v2717_v11  ;;  %978 = vmatprep.mubr.bf16.mxu0 %v945_v54  ;;  %1019 = vmatprep.mubr.bf16.mxu1 %v945_v54  ;;  %v2719_v29 = vpop.eup %2718  ;;  %v5065_v54 = vld [vmem:[#allocation90_spill] sm:$0xff] }
 0x277   :  { %2722 = vrcp.f32 %v905_v39  ;;  %v2721_v19 = vpop.eup %2720  ;;  %v907_v22 = vadd.f32 1.0, %v2719_v29  ;;  %v5066_v39 = vld [vmem:[#allocation92_spill] sm:$0xff]  ;;  %v5068_v29 = vld [vmem:[#allocation93_spill] sm:$0xff] }
 0x278   :  { %2724 = vrcp.f32 %v906_v17  ;;  %v5067_v17 = vld [vmem:[#allocation91_spill] sm:$0xff] }
 0x279   :  { %2726 = vrcp.f32 %v907_v22  ;;  %v5071_v22 = vld [vmem:[#allocation95_spill] sm:$0xff] }
 0x281   :  { %v2723_v24 = vpop.eup %2722 }
 0x282   :  { %v2725_v61 = vpop.eup %2724  ;;  %v916_v38 = vmul.f32 %v2723_v24, %v2721_v19  ;;  %v5069_v19 = vld [vmem:[#allocation94_spill] sm:$0xff]  ;;  %v5070_v24 = vld [vmem:[#allocation96_spill] sm:$0xff] }
 0x283   :  { %v915_v57 = vmul.f32 %v2725_v61, %v5060_v14  ;;  %v2727_v37 = vpop.eup %2726  ;;  %v5072_v61 = vld [vmem:[#allocation97_spill] sm:$0xff]  ;;  %v5074_v14 = vld [vmem:[#allocation100_spill] sm:$0xff] }
 0x285   :  { %v3772_v41 = vadd.f32 %v916_v38, %v915_v57  ;;  %v5073_v38 = vld [vmem:[#allocation98_spill] sm:$0xff]  ;;  %v5075_v57 = vld [vmem:[#allocation99_spill] sm:$0xff] }
 0x287   :  { %2728 = vtanh.f32 %v3772_v41 }
 0x291   :  { %v2729_v8 = vpop.eup %2728 }
 0x292   :  { %v919_v11 = vmul.f32 %v2729_v8, %v2727_v37  ;;  %v5076_v37 = vld [vmem:[#allocation101_spill] sm:$0xff]  ;;  %v5077_v8 = vld [vmem:[#allocation102_spill] sm:$0xff] }
 0x294   :  { %v920_v12 = vpack.c.bf16 %v919_v11, %v919_v11  ;;  %v5078_v11 = vld [vmem:[#allocation104_spill] sm:$0xff] }
 0x296   :  { %979 = vmatmul.mubr.bf16.vlgmr.msra.gmra.mrb[24].mxu0 %v920_v12  ;;  %1020 = vmatmul.mubr.bf16.vlgmr.msra.gmra.mrb[24].mxu1 %v920_v12 }
 0x297   :  { %1033 = vmatpush1.bf16.msra.mxu0 %v5061_v49  ;;  %1074 = vmatpush1.bf16.msra.mxu1 %v5062_v44 }
 0x298   :  { %1034 = vmatprep.subr.bf16.mxu0 %v5063_v35  ;;  %1075 = vmatprep.subr.bf16.mxu1 %v3605_v27 }
 0x299   :  { %1064 = vmatprep.mubr.bf16.mxu0 %v5064_v9  ;;  %1105 = vmatprep.mubr.bf16.mxu1 %v5064_v9 }
 0x29b   :  { %1035 = vmatpush1.bf16.msra.mxu0 %v5065_v54  ;;  %1076 = vmatpush1.bf16.msra.mxu1 %v5066_v39 }
 0x29c   :  { %1036 = vmatprep.subr.bf16.mxu0 %v5067_v17  ;;  %1077 = vmatprep.subr.bf16.mxu1 %v5068_v29  ;;  %v5079_v29 = vld [vmem:[#allocation103_spill] sm:$0xff] }
 0x29f   :  { %1037 = vmatpush1.bf16.msra.mxu0 %v5069_v19  ;;  %1078 = vmatpush1.bf16.msra.mxu1 %v5070_v24  ;;  %v5080_v19 = vld [vmem:[#allocation105_spill] sm:$0xff]  ;;  %v5081_v24 = vld [vmem:[#allocation106_spill] sm:$0xff] }
 0x2a0   :  { %1038 = vmatprep.subr.bf16.mxu0 %v5071_v22  ;;  %1079 = vmatprep.subr.bf16.mxu1 %v5072_v61 }
 0x2a3   :  { %1039 = vmatpush1.bf16.msra.mxu0 %v5073_v38  ;;  %1080 = vmatpush1.bf16.msra.mxu1 %v5074_v14 }
 0x2a4   :  { %1040 = vmatprep.subr.bf16.mxu0 %v5075_v57  ;;  %1081 = vmatprep.subr.bf16.mxu1 %v5076_v37 }
 0x2a7   :  { %1041 = vmatpush1.bf16.msra.mxu0 %v5077_v8  ;;  %1082 = vmatpush1.bf16.msra.mxu1 %v5078_v11 }
 0x2a8   :  { %1042 = vmatprep.subr.bf16.mxu0 %v5079_v29  ;;  %1083 = vmatprep.subr.bf16.mxu1 %v5080_v19 }
 0x2ab   :  { %1043 = vmatpush1.bf16.msra.mxu0 %v5081_v24  ;;  %1084 = vmatpush1.bf16.msra.mxu1 %v3665_v30 }
 0x2ac   :  { %1044 = vmatprep.subr.bf16.mxu0 %v3662_v25  ;;  %1085 = vmatprep.subr.bf16.mxu1 %v3668_v28 }
 0x2af   :  { %1045 = vmatpush1.bf16.msra.mxu0 %v3671_v53  ;;  %1086 = vmatpush1.bf16.msra.mxu1 %v3677_v47 }
 0x2b0   :  { %1046 = vmatprep.subr.bf16.mxu0 %v3674_v50  ;;  %1087 = vmatprep.subr.bf16.mxu1 %v3680_v42 }
 0x2b3   :  { %1047 = vmatpush1.bf16.msra.mxu0 %v3683_v55  ;;  %1088 = vmatpush1.bf16.msra.mxu1 %v3687_v31 }
 0x2b4   :  { %1168 = vmatprep.subr.bf16.mxu0 %v3400_v40  ;;  %1209 = vmatprep.subr.bf16.mxu1 %v3408_v46  ;;  %v5095_v40 = vld [vmem:[#allocation69_spill] sm:$0xff]  ;;  %v5098_v46 = vld [vmem:[#allocation71_spill] sm:$0xff] }
 0x2b6   :  { %1065 = vmatmul.mubr.bf16.vlgmr.msra.gmra.mrb[28].mxu0 %v920_v12  ;;  %1106 = vmatmul.mubr.bf16.vlgmr.msra.gmra.mrb[28].mxu1 %v920_v12  ;;  %v5114_v12 = vld [vmem:[#allocation22_spill] sm:$0xff] }
 0x2b7   :  { %1169 = vmatpush1.bf16.msra.mxu0 %v3402_v45  ;;  %1210 = vmatpush1.bf16.msra.mxu1 %v3414_v51  ;;  %v5096_v45 = vld [vmem:[#allocation68_spill] sm:$0xff] }
 0x2b8   :  { %1170 = vmatprep.subr.bf16.mxu0 %v3404_v43  ;;  %1211 = vmatprep.subr.bf16.mxu1 %v3416_v52  ;;  %v5097_v43 = vld [vmem:[#allocation70_spill] sm:$0xff]  ;;  %v5100_v51 = vld [vmem:[#allocation72_spill] sm:$0xff] }
 0x2b9   :  { %v5101_v52 = vld [vmem:[#allocation74_spill] sm:$0xff] }
 0x2bb   :  { %1171 = vmatpush1.bf16.msra.mxu0 %v3411_v48  ;;  %1212 = vmatpush1.bf16.msra.mxu1 %v3422_v58  ;;  %v5099_v48 = vld [vmem:[#allocation73_spill] sm:$0xff] }
 0x2bc   :  { %1172 = vmatprep.subr.bf16.mxu0 %v3418_v56  ;;  %1213 = vmatprep.subr.bf16.mxu1 %v3425_v60  ;;  %v5102_v56 = vld [vmem:[#allocation75_spill] sm:$0xff]  ;;  %v5103_v58 = vld [vmem:[#allocation77_spill] sm:$0xff]  ;;  %v5104_v60 = vld [vmem:[#allocation76_spill] sm:$0xff] }
 0x2bf   :  { %1173 = vmatpush1.bf16.msra.mxu0 %v3428_v62  ;;  %1214 = vmatpush1.bf16.msra.mxu1 %v3434_v13  ;;  %v5105_v62 = vld [vmem:[#allocation78_spill] sm:$0xff]  ;;  %v5107_v13 = vld [vmem:[#allocation81_spill] sm:$0xff] }
 0x2c0   :  { %1174 = vmatprep.subr.bf16.mxu0 %v3430_v63  ;;  %1215 = vmatprep.subr.bf16.mxu1 %v3437_v16  ;;  %v5106_v63 = vld [vmem:[#allocation79_spill] sm:$0xff]  ;;  %v5108_v16 = vld [vmem:[#allocation80_spill] sm:$0xff] }
 0x2c3   :  { %1175 = vmatpush1.bf16.msra.mxu0 %v3440_v18  ;;  %1216 = vmatpush1.bf16.msra.mxu1 %v3446_v21  ;;  %v5109_v18 = vld [vmem:[#allocation82_spill] sm:$0xff]  ;;  %v5111_v21 = vld [vmem:[#allocation85_spill] sm:$0xff] }
 0x2c4   :  { %1176 = vmatprep.subr.bf16.mxu0 %v3442_v20  ;;  %1217 = vmatprep.subr.bf16.mxu1 %v3449_v23  ;;  %v5110_v20 = vld [vmem:[#allocation83_spill] sm:$0xff]  ;;  %v5112_v23 = vld [vmem:[#allocation84_spill] sm:$0xff] }
 0x2c7   :  { %1177 = vmatpush1.bf16.msra.mxu0 %v3452_v34  ;;  %1218 = vmatpush1.bf16.msra.mxu1 %v3458_v36  ;;  %v5113_v34 = vld [vmem:[#allocation86_spill] sm:$0xff] }
 0x2c8   :  { %1178 = vmatprep.subr.bf16.mxu0 %v3454_v32  ;;  %1219 = vmatprep.subr.bf16.mxu1 %v3461_v10  ;;  %v5090_v10 = vld [vmem:[#allocation63_spill] sm:$0xff] }
 0x2cb   :  { %1179 = vmatpush1.bf16.msra.mxu0 %v3464_v7  ;;  %1220 = vmatpush1.bf16.msra.mxu1 %v3470_v5  ;;  %v5082_v5 = vld [vmem:[#allocation55_spill] sm:$0xff]  ;;  %v5089_v7 = vld [vmem:[#allocation62_spill] sm:$0xff] }
 0x2cc   :  { %1180 = vmatprep.subr.bf16.mxu0 %v3466_v6  ;;  %1221 = vmatprep.subr.bf16.mxu1 %v3473_v4  ;;  %v5083_v6 = vld [vmem:[#allocation57_spill] sm:$0xff]  ;;  %v5084_v4 = vld [vmem:[#allocation56_spill] sm:$0xff] }
 0x2cf   :  { %1181 = vmatpush1.bf16.msra.mxu0 %v3476_v3  ;;  %1222 = vmatpush1.bf16.msra.mxu1 %v3482_v1  ;;  %v5085_v3 = vld [vmem:[#allocation58_spill] sm:$0xff]  ;;  %v5086_v1 = vld [vmem:[#allocation59_spill] sm:$0xff] }
 0x2d0   :  { %1182 = vmatprep.subr.bf16.mxu0 %v3478_v2  ;;  %1223 = vmatprep.subr.bf16.mxu1 %v3485_v0  ;;  %v5087_v2 = vld [vmem:[#allocation61_spill] sm:$0xff]  ;;  %v5088_v0 = vld [vmem:[#allocation60_spill] sm:$0xff] }
 0x2d3   :  { %1183 = vmatpush1.bf16.msra.mxu0 %v3488_v26  ;;  %1224 = vmatpush1.bf16.msra.mxu1 %v3494_v15  ;;  %v5091_v15 = vld [vmem:[#allocation65_spill] sm:$0xff]  ;;  %v5094_v26 = vld [vmem:[#allocation67_spill] sm:$0xff] }
 0x2d4   :  { %1184 = vmatprep.subr.bf16.mxu0 %v3490_v33  ;;  %1225 = vmatprep.subr.bf16.mxu1 %v3497_v59  ;;  %v5092_v59 = vld [vmem:[#allocation64_spill] sm:$0xff]  ;;  %v5093_v33 = vld [vmem:[#allocation66_spill] sm:$0xff] }
 0x2d7   :  { %1185 = vmatpush1.bf16.msra.mxu0 %v5082_v5  ;;  %1226 = vmatpush1.bf16.msra.mxu1 %v5083_v6 }
 0x2d8   :  { %1186 = vmatprep.subr.bf16.mxu0 %v5084_v4  ;;  %1227 = vmatprep.subr.bf16.mxu1 %v5085_v3  ;;  %v5115_v3 = vld [vmem:[#allocation23_spill] sm:$0xff] }
 0x2db   :  { %1187 = vmatpush1.bf16.msra.mxu0 %v5086_v1  ;;  %1228 = vmatpush1.bf16.msra.mxu1 %v5087_v2 }
 0x2dc   :  { %1188 = vmatprep.subr.bf16.mxu0 %v5088_v0  ;;  %1229 = vmatprep.subr.bf16.mxu1 %v5089_v7 }
 0x2df   :  { %1189 = vmatpush1.bf16.msra.mxu0 %v5090_v10  ;;  %1230 = vmatpush1.bf16.msra.mxu1 %v5091_v15 }
 0x2e0   :  { %1190 = vmatprep.subr.bf16.mxu0 %v5092_v59  ;;  %1231 = vmatprep.subr.bf16.mxu1 %v5093_v33  ;;  %v5116_v33 = vld [vmem:[#allocation24_spill] sm:$0xff] }
 0x2e3   :  { %1191 = vmatpush1.bf16.msra.mxu0 %v5094_v26  ;;  %1232 = vmatpush1.bf16.msra.mxu1 %v5095_v40  ;;  %v5117_v40 = vld [vmem:[#allocation25_spill] sm:$0xff] }
 0x2e4   :  { %1192 = vmatprep.subr.bf16.mxu0 %v5096_v45  ;;  %1233 = vmatprep.subr.bf16.mxu1 %v5097_v43 }
 0x2e7   :  { %1193 = vmatpush1.bf16.msra.mxu0 %v5098_v46  ;;  %1234 = vmatpush1.bf16.msra.mxu1 %v5099_v48 }
 0x2e8   :  { %1194 = vmatprep.subr.bf16.mxu0 %v5100_v51  ;;  %1235 = vmatprep.subr.bf16.mxu1 %v5101_v52 }
 0x2eb   :  { %1195 = vmatpush1.bf16.msra.mxu0 %v5102_v56  ;;  %1236 = vmatpush1.bf16.msra.mxu1 %v5103_v58 }
 0x2ec   :  { %1196 = vmatprep.subr.bf16.mxu0 %v5104_v60  ;;  %1237 = vmatprep.subr.bf16.mxu1 %v5105_v62 }
 0x2ef   :  { %1197 = vmatpush1.bf16.msra.mxu0 %v5106_v63  ;;  %1238 = vmatpush1.bf16.msra.mxu1 %v5107_v13 }
 0x2f0   :  { %1198 = vmatprep.subr.bf16.mxu0 %v5108_v16  ;;  %1239 = vmatprep.subr.bf16.mxu1 %v5109_v18 }
 0x2f3   :  { %1199 = vmatpush1.bf16.msra.mxu0 %v5110_v20  ;;  %1240 = vmatpush1.bf16.msra.mxu1 %v5111_v21 }
 0x2f4   :  { %1254 = vmatprep.subr.bf16.mxu0 %v5112_v23  ;;  %1295 = vmatprep.subr.bf16.mxu1 %v5113_v34 }
 0x369   :  { %v980_v32 = vpop.f32.mrb[24].mxu0  ;;  %v1021_v36 = vpop.f32.mrb[24].mxu1 }
 0x36a   :  { %v981_v5 = vadd.f32 %v980_v32, %v5114_v12  ;;  %v982_v6 = vpop.f32.mrb[25].mxu0  ;;  %v1023_v4 = vpop.f32.mrb[25].mxu1  ;;  %v1022_v26 = vadd.f32 %v1021_v36, %v5116_v33 }
 0x36b   :  { %v983_v1 = vadd.f32 %v982_v6, %v5115_v3  ;;  %v984_v2 = vpop.f32.mrb[26].mxu0  ;;  %v1025_v0 = vpop.f32.mrb[26].mxu1  ;;  %v1024_v45 = vadd.f32 %v1023_v4, %v5117_v40 }
 0x36c   :  { %v2536_v7 = vmul.f32 -1.442695, %v981_v5  ;;  %v985_v10 = vpop.f32.mrb[27].mxu0  ;;  %v1026_v15 = vpop.f32.mrb[27].mxu1  ;;  %v2538_v43 = vmul.f32 -1.442695, %v1022_v26 }
 0x36d   :  { %v2537_v59 = vmul.f32 -1.442695, %v983_v1  ;;  %v5118_v15 = vld [vmem:[#allocation107_spill] sm:$0xff]  ;;  %v5119_v26 = vld [vmem:[#allocation30_spill] sm:$0xff] }
 0x36e   :  { %2730 = vpow2.f32 %v2536_v7 }
 0x36f   :  { %2732 = vpow2.f32 %v2537_v59 }
 0x370   :  { %2734 = vtanh.f32 %v1024_v45 }
 0x371   :  { %2736 = vpow2.f32 %v2538_v43  ;;  %v5120_v43 = vld [vmem:[#allocation31_spill] sm:$0xff] }
 0x378   :  { %v2731_v46 = vpop.eup %2730 }
 0x379   :  { %v1152_v51 = vadd.f32 1.0, %v2731_v46  ;;  %v2733_v32 = vpop.eup %2732 }
 0x37a   :  { %v1153_v6 = vadd.f32 1.0, %v2733_v32  ;;  %v2735_v2 = vpop.eup %2734 }
 0x37b   :  { %2738 = vrcp.f32 %v1152_v51  ;;  %v2737_v5 = vpop.eup %2736 }
 0x37c   :  { %2740 = vrcp.f32 %v1153_v6  ;;  %v1154_v7 = vadd.f32 1.0, %v2737_v5 }
 0x37e   :  { %2742 = vrcp.f32 %v1154_v7 }
 0x385   :  { %v2739_v0 = vpop.eup %2738 }
 0x386   :  { %v1163_v10 = vmul.f32 %v2739_v0, %v2735_v2  ;;  %v2741_v1 = vpop.eup %2740  ;;  %v5121_v0 = vld [vmem:[#allocation33_spill] sm:$0xff] }
 0x387   :  { %v1162_v59 = vmul.f32 %v2741_v1, %v5118_v15  ;;  %v5122_v15 = vld [vmem:[#allocation35_spill] sm:$0xff] }
 0x388   :  { %v2743_v1 = vpop.eup %2742 }
 0x389   :  { %v1066_v36 = vpop.f32.mrb[28].mxu0  ;;  %v1107_v33 = vpop.f32.mrb[28].mxu1  ;;  %v3878_v4 = vadd.f32 %v1163_v10, %v1162_v59 }
 0x38a   :  { %v1114_v46 = vadd.f32 %v1066_v36, %v5119_v26  ;;  %v1068_v45 = vpop.f32.mrb[29].mxu0  ;;  %v1109_v40 = vpop.f32.mrb[29].mxu1  ;;  %v1116_v10 = vadd.f32 %v1107_v33, %v5121_v0 }
 0x38b   :  { %v1115_v51 = vadd.f32 %v1068_v45, %v5120_v43  ;;  %v1070_v32 = vpop.f32.mrb[30].mxu0  ;;  %v1111_v6 = vpop.f32.mrb[30].mxu1  ;;  %2744 = vtanh.f32 %v3878_v4  ;;  %v1117_v59 = vadd.f32 %v1109_v40, %v5122_v15  ;;  %v5124_v15 = vld [vmem:[#allocation94_spill] sm:$0xff] }
 0x38c   :  { %v2533_v3 = vmul.f32 -1.442695, %v1114_v46  ;;  %v1071_v12 = vpop.f32.mrb[31].mxu0  ;;  %v1112_v2 = vpop.f32.mrb[31].mxu1  ;;  %v2535_v26 = vmul.f32 -1.442695, %v1116_v10 }
 0x38d   :  { %v2534_v5 = vmul.f32 -1.442695, %v1115_v51 }
 0x38e   :  { %2746 = vpow2.f32 %v2533_v3 }
 0x38f   :  { %2748 = vpow2.f32 %v2534_v5 }
 0x390   :  { %2750 = vtanh.f32 %v1117_v59  ;;  %v3999_v59 = vld [vmem:[#allocation3 + $0xc0] sm:$0xff] }
 0x391   :  { %2752 = vpow2.f32 %v2535_v26  ;;  %5132 = vst [vmem:[#allocation89_spill] sm:$0xff] %v3999_v59  ;;  %v4005_v26 = vld [vmem:[#allocation3 + $0xe8] sm:$0xff] }
 0x392   :  { %5134 = vst [vmem:[#allocation90_spill] sm:$0xff] %v4005_v26 }
 0x395   :  { %v2745_v36 = vpop.eup %2744 }
 0x396   :  { %v1166_v7 = vmul.f32 %v2745_v36, %v2743_v1  ;;  %v4002_v36 = vld [vmem:[#allocation3 + $0xd0] sm:$0xff] }
 0x397   :  { %5133 = vst [vmem:[#allocation88_spill] sm:$0xff] %v4002_v36 }
 0x398   :  { %v2747_v34 = vpop.eup %2746  ;;  %v1167_v43 = vpack.c.bf16 %v1166_v7, %v1166_v7  ;;  %v4008_v7 = vld [vmem:[#allocation3 + $0xf8] sm:$0xff] }
 0x399   :  { %v1127_v45 = vadd.f32 1.0, %v2747_v34  ;;  %v2749_v46 = vpop.eup %2748  ;;  %5135 = vst [vmem:[#allocation92_spill] sm:$0xff] %v4008_v7 }
 0x39a   :  { %v1128_v12 = vadd.f32 1.0, %v2749_v46  ;;  %1200 = vmatprep.mubr.bf16.mxu0 %v1167_v43  ;;  %1241 = vmatprep.mubr.bf16.mxu1 %v1167_v43  ;;  %v2751_v3 = vpop.eup %2750  ;;  %v4014_v43 = vld [vmem:[#allocation3 + $0xf0] sm:$0xff]  ;;  %v4017_v46 = vld [vmem:[#allocation3 + $0x108] sm:$0xff] }
 0x39b   :  { %2754 = vrcp.f32 %v1127_v45  ;;  %v2753_v51 = vpop.eup %2752  ;;  %v4011_v45 = vld [vmem:[#allocation3 + $0xe0] sm:$0xff]  ;;  %5137 = vst [vmem:[#allocation95_spill] sm:$0xff] %v4014_v43  ;;  %5138 = vst [vmem:[#allocation97_spill] sm:$0xff] %v4017_v46 }
 0x39c   :  { %2756 = vrcp.f32 %v1128_v12  ;;  %v1129_v40 = vadd.f32 1.0, %v2753_v51  ;;  %5136 = vst [vmem:[#allocation91_spill] sm:$0xff] %v4011_v45  ;;  %v4020_v12 = vld [vmem:[#allocation3 + $0x118] sm:$0xff]  ;;  %v4026_v51 = vld [vmem:[#allocation3 + $0x110] sm:$0xff] }
 0x39d   :  { %5139 = vst [vmem:[#allocation98_spill] sm:$0xff] %v4020_v12  ;;  %5141 = vst [vmem:[#allocation99_spill] sm:$0xff] %v4026_v51 }
 0x39e   :  { %2758 = vrcp.f32 %v1129_v40  ;;  %v4038_v40 = vld [vmem:[#allocation3 + $0x130] sm:$0xff] }
 0x39f   :  { %5145 = vst [vmem:[#allocation103_spill] sm:$0xff] %v4038_v40 }
 0x3a5   :  { %v2755_v33 = vpop.eup %2754 }
 0x3a6   :  { %v1138_v32 = vmul.f32 %v2755_v33, %v2751_v3  ;;  %v2757_v6 = vpop.eup %2756  ;;  %v4023_v3 = vld [vmem:[#allocation3 + $0x100] sm:$0xff]  ;;  %v4029_v33 = vld [vmem:[#allocation3 + $0x128] sm:$0xff] }
 0x3a7   :  { %v1137_v2 = vmul.f32 %v2757_v6, %v3772_v41  ;;  %v5123_v41 = vld [vmem:[#allocation93_spill] sm:$0xff]  ;;  %5140 = vst [vmem:[#allocation100_spill] sm:$0xff] %v4023_v3  ;;  %5142 = vst [vmem:[#allocation101_spill] sm:$0xff] %v4029_v33  ;;  %v4035_v6 = vld [vmem:[#allocation3 + $0x120] sm:$0xff] }
 0x3a8   :  { %v2759_v34 = vpop.eup %2758  ;;  %5144 = vst [vmem:[#allocation104_spill] sm:$0xff] %v4035_v6 }
 0x3a9   :  { %v3886_v5 = vadd.f32 %v1138_v32, %v1137_v2  ;;  %v4032_v32 = vld [vmem:[#allocation3 + $0x138] sm:$0xff]  ;;  %v4041_v2 = vld [vmem:[#allocation3 + $0x148] sm:$0xff] }
 0x3aa   :  { %5143 = vst [vmem:[#allocation102_spill] sm:$0xff] %v4032_v32  ;;  %5146 = vst [vmem:[#allocation105_spill] sm:$0xff] %v4041_v2 }
 0x3ab   :  { %2760 = vtanh.f32 %v3886_v5 }
 0x3b5   :  { %v2761_v0 = vpop.eup %2760 }
 0x3b6   :  { %v1141_v10 = vmul.f32 %v2761_v0, %v2759_v34  ;;  %v4044_v34 = vld [vmem:[#allocation3 + $0x158] sm:$0xff]  ;;  %v4047_v0 = vld [vmem:[#allocation3 + $0x140] sm:$0xff] }
 0x3b7   :  { %5147 = vst [vmem:[#allocation106_spill] sm:$0xff] %v4044_v34  ;;  %5148 = vst [vmem:[#allocation55_spill] sm:$0xff] %v4047_v0 }
 0x3b8   :  { %v1142_v1 = vpack.c.bf16 %v1141_v10, %v1141_v10  ;;  %v4050_v10 = vld [vmem:[#allocation3 + $0x150] sm:$0xff] }
 0x3b9   :  { %5149 = vst [vmem:[#allocation57_spill] sm:$0xff] %v4050_v10 }
 0x3ba   :  { %1201 = vmatmul.mubr.bf16.vlgmr.msra.gmra.mrb[32].mxu0 %v1142_v1  ;;  %1242 = vmatmul.mubr.bf16.vlgmr.msra.gmra.mrb[32].mxu1 %v1142_v1 }
 0x3bb   :  { %1255 = vmatpush1.bf16.msra.mxu0 %v5061_v49  ;;  %1296 = vmatpush1.bf16.msra.mxu1 %v5062_v44  ;;  %v5125_v49 = vld [vmem:[#allocation96_spill] sm:$0xff]  ;;  %v3951_v44 = vld [vmem:[#allocation3 + $0x40] sm:$0xff] }
 0x3bc   :  { %1256 = vmatprep.subr.bf16.mxu0 %v5063_v35  ;;  %1297 = vmatprep.subr.bf16.mxu1 %v3605_v27  ;;  %v3921_v27 = vld [vmem:[#allocation3 + $0x8] sm:$0xff]  ;;  %v3954_v35 = vld [vmem:[#allocation3 + $0x50] sm:$0xff] }
 0x3bd   :  { %1286 = vmatprep.mubr.bf16.mxu0 %v5064_v9  ;;  %1327 = vmatprep.mubr.bf16.mxu1 %v5064_v9 }
 0x3bf   :  { %1257 = vmatpush1.bf16.msra.mxu0 %v5065_v54  ;;  %1298 = vmatpush1.bf16.msra.mxu1 %v5066_v39  ;;  %v3957_v54 = vld [vmem:[#allocation3 + $0x68] sm:$0xff]  ;;  %v3960_v39 = vld [vmem:[#allocation3 + $0x78] sm:$0xff] }
 0x3c0   :  { %1258 = vmatprep.subr.bf16.mxu0 %v5067_v17  ;;  %1299 = vmatprep.subr.bf16.mxu1 %v5123_v41  ;;  %v3963_v17 = vld [vmem:[#allocation3 + $0x60] sm:$0xff]  ;;  %v4056_v41 = vld [vmem:[#allocation3 + $0x178] sm:$0xff] }
 0x3c1   :  { %5151 = vst [vmem:[#allocation58_spill] sm:$0xff] %v4056_v41 }
 0x3c3   :  { %1259 = vmatpush1.bf16.msra.mxu0 %v5124_v15  ;;  %1300 = vmatpush1.bf16.msra.mxu1 %v5125_v49  ;;  %v4059_v15 = vld [vmem:[#allocation3 + $0x160] sm:$0xff]  ;;  %v4062_v49 = vld [vmem:[#allocation3 + $0x170] sm:$0xff] }
 0x3c4   :  { %1260 = vmatprep.subr.bf16.mxu0 %v5071_v22  ;;  %1301 = vmatprep.subr.bf16.mxu1 %v5072_v61  ;;  %v3975_v22 = vld [vmem:[#allocation3 + $0x80] sm:$0xff]  ;;  %v3978_v61 = vld [vmem:[#allocation3 + $0x90] sm:$0xff]  ;;  %5152 = vst [vmem:[#allocation59_spill] sm:$0xff] %v4059_v15  ;;  %5153 = vst [vmem:[#allocation61_spill] sm:$0xff] %v4062_v49 }
 0x3c7   :  { %1261 = vmatpush1.bf16.msra.mxu0 %v5073_v38  ;;  %1302 = vmatpush1.bf16.msra.mxu1 %v5074_v14  ;;  %v3981_v38 = vld [vmem:[#allocation3 + $0xa8] sm:$0xff]  ;;  %v3984_v14 = vld [vmem:[#allocation3 + $0xb8] sm:$0xff] }
 0x3c8   :  { %1262 = vmatprep.subr.bf16.mxu0 %v5075_v57  ;;  %1303 = vmatprep.subr.bf16.mxu1 %v5076_v37  ;;  %5126 = vst [vmem:[#allocation26_spill] sm:$0xff] %v3981_v38  ;;  %5127 = vst [vmem:[#allocation27_spill] sm:$0xff] %v3984_v14  ;;  %v3987_v57 = vld [vmem:[#allocation3 + $0xa0] sm:$0xff]  ;;  %v3990_v37 = vld [vmem:[#allocation3 + $0xb0] sm:$0xff] }
 0x3c9   :  { %5128 = vst [vmem:[#allocation28_spill] sm:$0xff] %v3987_v57  ;;  %5129 = vst [vmem:[#allocation29_spill] sm:$0xff] %v3990_v37 }
 0x3cb   :  { %1263 = vmatpush1.bf16.msra.mxu0 %v5077_v8  ;;  %1304 = vmatpush1.bf16.msra.mxu1 %v5078_v11  ;;  %v3993_v8 = vld [vmem:[#allocation3 + $0xc8] sm:$0xff]  ;;  %v3996_v11 = vld [vmem:[#allocation3 + $0xd8] sm:$0xff] }
 0x3cc   :  { %1264 = vmatprep.subr.bf16.mxu0 %v5079_v29  ;;  %1305 = vmatprep.subr.bf16.mxu1 %v5080_v19  ;;  %v3966_v29 = vld [vmem:[#allocation3 + $0x70] sm:$0xff]  ;;  %v3969_v19 = vld [vmem:[#allocation3 + $0x88] sm:$0xff]  ;;  %5130 = vst [vmem:[#allocation54_spill] sm:$0xff] %v3993_v8  ;;  %5131 = vst [vmem:[#allocation87_spill] sm:$0xff] %v3996_v11 }
 0x3cf   :  { %1265 = vmatpush1.bf16.msra.mxu0 %v5081_v24  ;;  %1306 = vmatpush1.bf16.msra.mxu1 %v3665_v30  ;;  %v3924_v30 = vld [vmem:[#allocation3 + $0x18] sm:$0xff] }
 0x3d0   :  { %1266 = vmatprep.subr.bf16.mxu0 %v3662_v25  ;;  %1307 = vmatprep.subr.bf16.mxu1 %v3668_v28  ;;  %v3927_v25 = vld [vmem:[#allocation3] sm:$0xff]  ;;  %v3948_v28 = vld [vmem:[#allocation3 + $0x58] sm:$0xff] }
 0x3d1   :  { %v3972_v24 = vld [vmem:[#allocation3 + $0x98] sm:$0xff] }
 0x3d3   :  { %1267 = vmatpush1.bf16.msra.mxu0 %v3671_v53  ;;  %1308 = vmatpush1.bf16.msra.mxu1 %v3677_v47  ;;  %v3930_v47 = vld [vmem:[#allocation3 + $0x10] sm:$0xff] }
 0x3d4   :  { %1268 = vmatprep.subr.bf16.mxu0 %v3674_v50  ;;  %1309 = vmatprep.subr.bf16.mxu1 %v3680_v42  ;;  %v3933_v42 = vld [vmem:[#allocation3 + $0x28] sm:$0xff]  ;;  %v3939_v50 = vld [vmem:[#allocation3 + $0x20] sm:$0xff]  ;;  %v3942_v53 = vld [vmem:[#allocation3 + $0x30] sm:$0xff] }
 0x3d7   :  { %1269 = vmatpush1.bf16.msra.mxu0 %v3683_v55  ;;  %1310 = vmatpush1.bf16.msra.mxu1 %v3687_v31  ;;  %v3936_v31 = vld [vmem:[#allocation3 + $0x38] sm:$0xff]  ;;  %v3945_v55 = vld [vmem:[#allocation3 + $0x48] sm:$0xff] }
 0x3d8   :  { %1390 = vmatprep.subr.bf16.mxu0 %v3921_v27  ;;  %1431 = vmatprep.subr.bf16.mxu1 %v3924_v30 }
 0x3da   :  { %1287 = vmatmul.mubr.bf16.vlgmr.msra.gmra.mrb[36].mxu0 %v1142_v1  ;;  %1328 = vmatmul.mubr.bf16.vlgmr.msra.gmra.mrb[36].mxu1 %v1142_v1  ;;  %v4053_v1 = vld [vmem:[#allocation3 + $0x168] sm:$0xff] }
 0x3db   :  { %1391 = vmatpush1.bf16.msra.mxu0 %v3927_v25  ;;  %1432 = vmatpush1.bf16.msra.mxu1 %v3930_v47  ;;  %5150 = vst [vmem:[#allocation56_spill] sm:$0xff] %v4053_v1 }
 0x3dc   :  { %1392 = vmatprep.subr.bf16.mxu0 %v3933_v42  ;;  %1433 = vmatprep.subr.bf16.mxu1 %v3936_v31 }
 0x3df   :  { %1393 = vmatpush1.bf16.msra.mxu0 %v3939_v50  ;;  %1434 = vmatpush1.bf16.msra.mxu1 %v3942_v53 }
 0x3e0   :  { %1394 = vmatprep.subr.bf16.mxu0 %v3945_v55  ;;  %1435 = vmatprep.subr.bf16.mxu1 %v3948_v28 }
 0x3e3   :  { %1395 = vmatpush1.bf16.msra.mxu0 %v3951_v44  ;;  %1436 = vmatpush1.bf16.msra.mxu1 %v3954_v35 }
 0x3e4   :  { %1396 = vmatprep.subr.bf16.mxu0 %v3957_v54  ;;  %1437 = vmatprep.subr.bf16.mxu1 %v3960_v39 }
 0x3e7   :  { %1397 = vmatpush1.bf16.msra.mxu0 %v3963_v17  ;;  %1438 = vmatpush1.bf16.msra.mxu1 %v3966_v29 }
 0x3e8   :  { %1398 = vmatprep.subr.bf16.mxu0 %v3969_v19  ;;  %1439 = vmatprep.subr.bf16.mxu1 %v3972_v24 }
 0x3eb   :  { %1399 = vmatpush1.bf16.msra.mxu0 %v3975_v22  ;;  %1440 = vmatpush1.bf16.msra.mxu1 %v3978_v61 }
 0x3ec   :  { %1400 = vmatprep.subr.bf16.mxu0 %v3981_v38  ;;  %1441 = vmatprep.subr.bf16.mxu1 %v3984_v14 }
 0x3ef   :  { %1401 = vmatpush1.bf16.msra.mxu0 %v3987_v57  ;;  %1442 = vmatpush1.bf16.msra.mxu1 %v3990_v37 }
 0x3f0   :  { %1402 = vmatprep.subr.bf16.mxu0 %v3993_v8  ;;  %1443 = vmatprep.subr.bf16.mxu1 %v3996_v11 }
 0x3f3   :  { %1403 = vmatpush1.bf16.msra.mxu0 %v3999_v59  ;;  %1444 = vmatpush1.bf16.msra.mxu1 %v4002_v36 }
 0x3f4   :  { %1404 = vmatprep.subr.bf16.mxu0 %v4005_v26  ;;  %1445 = vmatprep.subr.bf16.mxu1 %v4008_v7 }
 0x3f7   :  { %1405 = vmatpush1.bf16.msra.mxu0 %v4011_v45  ;;  %1446 = vmatpush1.bf16.msra.mxu1 %v4014_v43 }
 0x3f8   :  { %1406 = vmatprep.subr.bf16.mxu0 %v4017_v46  ;;  %1447 = vmatprep.subr.bf16.mxu1 %v4020_v12 }
 0x3fb   :  { %1407 = vmatpush1.bf16.msra.mxu0 %v4023_v3  ;;  %1448 = vmatpush1.bf16.msra.mxu1 %v4026_v51 }
 0x3fc   :  { %1408 = vmatprep.subr.bf16.mxu0 %v4029_v33  ;;  %1449 = vmatprep.subr.bf16.mxu1 %v4032_v32 }
 0x3ff   :  { %1409 = vmatpush1.bf16.msra.mxu0 %v4035_v6  ;;  %1450 = vmatpush1.bf16.msra.mxu1 %v4038_v40 }
 0x400   :  { %1410 = vmatprep.subr.bf16.mxu0 %v4041_v2  ;;  %1451 = vmatprep.subr.bf16.mxu1 %v4044_v34 }
 0x403   :  { %1411 = vmatpush1.bf16.msra.mxu0 %v4047_v0  ;;  %1452 = vmatpush1.bf16.msra.mxu1 %v4050_v10  ;;  %v4065_v0 = vld [vmem:[#allocation3 + $0x188] sm:$0xff]  ;;  %v4068_v10 = vld [vmem:[#allocation3 + $0x198] sm:$0xff] }
 0x404   :  { %1412 = vmatprep.subr.bf16.mxu0 %v4053_v1  ;;  %1453 = vmatprep.subr.bf16.mxu1 %v4056_v41  ;;  %5154 = vst [vmem:[#allocation60_spill] sm:$0xff] %v4065_v0  ;;  %5155 = vst [vmem:[#allocation62_spill] sm:$0xff] %v4068_v10  ;;  %v4071_v1 = vld [vmem:[#allocation3 + $0x180] sm:$0xff]  ;;  %v4075_v41 = vld [vmem:[#allocation3 + $0x1a8] sm:$0xff] }
 0x405   :  { %5156 = vst [vmem:[#allocation63_spill] sm:$0xff] %v4071_v1  ;;  %5157 = vst [vmem:[#allocation65_spill] sm:$0xff] %v4075_v41 }
 0x407   :  { %1413 = vmatpush1.bf16.msra.mxu0 %v4059_v15  ;;  %1454 = vmatpush1.bf16.msra.mxu1 %v4062_v49  ;;  %v5162_v49 = vld [vmem:[#allocation25_spill] sm:$0xff] }
 0x408   :  { %1414 = vmatprep.subr.bf16.mxu0 %v4065_v0  ;;  %1455 = vmatprep.subr.bf16.mxu1 %v4068_v10 }
 0x40b   :  { %1415 = vmatpush1.bf16.msra.mxu0 %v4071_v1  ;;  %1456 = vmatpush1.bf16.msra.mxu1 %v5099_v48  ;;  %v5158_v48 = vld [vmem:[#allocation86_spill] sm:$0xff] }
 0x40c   :  { %1416 = vmatprep.subr.bf16.mxu0 %v4075_v41  ;;  %1457 = vmatprep.subr.bf16.mxu1 %v5101_v52  ;;  %v5160_v41 = vld [vmem:[#allocation23_spill] sm:$0xff] }
 0x40f   :  { %1417 = vmatpush1.bf16.msra.mxu0 %v5102_v56  ;;  %1458 = vmatpush1.bf16.msra.mxu1 %v5103_v58  ;;  %v5159_v58 = vld [vmem:[#allocation22_spill] sm:$0xff] }
 0x410   :  { %1418 = vmatprep.subr.bf16.mxu0 %v5104_v60  ;;  %1459 = vmatprep.subr.bf16.mxu1 %v5105_v62 }
 0x413   :  { %1419 = vmatpush1.bf16.msra.mxu0 %v5106_v63  ;;  %1460 = vmatpush1.bf16.msra.mxu1 %v5107_v13 }
 0x414   :  { %1420 = vmatprep.subr.bf16.mxu0 %v5108_v16  ;;  %1461 = vmatprep.subr.bf16.mxu1 %v5109_v18 }
 0x417   :  { %1421 = vmatpush1.bf16.msra.mxu0 %v5110_v20  ;;  %1462 = vmatpush1.bf16.msra.mxu1 %v5111_v21  ;;  %v5161_v21 = vld [vmem:[#allocation24_spill] sm:$0xff] }
 0x418   :  { %1476 = vmatprep.subr.bf16.mxu0 %v5112_v23  ;;  %1517 = vmatprep.subr.bf16.mxu1 %v5158_v48 }
 0x48d   :  { %v1202_v52 = vpop.f32.mrb[32].mxu0  ;;  %v1243_v56 = vpop.f32.mrb[32].mxu1 }
 0x48e   :  { %v1203_v60 = vadd.f32 %v1202_v52, %v5159_v58  ;;  %v1204_v62 = vpop.f32.mrb[33].mxu0  ;;  %v1245_v63 = vpop.f32.mrb[33].mxu1  ;;  %v1244_v23 = vadd.f32 %v1243_v56, %v5161_v21 }
 0x48f   :  { %v1205_v13 = vadd.f32 %v1204_v62, %v5160_v41  ;;  %v1206_v1 = vpop.f32.mrb[34].mxu0  ;;  %v1247_v16 = vpop.f32.mrb[34].mxu1  ;;  %v1246_v48 = vadd.f32 %v1245_v63, %v5162_v49 }
 0x490   :  { %v2542_v10 = vmul.f32 -1.442695, %v1203_v60  ;;  %v1207_v18 = vpop.f32.mrb[35].mxu0  ;;  %v1248_v0 = vpop.f32.mrb[35].mxu1  ;;  %v2544_v15 = vmul.f32 -1.442695, %v1244_v23 }
 0x491   :  { %v2543_v20 = vmul.f32 -1.442695, %v1205_v13  ;;  %v5163_v23 = vld [vmem:[#allocation32_spill] sm:$0xff] }
 0x492   :  { %2762 = vpow2.f32 %v2542_v10 }
 0x493   :  { %2764 = vpow2.f32 %v2543_v20 }
 0x494   :  { %2766 = vtanh.f32 %v1246_v48 }
 0x495   :  { %2768 = vpow2.f32 %v2544_v15 }
 0x49c   :  { %v2763_v34 = vpop.eup %2762 }
 0x49d   :  { %v1374_v2 = vadd.f32 1.0, %v2763_v34  ;;  %v2765_v52 = vpop.eup %2764 }
 0x49e   :  { %v1375_v62 = vadd.f32 1.0, %v2765_v52  ;;  %v2767_v1 = vpop.eup %2766 }
 0x49f   :  { %2770 = vrcp.f32 %v1374_v2  ;;  %v2769_v60 = vpop.eup %2768  ;;  %v5164_v2 = vld [vmem:[#allocation34_spill] sm:$0xff] }
 0x4a0   :  { %2772 = vrcp.f32 %v1375_v62  ;;  %v1376_v10 = vadd.f32 1.0, %v2769_v60 }
 0x4a2   :  { %2774 = vrcp.f32 %v1376_v10 }
 0x4a9   :  { %v2771_v16 = vpop.eup %2770 }
 0x4aa   :  { %v1385_v0 = vmul.f32 %v2771_v16, %v2767_v1  ;;  %v2773_v13 = vpop.eup %2772 }
 0x4ab   :  { %v1384_v18 = vmul.f32 %v2773_v13, %v3878_v4  ;;  %v5165_v4 = vld [vmem:[#allocation36_spill] sm:$0xff]  ;;  %v5166_v13 = vld [vmem:[#allocation37_spill] sm:$0xff] }
 0x4ad   :  { %v1288_v56 = vpop.f32.mrb[36].mxu0  ;;  %v1329_v20 = vpop.f32.mrb[36].mxu1  ;;  %v4096_v63 = vadd.f32 %v1385_v0, %v1384_v18 }
 0x4ae   :  { %v1336_v34 = vadd.f32 %v1288_v56, %v5163_v23  ;;  %v1290_v48 = vpop.f32.mrb[37].mxu0  ;;  %v1331_v49 = vpop.f32.mrb[37].mxu1  ;;  %v1338_v16 = vadd.f32 %v1329_v20, %v5165_v4 }
 0x4af   :  { %v1337_v15 = vadd.f32 %v1290_v48, %v5164_v2  ;;  %v1292_v52 = vpop.f32.mrb[38].mxu0  ;;  %v1333_v62 = vpop.f32.mrb[38].mxu1  ;;  %2776 = vtanh.f32 %v4096_v63  ;;  %v1339_v18 = vadd.f32 %v1331_v49, %v5166_v13  ;;  %v4111_v13 = vld [vmem:[#allocation6 + $0x40] ss:$16 sps:$4 sm:$0xff]  }
 0x4b0   :  { %v2539_v21 = vmul.f32 -1.442695, %v1336_v34  ;;  %v1293_v41 = vpop.f32.mrb[39].mxu0  ;;  %v1334_v1 = vpop.f32.mrb[39].mxu1  ;;  %v2541_v23 = vmul.f32 -1.442695, %v1338_v16 }
 0x4b1   :  { %v2540_v60 = vmul.f32 -1.442695, %v1337_v15  ;;  %v2775_v0 = vpop.eup %2774 }
 0x4b2   :  { %2778 = vpow2.f32 %v2539_v21 }
 0x4b3   :  { %2780 = vpow2.f32 %v2540_v60 }
 0x4b4   :  { %2782 = vtanh.f32 %v1339_v18  ;;  %v4114_v18 = vld [vmem:[#allocation6 + $0x48] ss:$16 sps:$4 sm:$0xff]  }
 0x4b5   :  { %2784 = vpow2.f32 %v2541_v23  ;;  %v4125_v23 = vld [vmem:[#allocation6 + $0x60] ss:$16 sps:$4 sm:$0xff]  }
 0x4b9   :  { %v2777_v56 = vpop.eup %2776 }
 0x4ba   :  { %v1388_v10 = vmul.f32 %v2777_v56, %v2775_v0  ;;  %v4120_v56 = vld [vmem:[#allocation6 + $0x6c] ss:$16 sps:$4 sm:$0xff]  }
 0x4bc   :  { %v2779_v58 = vpop.eup %2778  ;;  %v1389_v2 = vpack.c.bf16 %v1388_v10, %v1388_v10  ;;  %v4128_v10 = vld [vmem:[#allocation6 + $0x68] ss:$16 sps:$4 sm:$0xff]  }
 0x4bd   :  { %v1349_v48 = vadd.f32 1.0, %v2779_v58  ;;  %v2781_v34 = vpop.eup %2780 }
 0x4be   :  { %v1350_v41 = vadd.f32 1.0, %v2781_v34  ;;  %1422 = vmatprep.mubr.bf16.mxu0 %v1389_v2  ;;  %1463 = vmatprep.mubr.bf16.mxu1 %v1389_v2  ;;  %v2783_v21 = vpop.eup %2782  ;;  %v4134_v2 = vld [vmem:[#allocation6 + $0x8c] ss:$16 sps:$4 sm:$0xff]   ;;  %v4137_v34 = vld [vmem:[#allocation6 + $0x80] ss:$16 sps:$4 sm:$0xff]  }
 0x4bf   :  { %2786 = vrcp.f32 %v1349_v48  ;;  %v2785_v15 = vpop.eup %2784  ;;  %v4131_v48 = vld [vmem:[#allocation6 + $0x84] ss:$16 sps:$4 sm:$0xff]  }
 0x4c0   :  { %2788 = vrcp.f32 %v1350_v41  ;;  %v1351_v49 = vadd.f32 1.0, %v2785_v15  ;;  %v4140_v41 = vld [vmem:[#allocation6 + $0x88] ss:$16 sps:$4 sm:$0xff]   ;;  %v4146_v15 = vld [vmem:[#allocation6 + $0xac] ss:$16 sps:$4 sm:$0xff]  }
 0x4c2   :  { %2790 = vrcp.f32 %v1351_v49  ;;  %v4158_v49 = vld [vmem:[#allocation6 + $0xcc] ss:$16 sps:$4 sm:$0xff]  }
 0x4c3   :  { %5168 = vst [vmem:[#allocation66_spill] sm:$0xff] %v4158_v49 }
 0x4c9   :  { %v2787_v20 = vpop.eup %2786 }
 0x4ca   :  { %v1360_v52 = vmul.f32 %v2787_v20, %v2783_v21  ;;  %v2789_v62 = vpop.eup %2788  ;;  %v4143_v21 = vld [vmem:[#allocation6 + $0xa4] ss:$16 sps:$4 sm:$0xff]   ;;  %v4149_v20 = vld [vmem:[#allocation6 + $0xa0] ss:$16 sps:$4 sm:$0xff]  }
 0x4cb   :  { %v1359_v1 = vmul.f32 %v2789_v62, %v3886_v5  ;;  %v4117_v5 = vld [vmem:[#allocation6 + $0x64] ss:$16 sps:$4 sm:$0xff]  }
 0x4cc   :  { %v2791_v58 = vpop.eup %2790  ;;  %v4155_v62 = vld [vmem:[#allocation6 + $0xc4] ss:$16 sps:$4 sm:$0xff]  }
 0x4cd   :  { %v4104_v60 = vadd.f32 %v1360_v52, %v1359_v1  ;;  %v4152_v52 = vld [vmem:[#allocation6 + $0xa8] ss:$16 sps:$4 sm:$0xff]   ;;  %5167 = vst [vmem:[#allocation64_spill] sm:$0xff] %v4155_v62  ;;  %v4161_v1 = vld [vmem:[#allocation6 + $0xc0] ss:$16 sps:$4 sm:$0xff]  }
 0x4ce   :  { %5169 = vst [vmem:[#allocation67_spill] sm:$0xff] %v4161_v1 }
 0x4cf   :  { %2792 = vtanh.f32 %v4104_v60 }
 0x4d9   :  { %v2793_v4 = vpop.eup %2792 }
 0x4da   :  { %v1363_v16 = vmul.f32 %v2793_v4, %v2791_v58  ;;  %v4164_v58 = vld [vmem:[#allocation6 + $0xc8] ss:$16 sps:$4 sm:$0xff]   ;;  %v4167_v4 = vld [vmem:[#allocation6 + $0xe4] ss:$16 sps:$4 sm:$0xff]  }
 0x4db   :  { %5170 = vst [vmem:[#allocation69_spill] sm:$0xff] %v4164_v58  ;;  %5171 = vst [vmem:[#allocation68_spill] sm:$0xff] %v4167_v4 }
 0x4dc   :  { %v4107_v0 = vpack.c.bf16 %v1363_v16, %v1363_v16  ;;  %v4170_v16 = vld [vmem:[#allocation6 + $0xec] ss:$16 sps:$4 sm:$0xff]  }
 0x4dd   :  { %5172 = vst [vmem:[#allocation70_spill] sm:$0xff] %v4170_v16 }
 0x4de   :  { %1423 = vmatmul.mubr.bf16.vlgmr.msra.gmra.mrb[40].mxu0 %v4107_v0  ;;  %1464 = vmatmul.mubr.bf16.vlgmr.msra.gmra.mrb[40].mxu1 %v4107_v0 }
 0x4df   :  { %1477 = vmatpush1.bf16.msra.mxu0 %v4111_v13  ;;  %1518 = vmatpush1.bf16.msra.mxu1 %v4114_v18 }
 0x4e0   :  { %1478 = vmatprep.subr.bf16.mxu0 %v4117_v5  ;;  %1519 = vmatprep.subr.bf16.mxu1 %v4120_v56 }
 0x4e1   :  { %1508 = vmatprep.mubr.bf16.mxu0 %v5064_v9  ;;  %1549 = vmatprep.mubr.bf16.mxu1 %v5064_v9 }
 0x4e3   :  { %1479 = vmatpush1.bf16.msra.mxu0 %v4125_v23  ;;  %1520 = vmatpush1.bf16.msra.mxu1 %v4128_v10 }
 0x4e4   :  { %1480 = vmatprep.subr.bf16.mxu0 %v4131_v48  ;;  %1521 = vmatprep.subr.bf16.mxu1 %v4134_v2 }
 0x4e7   :  { %1481 = vmatpush1.bf16.msra.mxu0 %v4137_v34  ;;  %1522 = vmatpush1.bf16.msra.mxu1 %v4140_v41 }
 0x4e8   :  { %1482 = vmatprep.subr.bf16.mxu0 %v4143_v21  ;;  %1523 = vmatprep.subr.bf16.mxu1 %v4146_v15 }
 0x4eb   :  { %1483 = vmatpush1.bf16.msra.mxu0 %v4149_v20  ;;  %1524 = vmatpush1.bf16.msra.mxu1 %v4152_v52 }
 0x4ec   :  { %1484 = vmatprep.subr.bf16.mxu0 %v4155_v62  ;;  %1525 = vmatprep.subr.bf16.mxu1 %v4158_v49  ;;  %v4173_v62 = vld [vmem:[#allocation6 + $0xe0] ss:$16 sps:$4 sm:$0xff]   ;;  %v4176_v49 = vld [vmem:[#allocation6 + $0xe8] ss:$16 sps:$4 sm:$0xff]  }
 0x4ed   :  { %5173 = vst [vmem:[#allocation71_spill] sm:$0xff] %v4173_v62  ;;  %5174 = vst [vmem:[#allocation73_spill] sm:$0xff] %v4176_v49 }
 0x4ef   :  { %1485 = vmatpush1.bf16.msra.mxu0 %v4161_v1  ;;  %1526 = vmatpush1.bf16.msra.mxu1 %v4164_v58  ;;  %v4179_v1 = vld [vmem:[#allocation6 + $0x104] ss:$16 sps:$4 sm:$0xff]   ;;  %v4182_v58 = vld [vmem:[#allocation6 + $0x10c] ss:$16 sps:$4 sm:$0xff]  }
 0x4f0   :  { %1486 = vmatprep.subr.bf16.mxu0 %v4167_v4  ;;  %1527 = vmatprep.subr.bf16.mxu1 %v4170_v16  ;;  %5175 = vst [vmem:[#allocation72_spill] sm:$0xff] %v4179_v1  ;;  %5176 = vst [vmem:[#allocation74_spill] sm:$0xff] %v4182_v58  ;;  %v4185_v4 = vld [vmem:[#allocation6 + $0x100] ss:$16 sps:$4 sm:$0xff]   ;;  %v4188_v16 = vld [vmem:[#allocation6 + $0x108] ss:$16 sps:$4 sm:$0xff]  }
 0x4f3   :  { %1487 = vmatpush1.bf16.msra.mxu0 %v4173_v62  ;;  %1528 = vmatpush1.bf16.msra.mxu1 %v4176_v49  ;;  %v4191_v62 = vld [vmem:[#allocation6 + $0x124] ss:$16 sps:$4 sm:$0xff]   ;;  %v4194_v49 = vld [vmem:[#allocation6 + $0x12c] ss:$16 sps:$4 sm:$0xff]  }
 0x4f4   :  { %1488 = vmatprep.subr.bf16.mxu0 %v4179_v1  ;;  %1529 = vmatprep.subr.bf16.mxu1 %v4182_v58  ;;  %v4197_v1 = vld [vmem:[#allocation6 + $0x120] ss:$16 sps:$4 sm:$0xff]   ;;  %v4200_v58 = vld [vmem:[#allocation6 + $0x128] ss:$16 sps:$4 sm:$0xff]  }
 0x4f7   :  { %1489 = vmatpush1.bf16.msra.mxu0 %v4185_v4  ;;  %1530 = vmatpush1.bf16.msra.mxu1 %v4188_v16 }
 0x4f8   :  { %1490 = vmatprep.subr.bf16.mxu0 %v4191_v62  ;;  %1531 = vmatprep.subr.bf16.mxu1 %v4194_v49 }
 0x4fb   :  { %1491 = vmatpush1.bf16.msra.mxu0 %v4197_v1  ;;  %1532 = vmatpush1.bf16.msra.mxu1 %v4200_v58 }
 0x4fc   :  { %1612 = vmatprep.subr.bf16.mxu0 %v3921_v27  ;;  %1653 = vmatprep.subr.bf16.mxu1 %v3924_v30 }
 0x4fe   :  { %1509 = vmatmul.mubr.bf16.vlgmr.msra.gmra.mrb[44].mxu0 %v4107_v0  ;;  %1550 = vmatmul.mubr.bf16.vlgmr.msra.gmra.mrb[44].mxu1 %v4107_v0  ;;  %v5177_v0 = vld [vmem:[#allocation105_spill] sm:$0xff] }
 0x4ff   :  { %1613 = vmatpush1.bf16.msra.mxu0 %v3927_v25  ;;  %1654 = vmatpush1.bf16.msra.mxu1 %v3930_v47 }
 0x500   :  { %1614 = vmatprep.subr.bf16.mxu0 %v3933_v42  ;;  %1655 = vmatprep.subr.bf16.mxu1 %v3936_v31 }
 0x503   :  { %1615 = vmatpush1.bf16.msra.mxu0 %v3939_v50  ;;  %1656 = vmatpush1.bf16.msra.mxu1 %v3942_v53 }
 0x504   :  { %1616 = vmatprep.subr.bf16.mxu0 %v3945_v55  ;;  %1657 = vmatprep.subr.bf16.mxu1 %v3948_v28 }
 0x507   :  { %1617 = vmatpush1.bf16.msra.mxu0 %v3951_v44  ;;  %1658 = vmatpush1.bf16.msra.mxu1 %v3954_v35 }
 0x508   :  { %1618 = vmatprep.subr.bf16.mxu0 %v3957_v54  ;;  %1659 = vmatprep.subr.bf16.mxu1 %v3960_v39 }
 0x50b   :  { %1619 = vmatpush1.bf16.msra.mxu0 %v3963_v17  ;;  %1660 = vmatpush1.bf16.msra.mxu1 %v3966_v29 }
 0x50c   :  { %1620 = vmatprep.subr.bf16.mxu0 %v3969_v19  ;;  %1661 = vmatprep.subr.bf16.mxu1 %v3972_v24 }
 0x50f   :  { %1621 = vmatpush1.bf16.msra.mxu0 %v3975_v22  ;;  %1662 = vmatpush1.bf16.msra.mxu1 %v3978_v61 }
 0x510   :  { %1622 = vmatprep.subr.bf16.mxu0 %v3981_v38  ;;  %1663 = vmatprep.subr.bf16.mxu1 %v3984_v14 }
 0x513   :  { %1623 = vmatpush1.bf16.msra.mxu0 %v3987_v57  ;;  %1664 = vmatpush1.bf16.msra.mxu1 %v3990_v37  ;;  %v5206_v37 = vld [vmem:[#allocation25_spill] sm:$0xff] }
 0x514   :  { %1624 = vmatprep.subr.bf16.mxu0 %v3993_v8  ;;  %1665 = vmatprep.subr.bf16.mxu1 %v3996_v11 }
 0x517   :  { %1625 = vmatpush1.bf16.msra.mxu0 %v3999_v59  ;;  %1666 = vmatpush1.bf16.msra.mxu1 %v4002_v36 }
 0x518   :  { %1626 = vmatprep.subr.bf16.mxu0 %v4005_v26  ;;  %1667 = vmatprep.subr.bf16.mxu1 %v4008_v7 }
 0x51b   :  { %1627 = vmatpush1.bf16.msra.mxu0 %v4011_v45  ;;  %1668 = vmatpush1.bf16.msra.mxu1 %v4014_v43  ;;  %v5178_v45 = vld [vmem:[#allocation106_spill] sm:$0xff]  ;;  %v5179_v43 = vld [vmem:[#allocation55_spill] sm:$0xff] }
 0x51c   :  { %1628 = vmatprep.subr.bf16.mxu0 %v4017_v46  ;;  %1669 = vmatprep.subr.bf16.mxu1 %v4020_v12  ;;  %v5180_v46 = vld [vmem:[#allocation57_spill] sm:$0xff]  ;;  %v5181_v12 = vld [vmem:[#allocation56_spill] sm:$0xff] }
 0x51f   :  { %1629 = vmatpush1.bf16.msra.mxu0 %v4023_v3  ;;  %1670 = vmatpush1.bf16.msra.mxu1 %v4026_v51  ;;  %v5182_v3 = vld [vmem:[#allocation58_spill] sm:$0xff]  ;;  %v5183_v51 = vld [vmem:[#allocation59_spill] sm:$0xff] }
 0x520   :  { %1630 = vmatprep.subr.bf16.mxu0 %v4029_v33  ;;  %1671 = vmatprep.subr.bf16.mxu1 %v4032_v32  ;;  %v5184_v33 = vld [vmem:[#allocation61_spill] sm:$0xff]  ;;  %v5185_v32 = vld [vmem:[#allocation60_spill] sm:$0xff] }
 0x523   :  { %1631 = vmatpush1.bf16.msra.mxu0 %v4035_v6  ;;  %1672 = vmatpush1.bf16.msra.mxu1 %v4038_v40  ;;  %v5186_v6 = vld [vmem:[#allocation62_spill] sm:$0xff]  ;;  %v5187_v40 = vld [vmem:[#allocation63_spill] sm:$0xff] }
 0x524   :  { %1632 = vmatprep.subr.bf16.mxu0 %v5177_v0  ;;  %1673 = vmatprep.subr.bf16.mxu1 %v5178_v45  ;;  %v4256_v0 = vld [vmem:[#allocation3 + $0x190] sm:$0xff]  ;;  %v5204_v45 = vld [vmem:[#allocation23_spill] sm:$0xff] }
 0x525   :  { %5188 = vst [vmem:[#allocation75_spill] sm:$0xff] %v4256_v0 }
 0x527   :  { %1633 = vmatpush1.bf16.msra.mxu0 %v5179_v43  ;;  %1674 = vmatpush1.bf16.msra.mxu1 %v5180_v46  ;;  %v5189_v43 = vld [vmem:[#allocation65_spill] sm:$0xff] }
 0x528   :  { %1634 = vmatprep.subr.bf16.mxu0 %v5181_v12  ;;  %1675 = vmatprep.subr.bf16.mxu1 %v5182_v3  ;;  %v4260_v46 = vld [vmem:[#allocation3 + $0x1b8] sm:$0xff]  ;;  %v4263_v3 = vld [vmem:[#allocation3 + $0x1a0] sm:$0xff] }
 0x529   :  { %5190 = vst [vmem:[#allocation77_spill] sm:$0xff] %v4260_v46  ;;  %5191 = vst [vmem:[#allocation76_spill] sm:$0xff] %v4263_v3 }
 0x52b   :  { %1635 = vmatpush1.bf16.msra.mxu0 %v5183_v51  ;;  %1676 = vmatpush1.bf16.msra.mxu1 %v5184_v33  ;;  %v4266_v33 = vld [vmem:[#allocation3 + $0x1b0] sm:$0xff] }
 0x52c   :  { %1636 = vmatprep.subr.bf16.mxu0 %v5185_v32  ;;  %1677 = vmatprep.subr.bf16.mxu1 %v5186_v6  ;;  %5192 = vst [vmem:[#allocation78_spill] sm:$0xff] %v4266_v33  ;;  %v4269_v6 = vld [vmem:[#allocation3 + $0x1c8] sm:$0xff]  ;;  %v5203_v32 = vld [vmem:[#allocation22_spill] sm:$0xff] }
 0x52d   :  { %5193 = vst [vmem:[#allocation79_spill] sm:$0xff] %v4269_v6 }
 0x52f   :  { %1637 = vmatpush1.bf16.msra.mxu0 %v5187_v40  ;;  %1678 = vmatpush1.bf16.msra.mxu1 %v4256_v0  ;;  %v4272_v40 = vld [vmem:[#allocation3 + $0x1d8] sm:$0xff] }
 0x530   :  { %1638 = vmatprep.subr.bf16.mxu0 %v5189_v43  ;;  %1679 = vmatprep.subr.bf16.mxu1 %v4260_v46  ;;  %5194 = vst [vmem:[#allocation81_spill] sm:$0xff] %v4272_v40  ;;  %v4275_v43 = vld [vmem:[#allocation3 + $0x1c0] sm:$0xff]  ;;  %v4278_v46 = vld [vmem:[#allocation3 + $0x1d0] sm:$0xff] }
 0x531   :  { %5195 = vst [vmem:[#allocation80_spill] sm:$0xff] %v4275_v43  ;;  %5196 = vst [vmem:[#allocation82_spill] sm:$0xff] %v4278_v46 }
 0x533   :  { %1639 = vmatpush1.bf16.msra.mxu0 %v4263_v3  ;;  %1680 = vmatpush1.bf16.msra.mxu1 %v4266_v33  ;;  %v4281_v3 = vld [vmem:[#allocation3 + $0x1e8] sm:$0xff]  ;;  %v4284_v33 = vld [vmem:[#allocation3 + $0x1f8] sm:$0xff] }
 0x534   :  { %1640 = vmatprep.subr.bf16.mxu0 %v4269_v6  ;;  %1681 = vmatprep.subr.bf16.mxu1 %v4272_v40  ;;  %5197 = vst [vmem:[#allocation83_spill] sm:$0xff] %v4281_v3  ;;  %5198 = vst [vmem:[#allocation85_spill] sm:$0xff] %v4284_v33  ;;  %v4287_v6 = vld [vmem:[#allocation3 + $0x1e0] sm:$0xff]  ;;  %v4290_v40 = vld [vmem:[#allocation3 + $0x1f0] sm:$0xff] }
 0x535   :  { %5199 = vst [vmem:[#allocation84_spill] sm:$0xff] %v4287_v6  ;;  %5200 = vst [vmem:[#allocation107_spill] sm:$0xff] %v4290_v40 }
 0x537   :  { %1641 = vmatpush1.bf16.msra.mxu0 %v4275_v43  ;;  %1682 = vmatpush1.bf16.msra.mxu1 %v4278_v46  ;;  %v4293_v43 = vld [vmem:[#allocation6 + $0x44] ss:$16 sps:$4 sm:$0xff]   ;;  %v4296_v46 = vld [vmem:[#allocation6 + $0x4c] ss:$16 sps:$4 sm:$0xff]  }
 0x538   :  { %1642 = vmatprep.subr.bf16.mxu0 %v4281_v3  ;;  %1683 = vmatprep.subr.bf16.mxu1 %v4284_v33  ;;  %5201 = vst [vmem:[#allocation30_spill] sm:$0xff] %v4293_v43  ;;  %5202 = vst [vmem:[#allocation31_spill] sm:$0xff] %v4296_v46 }
 0x53b   :  { %1643 = vmatpush1.bf16.msra.mxu0 %v4287_v6  ;;  %1684 = vmatpush1.bf16.msra.mxu1 %v4290_v40 }
 0x53c   :  { %1698 = vmatprep.subr.bf16.mxu0 %v4293_v43  ;;  %1739 = vmatprep.subr.bf16.mxu1 %v4296_v46  ;;  %v5205_v43 = vld [vmem:[#allocation24_spill] sm:$0xff] }
 0x5b1   :  { %v1424_v3 = vpop.f32.mrb[40].mxu0  ;;  %v1465_v0 = vpop.f32.mrb[40].mxu1 }
 0x5b2   :  { %v1425_v33 = vadd.f32 %v1424_v3, %v5203_v32  ;;  %v1426_v51 = vpop.f32.mrb[41].mxu0  ;;  %v1467_v12 = vpop.f32.mrb[41].mxu1  ;;  %v1466_v8 = vadd.f32 %v1465_v0, %v5205_v43 }
 0x5b3   :  { %v1427_v6 = vadd.f32 %v1426_v51, %v5204_v45  ;;  %v1428_v7 = vpop.f32.mrb[42].mxu0  ;;  %v1469_v26 = vpop.f32.mrb[42].mxu1  ;;  %v1468_v46 = vadd.f32 %v1467_v12, %v5206_v37 }
 0x5b4   :  { %v2548_v36 = vmul.f32 -1.442695, %v1425_v33  ;;  %v1429_v40 = vpop.f32.mrb[43].mxu0  ;;  %v1470_v59 = vpop.f32.mrb[43].mxu1  ;;  %v2550_v57 = vmul.f32 -1.442695, %v1466_v8 }
 0x5b5   :  { %v2549_v11 = vmul.f32 -1.442695, %v1427_v6  ;;  %v5207_v8 = vld [vmem:[#allocation38_spill] sm:$0xff] }
 0x5b6   :  { %2794 = vpow2.f32 %v2548_v36 }
 0x5b7   :  { %2796 = vpow2.f32 %v2549_v11 }
 0x5b8   :  { %2798 = vtanh.f32 %v1468_v46 }
 0x5b9   :  { %2800 = vpow2.f32 %v2550_v57 }
 0x5c0   :  { %v2795_v14 = vpop.eup %2794 }
 0x5c1   :  { %v1596_v38 = vadd.f32 1.0, %v2795_v14  ;;  %v2797_v3 = vpop.eup %2796 }
 0x5c2   :  { %v1597_v51 = vadd.f32 1.0, %v2797_v3  ;;  %v2799_v26 = vpop.eup %2798 }
 0x5c3   :  { %2802 = vrcp.f32 %v1596_v38  ;;  %v2801_v7 = vpop.eup %2800  ;;  %v5208_v38 = vld [vmem:[#allocation39_spill] sm:$0xff] }
 0x5c4   :  { %2804 = vrcp.f32 %v1597_v51  ;;  %v1598_v36 = vadd.f32 1.0, %v2801_v7 }
 0x5c6   :  { %2806 = vrcp.f32 %v1598_v36 }
 0x5cd   :  { %v2803_v33 = vpop.eup %2802 }
 0x5ce   :  { %v1607_v59 = vmul.f32 %v2803_v33, %v2799_v26  ;;  %v2805_v6 = vpop.eup %2804 }
 0x5cf   :  { %v1606_v11 = vmul.f32 %v2805_v6, %v4096_v63  ;;  %v5209_v63 = vld [vmem:[#allocation41_spill] sm:$0xff]  ;;  %v5210_v6 = vld [vmem:[#allocation43_spill] sm:$0xff] }
 0x5d1   :  { %v1510_v40 = vpop.f32.mrb[44].mxu0  ;;  %v1551_v0 = vpop.f32.mrb[44].mxu1  ;;  %v4304_v12 = vadd.f32 %v1607_v59, %v1606_v11 }
 0x5d2   :  { %v1558_v14 = vadd.f32 %v1510_v40, %v5207_v8  ;;  %v1512_v46 = vpop.f32.mrb[45].mxu0  ;;  %v1553_v37 = vpop.f32.mrb[45].mxu1  ;;  %v1560_v33 = vadd.f32 %v1551_v0, %v5209_v63 }
 0x5d3   :  { %v1559_v57 = vadd.f32 %v1512_v46, %v5208_v38  ;;  %v1514_v3 = vpop.f32.mrb[46].mxu0  ;;  %v1555_v51 = vpop.f32.mrb[46].mxu1  ;;  %2808 = vtanh.f32 %v4304_v12  ;;  %v1561_v11 = vadd.f32 %v1553_v37, %v5210_v6  ;;  %v5212_v6 = vld [vmem:[#allocation66_spill] sm:$0xff] }
 0x5d4   :  { %v2545_v43 = vmul.f32 -1.442695, %v1558_v14  ;;  %v1515_v45 = vpop.f32.mrb[47].mxu0  ;;  %v1556_v26 = vpop.f32.mrb[47].mxu1  ;;  %v2547_v8 = vmul.f32 -1.442695, %v1560_v33 }
 0x5d5   :  { %v2546_v7 = vmul.f32 -1.442695, %v1559_v57  ;;  %v2807_v59 = vpop.eup %2806 }
 0x5d6   :  { %2810 = vpow2.f32 %v2545_v43 }
 0x5d7   :  { %2812 = vpow2.f32 %v2546_v7 }
 0x5d8   :  { %2814 = vtanh.f32 %v1561_v11  ;;  %v5213_v11 = vld [vmem:[#allocation67_spill] sm:$0xff] }
 0x5d9   :  { %2816 = vpow2.f32 %v2547_v8  ;;  %v5215_v8 = vld [vmem:[#allocation68_spill] sm:$0xff] }
 0x5dd   :  { %v2809_v40 = vpop.eup %2808 }
 0x5de   :  { %v1610_v36 = vmul.f32 %v2809_v40, %v2807_v59  ;;  %v5214_v40 = vld [vmem:[#allocation69_spill] sm:$0xff] }
 0x5e0   :  { %v2811_v32 = vpop.eup %2810  ;;  %v1611_v38 = vpack.c.bf16 %v1610_v36, %v1610_v36  ;;  %v5216_v36 = vld [vmem:[#allocation70_spill] sm:$0xff] }
 0x5e1   :  { %v1571_v46 = vadd.f32 1.0, %v2811_v32  ;;  %v2813_v14 = vpop.eup %2812 }
 0x5e2   :  { %v1572_v45 = vadd.f32 1.0, %v2813_v14  ;;  %1644 = vmatprep.mubr.bf16.mxu0 %v1611_v38  ;;  %1685 = vmatprep.mubr.bf16.mxu1 %v1611_v38  ;;  %v2815_v43 = vpop.eup %2814  ;;  %v5218_v38 = vld [vmem:[#allocation73_spill] sm:$0xff]  ;;  %v5219_v14 = vld [vmem:[#allocation72_spill] sm:$0xff] }
 0x5e3   :  { %2818 = vrcp.f32 %v1571_v46  ;;  %v2817_v57 = vpop.eup %2816  ;;  %v5217_v46 = vld [vmem:[#allocation71_spill] sm:$0xff] }
 0x5e4   :  { %2820 = vrcp.f32 %v1572_v45  ;;  %v1573_v37 = vadd.f32 1.0, %v2817_v57  ;;  %v5220_v45 = vld [vmem:[#allocation74_spill] sm:$0xff] }
 0x5e5   :  { %v5242_v57 = vld [vmem:[#allocation106_spill] sm:$0xff] }
 0x5e6   :  { %2822 = vrcp.f32 %v1573_v37  ;;  %v5246_v37 = vld [vmem:[#allocation58_spill] sm:$0xff] }
 0x5ed   :  { %v2819_v0 = vpop.eup %2818 }
 0x5ee   :  { %v1582_v3 = vmul.f32 %v2819_v0, %v2815_v43  ;;  %v2821_v51 = vpop.eup %2820  ;;  %v5241_v43 = vld [vmem:[#allocation105_spill] sm:$0xff]  ;;  %v5243_v0 = vld [vmem:[#allocation55_spill] sm:$0xff] }
 0x5ef   :  { %v1581_v26 = vmul.f32 %v2821_v51, %v4104_v60  ;;  %v5211_v60 = vld [vmem:[#allocation64_spill] sm:$0xff] }
 0x5f0   :  { %v2823_v32 = vpop.eup %2822  ;;  %v5245_v51 = vld [vmem:[#allocation56_spill] sm:$0xff] }
 0x5f1   :  { %v4312_v7 = vadd.f32 %v1582_v3, %v1581_v26  ;;  %v5244_v3 = vld [vmem:[#allocation57_spill] sm:$0xff]  ;;  %v5247_v26 = vld [vmem:[#allocation59_spill] sm:$0xff] }
 0x5f3   :  { %2824 = vtanh.f32 %v4312_v7 }
 0x5fd   :  { %v2825_v63 = vpop.eup %2824 }
 0x5fe   :  { %v1585_v33 = vmul.f32 %v2825_v63, %v2823_v32  ;;  %v5248_v32 = vld [vmem:[#allocation61_spill] sm:$0xff]  ;;  %v5249_v63 = vld [vmem:[#allocation60_spill] sm:$0xff] }
 0x600   :  { %v1586_v59 = vpack.c.bf16 %v1585_v33, %v1585_v33  ;;  %v5250_v33 = vld [vmem:[#allocation62_spill] sm:$0xff] }
 0x602   :  { %1645 = vmatmul.mubr.bf16.vlgmr.msra.gmra.mrb[48].mxu0 %v1586_v59  ;;  %1686 = vmatmul.mubr.bf16.vlgmr.msra.gmra.mrb[48].mxu1 %v1586_v59 }
 0x603   :  { %1699 = vmatpush1.bf16.msra.mxu0 %v4111_v13  ;;  %1740 = vmatpush1.bf16.msra.mxu1 %v4114_v18 }
 0x604   :  { %1700 = vmatprep.subr.bf16.mxu0 %v4117_v5  ;;  %1741 = vmatprep.subr.bf16.mxu1 %v4120_v56 }
 0x605   :  { %1730 = vmatprep.mubr.bf16.mxu0 %v5064_v9  ;;  %1771 = vmatprep.mubr.bf16.mxu1 %v5064_v9 }
 0x607   :  { %1701 = vmatpush1.bf16.msra.mxu0 %v4125_v23  ;;  %1742 = vmatpush1.bf16.msra.mxu1 %v4128_v10 }
 0x608   :  { %1702 = vmatprep.subr.bf16.mxu0 %v4131_v48  ;;  %1743 = vmatprep.subr.bf16.mxu1 %v4134_v2 }
 0x60b   :  { %1703 = vmatpush1.bf16.msra.mxu0 %v4137_v34  ;;  %1744 = vmatpush1.bf16.msra.mxu1 %v4140_v41 }
 0x60c   :  { %1704 = vmatprep.subr.bf16.mxu0 %v4143_v21  ;;  %1745 = vmatprep.subr.bf16.mxu1 %v4146_v15 }
 0x60f   :  { %1705 = vmatpush1.bf16.msra.mxu0 %v4149_v20  ;;  %1746 = vmatpush1.bf16.msra.mxu1 %v4152_v52 }
 0x610   :  { %1706 = vmatprep.subr.bf16.mxu0 %v5211_v60  ;;  %1747 = vmatprep.subr.bf16.mxu1 %v5212_v6 }
 0x613   :  { %1707 = vmatpush1.bf16.msra.mxu0 %v5213_v11  ;;  %1748 = vmatpush1.bf16.msra.mxu1 %v5214_v40 }
 0x614   :  { %1708 = vmatprep.subr.bf16.mxu0 %v5215_v8  ;;  %1749 = vmatprep.subr.bf16.mxu1 %v5216_v36 }
 0x617   :  { %1709 = vmatpush1.bf16.msra.mxu0 %v5217_v46  ;;  %1750 = vmatpush1.bf16.msra.mxu1 %v5218_v38 }
 0x618   :  { %1710 = vmatprep.subr.bf16.mxu0 %v5219_v14  ;;  %1751 = vmatprep.subr.bf16.mxu1 %v5220_v45 }
 0x61b   :  { %1711 = vmatpush1.bf16.msra.mxu0 %v4185_v4  ;;  %1752 = vmatpush1.bf16.msra.mxu1 %v4188_v16 }
 0x61c   :  { %1712 = vmatprep.subr.bf16.mxu0 %v4191_v62  ;;  %1753 = vmatprep.subr.bf16.mxu1 %v4194_v49 }
 0x61f   :  { %1713 = vmatpush1.bf16.msra.mxu0 %v4197_v1  ;;  %1754 = vmatpush1.bf16.msra.mxu1 %v4200_v58 }
 0x620   :  { %1834 = vmatprep.subr.bf16.mxu0 %v3921_v27  ;;  %1875 = vmatprep.subr.bf16.mxu1 %v3924_v30  ;;  %v5221_v27 = vld [vmem:[#allocation26_spill] sm:$0xff]  ;;  %v5222_v30 = vld [vmem:[#allocation27_spill] sm:$0xff] }
 0x622   :  { %1731 = vmatmul.mubr.bf16.vlgmr.msra.gmra.mrb[52].mxu0 %v1586_v59  ;;  %1772 = vmatmul.mubr.bf16.vlgmr.msra.gmra.mrb[52].mxu1 %v1586_v59  ;;  %v5251_v59 = vld [vmem:[#allocation63_spill] sm:$0xff] }
 0x623   :  { %1835 = vmatpush1.bf16.msra.mxu0 %v3927_v25  ;;  %1876 = vmatpush1.bf16.msra.mxu1 %v3930_v47  ;;  %v5223_v25 = vld [vmem:[#allocation28_spill] sm:$0xff]  ;;  %v5224_v47 = vld [vmem:[#allocation29_spill] sm:$0xff] }
 0x624   :  { %1836 = vmatprep.subr.bf16.mxu0 %v3933_v42  ;;  %1877 = vmatprep.subr.bf16.mxu1 %v3936_v31  ;;  %v5225_v42 = vld [vmem:[#allocation54_spill] sm:$0xff]  ;;  %v5226_v31 = vld [vmem:[#allocation87_spill] sm:$0xff] }
 0x627   :  { %1837 = vmatpush1.bf16.msra.mxu0 %v3939_v50  ;;  %1878 = vmatpush1.bf16.msra.mxu1 %v3942_v53  ;;  %v5227_v50 = vld [vmem:[#allocation89_spill] sm:$0xff]  ;;  %v5228_v53 = vld [vmem:[#allocation88_spill] sm:$0xff] }
 0x628   :  { %1838 = vmatprep.subr.bf16.mxu0 %v3945_v55  ;;  %1879 = vmatprep.subr.bf16.mxu1 %v3948_v28  ;;  %v5229_v55 = vld [vmem:[#allocation90_spill] sm:$0xff]  ;;  %v5230_v28 = vld [vmem:[#allocation92_spill] sm:$0xff] }
 0x62b   :  { %1839 = vmatpush1.bf16.msra.mxu0 %v3951_v44  ;;  %1880 = vmatpush1.bf16.msra.mxu1 %v3954_v35  ;;  %v5231_v44 = vld [vmem:[#allocation91_spill] sm:$0xff] }
 0x62c   :  { %1840 = vmatprep.subr.bf16.mxu0 %v3957_v54  ;;  %1881 = vmatprep.subr.bf16.mxu1 %v3960_v39  ;;  %v5232_v35 = vld [vmem:[#allocation95_spill] sm:$0xff]  ;;  %v5233_v54 = vld [vmem:[#allocation97_spill] sm:$0xff]  ;;  %v5234_v39 = vld [vmem:[#allocation98_spill] sm:$0xff] }
 0x62f   :  { %1841 = vmatpush1.bf16.msra.mxu0 %v3963_v17  ;;  %1882 = vmatpush1.bf16.msra.mxu1 %v3966_v29  ;;  %v5235_v17 = vld [vmem:[#allocation100_spill] sm:$0xff]  ;;  %v5236_v29 = vld [vmem:[#allocation99_spill] sm:$0xff] }
 0x630   :  { %1842 = vmatprep.subr.bf16.mxu0 %v3969_v19  ;;  %1883 = vmatprep.subr.bf16.mxu1 %v3972_v24  ;;  %v5237_v19 = vld [vmem:[#allocation101_spill] sm:$0xff]  ;;  %v5238_v24 = vld [vmem:[#allocation102_spill] sm:$0xff] }
 0x633   :  { %1843 = vmatpush1.bf16.msra.mxu0 %v3975_v22  ;;  %1884 = vmatpush1.bf16.msra.mxu1 %v3978_v61  ;;  %v5239_v22 = vld [vmem:[#allocation104_spill] sm:$0xff]  ;;  %v5240_v61 = vld [vmem:[#allocation103_spill] sm:$0xff] }
 0x634   :  { %1844 = vmatprep.subr.bf16.mxu0 %v5221_v27  ;;  %1885 = vmatprep.subr.bf16.mxu1 %v5222_v30  ;;  %v5252_v27 = vld [vmem:[#allocation75_spill] sm:$0xff]  ;;  %v5253_v30 = vld [vmem:[#allocation65_spill] sm:$0xff] }
 0x637   :  { %1845 = vmatpush1.bf16.msra.mxu0 %v5223_v25  ;;  %1886 = vmatpush1.bf16.msra.mxu1 %v5224_v47  ;;  %v5254_v25 = vld [vmem:[#allocation77_spill] sm:$0xff]  ;;  %v5255_v47 = vld [vmem:[#allocation76_spill] sm:$0xff] }
 0x638   :  { %1846 = vmatprep.subr.bf16.mxu0 %v5225_v42  ;;  %1887 = vmatprep.subr.bf16.mxu1 %v5226_v31  ;;  %v5256_v42 = vld [vmem:[#allocation78_spill] sm:$0xff]  ;;  %v5257_v31 = vld [vmem:[#allocation79_spill] sm:$0xff] }
 0x63b   :  { %1847 = vmatpush1.bf16.msra.mxu0 %v5227_v50  ;;  %1888 = vmatpush1.bf16.msra.mxu1 %v5228_v53  ;;  %v5258_v50 = vld [vmem:[#allocation81_spill] sm:$0xff]  ;;  %v5259_v53 = vld [vmem:[#allocation80_spill] sm:$0xff] }
 0x63c   :  { %1848 = vmatprep.subr.bf16.mxu0 %v5229_v55  ;;  %1889 = vmatprep.subr.bf16.mxu1 %v5230_v28  ;;  %v5260_v55 = vld [vmem:[#allocation82_spill] sm:$0xff]  ;;  %v5261_v28 = vld [vmem:[#allocation83_spill] sm:$0xff] }
 0x63f   :  { %1849 = vmatpush1.bf16.msra.mxu0 %v5231_v44  ;;  %1890 = vmatpush1.bf16.msra.mxu1 %v5232_v35  ;;  %v5262_v44 = vld [vmem:[#allocation85_spill] sm:$0xff]  ;;  %v5263_v35 = vld [vmem:[#allocation84_spill] sm:$0xff] }
 0x640   :  { %1850 = vmatprep.subr.bf16.mxu0 %v5233_v54  ;;  %1891 = vmatprep.subr.bf16.mxu1 %v5234_v39  ;;  %v5264_v54 = vld [vmem:[#allocation107_spill] sm:$0xff]  ;;  %v5265_v39 = vld [vmem:[#allocation30_spill] sm:$0xff] }
 0x643   :  { %1851 = vmatpush1.bf16.msra.mxu0 %v5235_v17  ;;  %1892 = vmatpush1.bf16.msra.mxu1 %v5236_v29  ;;  %v5266_v17 = vld [vmem:[#allocation31_spill] sm:$0xff] }
 0x644   :  { %1852 = vmatprep.subr.bf16.mxu0 %v5237_v19  ;;  %1893 = vmatprep.subr.bf16.mxu1 %v5238_v24  ;;  %v5267_v24 = vld [vmem:[#allocation22_spill] sm:$0xff] }
 0x647   :  { %1853 = vmatpush1.bf16.msra.mxu0 %v5239_v22  ;;  %1894 = vmatpush1.bf16.msra.mxu1 %v5240_v61 }
 0x648   :  { %1854 = vmatprep.subr.bf16.mxu0 %v5241_v43  ;;  %1895 = vmatprep.subr.bf16.mxu1 %v5242_v57  ;;  %v5268_v57 = vld [vmem:[#allocation23_spill] sm:$0xff] }
 0x64b   :  { %1855 = vmatpush1.bf16.msra.mxu0 %v5243_v0  ;;  %1896 = vmatpush1.bf16.msra.mxu1 %v5244_v3 }
 0x64c   :  { %1856 = vmatprep.subr.bf16.mxu0 %v5245_v51  ;;  %1897 = vmatprep.subr.bf16.mxu1 %v5246_v37 }
 0x64f   :  { %1857 = vmatpush1.bf16.msra.mxu0 %v5247_v26  ;;  %1898 = vmatpush1.bf16.msra.mxu1 %v5248_v32 }
 0x650   :  { %1858 = vmatprep.subr.bf16.mxu0 %v5249_v63  ;;  %1899 = vmatprep.subr.bf16.mxu1 %v5250_v33  ;;  %v5269_v33 = vld [vmem:[#allocation24_spill] sm:$0xff] }
 0x653   :  { %1859 = vmatpush1.bf16.msra.mxu0 %v5251_v59  ;;  %1900 = vmatpush1.bf16.msra.mxu1 %v5252_v27 }
 0x654   :  { %1860 = vmatprep.subr.bf16.mxu0 %v5253_v30  ;;  %1901 = vmatprep.subr.bf16.mxu1 %v5254_v25  ;;  %v5270_v30 = vld [vmem:[#allocation25_spill] sm:$0xff] }
 0x657   :  { %1861 = vmatpush1.bf16.msra.mxu0 %v5255_v47  ;;  %1902 = vmatpush1.bf16.msra.mxu1 %v5256_v42 }
 0x658   :  { %1862 = vmatprep.subr.bf16.mxu0 %v5257_v31  ;;  %1903 = vmatprep.subr.bf16.mxu1 %v5258_v50 }
 0x65b   :  { %1863 = vmatpush1.bf16.msra.mxu0 %v5259_v53  ;;  %1904 = vmatpush1.bf16.msra.mxu1 %v5260_v55 }
 0x65c   :  { %1864 = vmatprep.subr.bf16.mxu0 %v5261_v28  ;;  %1905 = vmatprep.subr.bf16.mxu1 %v5262_v44 }
 0x65f   :  { %1865 = vmatpush1.bf16.msra.mxu0 %v5263_v35  ;;  %1906 = vmatpush1.bf16.msra.mxu1 %v5264_v54 }
 0x660   :  { %1920 = vmatprep.subr.bf16.mxu0 %v5265_v39  ;;  %1961 = vmatprep.subr.bf16.mxu1 %v5266_v17 }
 0x6d5   :  { %v1646_v29 = vpop.f32.mrb[48].mxu0  ;;  %v1687_v19 = vpop.f32.mrb[48].mxu1 }
 0x6d6   :  { %v1647_v22 = vadd.f32 %v1646_v29, %v5267_v24  ;;  %v1648_v61 = vpop.f32.mrb[49].mxu0  ;;  %v1689_v43 = vpop.f32.mrb[49].mxu1  ;;  %v1688_v59 = vadd.f32 %v1687_v19, %v5269_v33 }
 0x6d7   :  { %v1649_v0 = vadd.f32 %v1648_v61, %v5268_v57  ;;  %v1650_v3 = vpop.f32.mrb[50].mxu0  ;;  %v1691_v51 = vpop.f32.mrb[50].mxu1  ;;  %v1690_v17 = vadd.f32 %v1689_v43, %v5270_v30 }
 0x6d8   :  { %v2554_v37 = vmul.f32 -1.442695, %v1647_v22  ;;  %v1651_v26 = vpop.f32.mrb[51].mxu0  ;;  %v1692_v32 = vpop.f32.mrb[51].mxu1  ;;  %v2556_v39 = vmul.f32 -1.442695, %v1688_v59 }
 0x6d9   :  { %v2555_v63 = vmul.f32 -1.442695, %v1649_v0  ;;  %v5271_v59 = vld [vmem:[#allocation40_spill] sm:$0xff] }
 0x6da   :  { %2826 = vpow2.f32 %v2554_v37 }
 0x6db   :  { %2828 = vpow2.f32 %v2555_v63 }
 0x6dc   :  { %2830 = vtanh.f32 %v1690_v17 }
 0x6dd   :  { %2832 = vpow2.f32 %v2556_v39 }
 0x6e4   :  { %v2827_v54 = vpop.eup %2826 }
 0x6e5   :  { %v1818_v35 = vadd.f32 1.0, %v2827_v54  ;;  %v2829_v29 = vpop.eup %2828 }
 0x6e6   :  { %v1819_v61 = vadd.f32 1.0, %v2829_v29  ;;  %v2831_v3 = vpop.eup %2830 }
 0x6e7   :  { %2834 = vrcp.f32 %v1818_v35  ;;  %v2833_v22 = vpop.eup %2832  ;;  %v5272_v35 = vld [vmem:[#allocation42_spill] sm:$0xff] }
 0x6e8   :  { %2836 = vrcp.f32 %v1819_v61  ;;  %v1820_v37 = vadd.f32 1.0, %v2833_v22 }
 0x6ea   :  { %2838 = vrcp.f32 %v1820_v37 }
 0x6f1   :  { %v2835_v51 = vpop.eup %2834 }
 0x6f2   :  { %v1829_v26 = vmul.f32 %v2835_v51, %v2831_v3  ;;  %v2837_v0 = vpop.eup %2836 }
 0x6f3   :  { %v1828_v32 = vmul.f32 %v2837_v0, %v4304_v12  ;;  %v5273_v12 = vld [vmem:[#allocation44_spill] sm:$0xff]  ;;  %v5274_v0 = vld [vmem:[#allocation45_spill] sm:$0xff] }
 0x6f5   :  { %v1732_v19 = vpop.f32.mrb[52].mxu0  ;;  %v1773_v63 = vpop.f32.mrb[52].mxu1  ;;  %v4418_v43 = vadd.f32 %v1829_v26, %v1828_v32 }
 0x6f6   :  { %v1780_v54 = vadd.f32 %v1732_v19, %v5271_v59  ;;  %v1734_v17 = vpop.f32.mrb[53].mxu0  ;;  %v1775_v30 = vpop.f32.mrb[53].mxu1  ;;  %v1782_v51 = vadd.f32 %v1773_v63, %v5273_v12 }
 0x6f7   :  { %v1781_v39 = vadd.f32 %v1734_v17, %v5272_v35  ;;  %v1736_v29 = vpop.f32.mrb[54].mxu0  ;;  %v1777_v61 = vpop.f32.mrb[54].mxu1  ;;  %2840 = vtanh.f32 %v4418_v43  ;;  %v1783_v32 = vadd.f32 %v1775_v30, %v5274_v0  ;;  %v4554_v0 = vld [vmem:[#allocation3 + $0xf0] sm:$0xff] }
 0x6f8   :  { %v2551_v33 = vmul.f32 -1.442695, %v1780_v54  ;;  %v1737_v57 = vpop.f32.mrb[55].mxu0  ;;  %v1778_v3 = vpop.f32.mrb[55].mxu1  ;;  %v2553_v59 = vmul.f32 -1.442695, %v1782_v51 }
 0x6f9   :  { %v2552_v22 = vmul.f32 -1.442695, %v1781_v39  ;;  %v2839_v26 = vpop.eup %2838 }
 0x6fa   :  { %2842 = vpow2.f32 %v2551_v33 }
 0x6fb   :  { %2844 = vpow2.f32 %v2552_v22 }
 0x6fc   :  { %2846 = vtanh.f32 %v1783_v32  ;;  %v4557_v32 = vld [vmem:[#allocation3 + $0x108] sm:$0xff] }
 0x6fd   :  { %2848 = vpow2.f32 %v2553_v59  ;;  %v4563_v59 = vld [vmem:[#allocation3 + $0x100] sm:$0xff] }
 0x701   :  { %v2841_v19 = vpop.eup %2840 }
 0x702   :  { %v1832_v37 = vmul.f32 %v2841_v19, %v2839_v26  ;;  %v4560_v19 = vld [vmem:[#allocation3 + $0x118] sm:$0xff] }
 0x704   :  { %v2843_v24 = vpop.eup %2842  ;;  %v1833_v35 = vpack.c.bf16 %v1832_v37, %v1832_v37  ;;  %v4566_v37 = vld [vmem:[#allocation3 + $0x110] sm:$0xff] }
 0x705   :  { %v1793_v17 = vadd.f32 1.0, %v2843_v24  ;;  %v2845_v54 = vpop.eup %2844 }
 0x706   :  { %v1794_v57 = vadd.f32 1.0, %v2845_v54  ;;  %1866 = vmatprep.mubr.bf16.mxu0 %v1833_v35  ;;  %1907 = vmatprep.mubr.bf16.mxu1 %v1833_v35  ;;  %v2847_v33 = vpop.eup %2846  ;;  %v4572_v35 = vld [vmem:[#allocation3 + $0x138] sm:$0xff]  ;;  %v4575_v54 = vld [vmem:[#allocation3 + $0x120] sm:$0xff] }
 0x707   :  { %2850 = vrcp.f32 %v1793_v17  ;;  %v2849_v39 = vpop.eup %2848  ;;  %v4569_v17 = vld [vmem:[#allocation3 + $0x128] sm:$0xff] }
 0x708   :  { %2852 = vrcp.f32 %v1794_v57  ;;  %v1795_v30 = vadd.f32 1.0, %v2849_v39  ;;  %v4578_v57 = vld [vmem:[#allocation3 + $0x130] sm:$0xff]  ;;  %v4584_v39 = vld [vmem:[#allocation3 + $0x158] sm:$0xff] }
 0x709   :  { %5276 = vst [vmem:[#allocation35_spill] sm:$0xff] %v4584_v39 }
 0x70a   :  { %2854 = vrcp.f32 %v1795_v30  ;;  %v4596_v30 = vld [vmem:[#allocation3 + $0x178] sm:$0xff] }
 0x70b   :  { %5280 = vst [vmem:[#allocation86_spill] sm:$0xff] %v4596_v30 }
 0x711   :  { %v2851_v63 = vpop.eup %2850 }
 0x712   :  { %v1804_v29 = vmul.f32 %v2851_v63, %v2847_v33  ;;  %v2853_v61 = vpop.eup %2852  ;;  %v4581_v33 = vld [vmem:[#allocation3 + $0x148] sm:$0xff]  ;;  %v4587_v63 = vld [vmem:[#allocation3 + $0x140] sm:$0xff] }
 0x713   :  { %v1803_v3 = vmul.f32 %v2853_v61, %v4312_v7  ;;  %v4521_v7 = vld [vmem:[#allocation3 + $0xa8] sm:$0xff]  ;;  %5275 = vst [vmem:[#allocation33_spill] sm:$0xff] %v4581_v33  ;;  %5277 = vst [vmem:[#allocation93_spill] sm:$0xff] %v4587_v63 }
 0x714   :  { %v2855_v24 = vpop.eup %2854  ;;  %v4593_v61 = vld [vmem:[#allocation3 + $0x168] sm:$0xff] }
 0x715   :  { %v4426_v22 = vadd.f32 %v1804_v29, %v1803_v3  ;;  %v4590_v29 = vld [vmem:[#allocation3 + $0x150] sm:$0xff]  ;;  %5279 = vst [vmem:[#allocation96_spill] sm:$0xff] %v4593_v61  ;;  %v4599_v3 = vld [vmem:[#allocation3 + $0x160] sm:$0xff] }
 0x716   :  { %5278 = vst [vmem:[#allocation94_spill] sm:$0xff] %v4590_v29  ;;  %5281 = vst [vmem:[#allocation32_spill] sm:$0xff] %v4599_v3 }
 0x717   :  { %2856 = vtanh.f32 %v4426_v22 }
 0x721   :  { %v2857_v12 = vpop.eup %2856 }
 0x722   :  { %v1807_v51 = vmul.f32 %v2857_v12, %v2855_v24  ;;  %v4602_v24 = vld [vmem:[#allocation3 + $0x170] sm:$0xff]  ;;  %v4605_v12 = vld [vmem:[#allocation3 + $0x188] sm:$0xff] }
 0x723   :  { %5282 = vst [vmem:[#allocation34_spill] sm:$0xff] %v4602_v24  ;;  %5283 = vst [vmem:[#allocation36_spill] sm:$0xff] %v4605_v12 }
 0x724   :  { %v1808_v26 = vpack.c.bf16 %v1807_v51, %v1807_v51  ;;  %v4608_v51 = vld [vmem:[#allocation3 + $0x198] sm:$0xff] }
 0x725   :  { %5284 = vst [vmem:[#allocation37_spill] sm:$0xff] %v4608_v51 }
 0x726   :  { %1867 = vmatmul.mubr.bf16.vlgmr.msra.gmra.mrb[56].mxu0 %v1808_v26  ;;  %1908 = vmatmul.mubr.bf16.vlgmr.msra.gmra.mrb[56].mxu1 %v1808_v26 }
 0x727   :  { %1921 = vmatpush1.bf16.msra.mxu0 %v4111_v13  ;;  %1962 = vmatpush1.bf16.msra.mxu1 %v4114_v18  ;;  %v4461_v13 = vld [vmem:[#allocation3 + $0x8] sm:$0xff]  ;;  %v4464_v18 = vld [vmem:[#allocation3 + $0x18] sm:$0xff] }
 0x728   :  { %1922 = vmatprep.subr.bf16.mxu0 %v4117_v5  ;;  %1963 = vmatprep.subr.bf16.mxu1 %v4120_v56  ;;  %v4467_v5 = vld [vmem:[#allocation3] sm:$0xff]  ;;  %v4470_v56 = vld [vmem:[#allocation3 + $0x10] sm:$0xff] }
 0x729   :  { %1952 = vmatprep.mubr.bf16.mxu0 %v5064_v9  ;;  %1993 = vmatprep.mubr.bf16.mxu1 %v5064_v9 }
 0x72b   :  { %1923 = vmatpush1.bf16.msra.mxu0 %v4125_v23  ;;  %1964 = vmatpush1.bf16.msra.mxu1 %v4128_v10  ;;  %v4473_v23 = vld [vmem:[#allocation3 + $0x28] sm:$0xff]  ;;  %v4476_v10 = vld [vmem:[#allocation3 + $0x38] sm:$0xff] }
 0x72c   :  { %1924 = vmatprep.subr.bf16.mxu0 %v4131_v48  ;;  %1965 = vmatprep.subr.bf16.mxu1 %v4134_v2  ;;  %v4479_v48 = vld [vmem:[#allocation3 + $0x20] sm:$0xff]  ;;  %v4482_v2 = vld [vmem:[#allocation3 + $0x30] sm:$0xff] }
 0x72f   :  { %1925 = vmatpush1.bf16.msra.mxu0 %v4137_v34  ;;  %1966 = vmatpush1.bf16.msra.mxu1 %v4140_v41  ;;  %v4485_v34 = vld [vmem:[#allocation3 + $0x48] sm:$0xff]  ;;  %v4488_v41 = vld [vmem:[#allocation3 + $0x58] sm:$0xff] }
 0x730   :  { %1926 = vmatprep.subr.bf16.mxu0 %v4143_v21  ;;  %1967 = vmatprep.subr.bf16.mxu1 %v4146_v15  ;;  %v4491_v21 = vld [vmem:[#allocation3 + $0x40] sm:$0xff]  ;;  %v4494_v15 = vld [vmem:[#allocation3 + $0x50] sm:$0xff] }
 0x733   :  { %1927 = vmatpush1.bf16.msra.mxu0 %v4149_v20  ;;  %1968 = vmatpush1.bf16.msra.mxu1 %v4152_v52  ;;  %v4497_v20 = vld [vmem:[#allocation3 + $0x68] sm:$0xff]  ;;  %v4500_v52 = vld [vmem:[#allocation3 + $0x78] sm:$0xff] }
 0x734   :  { %1928 = vmatprep.subr.bf16.mxu0 %v5211_v60  ;;  %1969 = vmatprep.subr.bf16.mxu1 %v5212_v6  ;;  %v4524_v60 = vld [vmem:[#allocation3 + $0xb8] sm:$0xff]  ;;  %v4527_v6 = vld [vmem:[#allocation3 + $0xa0] sm:$0xff] }
 0x737   :  { %1929 = vmatpush1.bf16.msra.mxu0 %v5213_v11  ;;  %1970 = vmatpush1.bf16.msra.mxu1 %v5214_v40  ;;  %v4530_v11 = vld [vmem:[#allocation3 + $0xb0] sm:$0xff]  ;;  %v4533_v40 = vld [vmem:[#allocation3 + $0xc8] sm:$0xff] }
 0x738   :  { %1930 = vmatprep.subr.bf16.mxu0 %v5215_v8  ;;  %1971 = vmatprep.subr.bf16.mxu1 %v5216_v36  ;;  %v4536_v8 = vld [vmem:[#allocation3 + $0xd8] sm:$0xff]  ;;  %v4539_v36 = vld [vmem:[#allocation3 + $0xc0] sm:$0xff] }
 0x73b   :  { %1931 = vmatpush1.bf16.msra.mxu0 %v5217_v46  ;;  %1972 = vmatpush1.bf16.msra.mxu1 %v5218_v38  ;;  %v4542_v46 = vld [vmem:[#allocation3 + $0xd0] sm:$0xff]  ;;  %v4545_v38 = vld [vmem:[#allocation3 + $0xe8] sm:$0xff] }
 0x73c   :  { %1932 = vmatprep.subr.bf16.mxu0 %v5219_v14  ;;  %1973 = vmatprep.subr.bf16.mxu1 %v5220_v45  ;;  %v4548_v14 = vld [vmem:[#allocation3 + $0xf8] sm:$0xff]  ;;  %v4551_v45 = vld [vmem:[#allocation3 + $0xe0] sm:$0xff] }
 0x73f   :  { %1933 = vmatpush1.bf16.msra.mxu0 %v4185_v4  ;;  %1974 = vmatpush1.bf16.msra.mxu1 %v4188_v16  ;;  %v4515_v4 = vld [vmem:[#allocation3 + $0x80] sm:$0xff]  ;;  %v4518_v16 = vld [vmem:[#allocation3 + $0x90] sm:$0xff] }
 0x740   :  { %1934 = vmatprep.subr.bf16.mxu0 %v4191_v62  ;;  %1975 = vmatprep.subr.bf16.mxu1 %v4194_v49  ;;  %v4503_v62 = vld [vmem:[#allocation3 + $0x60] sm:$0xff]  ;;  %v4506_v49 = vld [vmem:[#allocation3 + $0x70] sm:$0xff] }
 0x743   :  { %1935 = vmatpush1.bf16.msra.mxu0 %v4197_v1  ;;  %1976 = vmatpush1.bf16.msra.mxu1 %v4200_v58  ;;  %v4509_v1 = vld [vmem:[#allocation3 + $0x88] sm:$0xff]  ;;  %v4512_v58 = vld [vmem:[#allocation3 + $0x98] sm:$0xff] }
 0x744   :  { %2056 = vmatprep.subr.bf16.mxu0 %v4461_v13  ;;  %2097 = vmatprep.subr.bf16.mxu1 %v4464_v18 }
 0x746   :  { %1953 = vmatmul.mubr.bf16.vlgmr.msra.gmra.mrb[60].mxu0 %v1808_v26  ;;  %1994 = vmatmul.mubr.bf16.vlgmr.msra.gmra.mrb[60].mxu1 %v1808_v26  ;;  %v4611_v26 = vld [vmem:[#allocation3 + $0x180] sm:$0xff] }
 0x747   :  { %2057 = vmatpush1.bf16.msra.mxu0 %v4467_v5  ;;  %2098 = vmatpush1.bf16.msra.mxu1 %v4470_v56  ;;  %5285 = vst [vmem:[#allocation38_spill] sm:$0xff] %v4611_v26 }
 0x748   :  { %2058 = vmatprep.subr.bf16.mxu0 %v4473_v23  ;;  %2099 = vmatprep.subr.bf16.mxu1 %v4476_v10 }
 0x74b   :  { %2059 = vmatpush1.bf16.msra.mxu0 %v4479_v48  ;;  %2100 = vmatpush1.bf16.msra.mxu1 %v4482_v2 }
 0x74c   :  { %2060 = vmatprep.subr.bf16.mxu0 %v4485_v34  ;;  %2101 = vmatprep.subr.bf16.mxu1 %v4488_v41 }
 0x74f   :  { %2061 = vmatpush1.bf16.msra.mxu0 %v4491_v21  ;;  %2102 = vmatpush1.bf16.msra.mxu1 %v4494_v15 }
 0x750   :  { %2062 = vmatprep.subr.bf16.mxu0 %v4497_v20  ;;  %2103 = vmatprep.subr.bf16.mxu1 %v4500_v52 }
 0x753   :  { %2063 = vmatpush1.bf16.msra.mxu0 %v4503_v62  ;;  %2104 = vmatpush1.bf16.msra.mxu1 %v4506_v49 }
 0x754   :  { %2064 = vmatprep.subr.bf16.mxu0 %v4509_v1  ;;  %2105 = vmatprep.subr.bf16.mxu1 %v4512_v58 }
 0x757   :  { %2065 = vmatpush1.bf16.msra.mxu0 %v4515_v4  ;;  %2106 = vmatpush1.bf16.msra.mxu1 %v4518_v16 }
 0x758   :  { %2066 = vmatprep.subr.bf16.mxu0 %v4521_v7  ;;  %2107 = vmatprep.subr.bf16.mxu1 %v4524_v60 }
 0x75b   :  { %2067 = vmatpush1.bf16.msra.mxu0 %v4527_v6  ;;  %2108 = vmatpush1.bf16.msra.mxu1 %v4530_v11 }
 0x75c   :  { %2068 = vmatprep.subr.bf16.mxu0 %v4533_v40  ;;  %2109 = vmatprep.subr.bf16.mxu1 %v4536_v8 }
 0x75f   :  { %2069 = vmatpush1.bf16.msra.mxu0 %v4539_v36  ;;  %2110 = vmatpush1.bf16.msra.mxu1 %v4542_v46 }
 0x760   :  { %2070 = vmatprep.subr.bf16.mxu0 %v4545_v38  ;;  %2111 = vmatprep.subr.bf16.mxu1 %v4548_v14 }
 0x763   :  { %2071 = vmatpush1.bf16.msra.mxu0 %v4551_v45  ;;  %2112 = vmatpush1.bf16.msra.mxu1 %v4554_v0 }
 0x764   :  { %2072 = vmatprep.subr.bf16.mxu0 %v4557_v32  ;;  %2113 = vmatprep.subr.bf16.mxu1 %v4560_v19 }
 0x767   :  { %2073 = vmatpush1.bf16.msra.mxu0 %v4563_v59  ;;  %2114 = vmatpush1.bf16.msra.mxu1 %v4566_v37 }
 0x768   :  { %2074 = vmatprep.subr.bf16.mxu0 %v4569_v17  ;;  %2115 = vmatprep.subr.bf16.mxu1 %v4572_v35 }
 0x76b   :  { %2075 = vmatpush1.bf16.msra.mxu0 %v4575_v54  ;;  %2116 = vmatpush1.bf16.msra.mxu1 %v4578_v57 }
 0x76c   :  { %2076 = vmatprep.subr.bf16.mxu0 %v4581_v33  ;;  %2117 = vmatprep.subr.bf16.mxu1 %v4584_v39 }
 0x76f   :  { %2077 = vmatpush1.bf16.msra.mxu0 %v4587_v63  ;;  %2118 = vmatpush1.bf16.msra.mxu1 %v4590_v29  ;;  %v5294_v29 = vld [vmem:[#allocation25_spill] sm:$0xff] }
 0x770   :  { %2078 = vmatprep.subr.bf16.mxu0 %v4593_v61  ;;  %2119 = vmatprep.subr.bf16.mxu1 %v4596_v30  ;;  %v4615_v30 = vld [vmem:[#allocation3 + $0x1a8] sm:$0xff] }
 0x771   :  { %5286 = vst [vmem:[#allocation39_spill] sm:$0xff] %v4615_v30 }
 0x773   :  { %2079 = vmatpush1.bf16.msra.mxu0 %v4599_v3  ;;  %2120 = vmatpush1.bf16.msra.mxu1 %v4602_v24 }
 0x774   :  { %2080 = vmatprep.subr.bf16.mxu0 %v4605_v12  ;;  %2121 = vmatprep.subr.bf16.mxu1 %v4608_v51  ;;  %v5292_v12 = vld [vmem:[#allocation23_spill] sm:$0xff] }
 0x777   :  { %2081 = vmatpush1.bf16.msra.mxu0 %v4611_v26  ;;  %2122 = vmatpush1.bf16.msra.mxu1 %v5252_v27  ;;  %v5287_v27 = vld [vmem:[#allocation84_spill] sm:$0xff]  ;;  %v5291_v26 = vld [vmem:[#allocation22_spill] sm:$0xff] }
 0x778   :  { %2082 = vmatprep.subr.bf16.mxu0 %v4615_v30  ;;  %2123 = vmatprep.subr.bf16.mxu1 %v5254_v25  ;;  %v5288_v30 = vld [vmem:[#allocation107_spill] sm:$0xff]  ;;  %v5289_v25 = vld [vmem:[#allocation30_spill] sm:$0xff] }
 0x77b   :  { %2083 = vmatpush1.bf16.msra.mxu0 %v5255_v47  ;;  %2124 = vmatpush1.bf16.msra.mxu1 %v5256_v42  ;;  %v5290_v47 = vld [vmem:[#allocation31_spill] sm:$0xff] }
 0x77c   :  { %2084 = vmatprep.subr.bf16.mxu0 %v5257_v31  ;;  %2125 = vmatprep.subr.bf16.mxu1 %v5258_v50 }
 0x77f   :  { %2085 = vmatpush1.bf16.msra.mxu0 %v5259_v53  ;;  %2126 = vmatpush1.bf16.msra.mxu1 %v5260_v55 }
 0x780   :  { %2086 = vmatprep.subr.bf16.mxu0 %v5261_v28  ;;  %2127 = vmatprep.subr.bf16.mxu1 %v5262_v44 }
 0x783   :  { %2087 = vmatpush1.bf16.msra.mxu0 %v5287_v27  ;;  %2128 = vmatpush1.bf16.msra.mxu1 %v5288_v30  ;;  %v5293_v30 = vld [vmem:[#allocation24_spill] sm:$0xff] }
 0x784   :  { %2142 = vmatprep.subr.bf16.mxu0 %v5289_v25  ;;  %2183 = vmatprep.subr.bf16.mxu1 %v5290_v47 }
 0x7f9   :  { %v1868_v42 = vpop.f32.mrb[56].mxu0  ;;  %v1909_v31 = vpop.f32.mrb[56].mxu1 }
 0x7fa   :  { %v1869_v50 = vadd.f32 %v1868_v42, %v5291_v26  ;;  %v1870_v51 = vpop.f32.mrb[57].mxu0  ;;  %v1911_v53 = vpop.f32.mrb[57].mxu1  ;;  %v1910_v25 = vadd.f32 %v1909_v31, %v5293_v30 }
 0x7fb   :  { %v1871_v55 = vadd.f32 %v1870_v51, %v5292_v12  ;;  %v1872_v24 = vpop.f32.mrb[58].mxu0  ;;  %v1913_v28 = vpop.f32.mrb[58].mxu1  ;;  %v1912_v47 = vadd.f32 %v1911_v53, %v5294_v29 }
 0x7fc   :  { %v2560_v3 = vmul.f32 -1.442695, %v1869_v50  ;;  %v1873_v44 = vpop.f32.mrb[59].mxu0  ;;  %v1914_v61 = vpop.f32.mrb[59].mxu1  ;;  %v2562_v63 = vmul.f32 -1.442695, %v1910_v25 }
 0x7fd   :  { %v2561_v27 = vmul.f32 -1.442695, %v1871_v55  ;;  %v5295_v25 = vld [vmem:[#allocation46_spill] sm:$0xff] }
 0x7fe   :  { %2858 = vpow2.f32 %v2560_v3 }
 0x7ff   :  { %2860 = vpow2.f32 %v2561_v27 }
 0x800   :  { %2862 = vtanh.f32 %v1912_v47 }
 0x801   :  { %2864 = vpow2.f32 %v2562_v63 }
 0x808   :  { %v2859_v39 = vpop.eup %2858 }
 0x809   :  { %v2040_v33 = vadd.f32 1.0, %v2859_v39  ;;  %v2861_v42 = vpop.eup %2860 }
 0x80a   :  { %v2041_v51 = vadd.f32 1.0, %v2861_v42  ;;  %v2863_v24 = vpop.eup %2862 }
 0x80b   :  { %2866 = vrcp.f32 %v2040_v33  ;;  %v2865_v50 = vpop.eup %2864  ;;  %v5296_v33 = vld [vmem:[#allocation47_spill] sm:$0xff] }
 0x80c   :  { %2868 = vrcp.f32 %v2041_v51  ;;  %v2042_v3 = vadd.f32 1.0, %v2865_v50 }
 0x80e   :  { %2870 = vrcp.f32 %v2042_v3 }
 0x815   :  { %v2867_v28 = vpop.eup %2866 }
 0x816   :  { %v2051_v61 = vmul.f32 %v2867_v28, %v2863_v24  ;;  %v2869_v55 = vpop.eup %2868 }
 0x817   :  { %v2050_v44 = vmul.f32 %v2869_v55, %v4418_v43  ;;  %v5297_v43 = vld [vmem:[#allocation49_spill] sm:$0xff]  ;;  %v5298_v55 = vld [vmem:[#allocation51_spill] sm:$0xff] }
 0x819   :  { %v1954_v31 = vpop.f32.mrb[60].mxu0  ;;  %v1995_v27 = vpop.f32.mrb[60].mxu1  ;;  %v4636_v53 = vadd.f32 %v2051_v61, %v2050_v44 }
 0x81a   :  { %v2002_v39 = vadd.f32 %v1954_v31, %v5295_v25  ;;  %v1956_v47 = vpop.f32.mrb[61].mxu0  ;;  %v1997_v29 = vpop.f32.mrb[61].mxu1  ;;  %v2004_v28 = vadd.f32 %v1995_v27, %v5297_v43 }
 0x81b   :  { %v2003_v63 = vadd.f32 %v1956_v47, %v5296_v33  ;;  %v1958_v42 = vpop.f32.mrb[62].mxu0  ;;  %v1999_v51 = vpop.f32.mrb[62].mxu1  ;;  %2872 = vtanh.f32 %v4636_v53  ;;  %v2005_v44 = vadd.f32 %v1997_v29, %v5298_v55  ;;  %v3086_v55 = vld [vmem:[#allocation6 + $0x40] ss:$16 sps:$4 sm:$0xff]  }
 0x81c   :  { %v2557_v30 = vmul.f32 -1.442695, %v2002_v39  ;;  %v1959_v12 = vpop.f32.mrb[63].mxu0  ;;  %v2000_v24 = vpop.f32.mrb[63].mxu1  ;;  %v2559_v25 = vmul.f32 -1.442695, %v2004_v28 }
 0x81d   :  { %v2558_v50 = vmul.f32 -1.442695, %v2003_v63  ;;  %v2871_v61 = vpop.eup %2870 }
 0x81e   :  { %2874 = vpow2.f32 %v2557_v30 }
 0x81f   :  { %2876 = vpow2.f32 %v2558_v50 }
 0x820   :  { %2878 = vtanh.f32 %v2005_v44  ;;  %v3087_v44 = vld [vmem:[#allocation6 + $0x48] ss:$16 sps:$4 sm:$0xff]  }
 0x821   :  { %2880 = vpow2.f32 %v2559_v25  ;;  %v3090_v25 = vld [vmem:[#allocation6 + $0x60] ss:$16 sps:$4 sm:$0xff]  }
 0x825   :  { %v2873_v31 = vpop.eup %2872 }
 0x826   :  { %v2054_v3 = vmul.f32 %v2873_v31, %v2871_v61  ;;  %v3088_v31 = vld [vmem:[#allocation6 + $0x64] ss:$16 sps:$4 sm:$0xff]  }
 0x828   :  { %v2875_v26 = vpop.eup %2874  ;;  %v2055_v33 = vpack.c.bf16 %v2054_v3, %v2054_v3  ;;  %v3091_v3 = vld [vmem:[#allocation6 + $0x68] ss:$16 sps:$4 sm:$0xff]  }
 0x829   :  { %v2015_v47 = vadd.f32 1.0, %v2875_v26  ;;  %v2877_v39 = vpop.eup %2876 }
 0x82a   :  { %v2016_v12 = vadd.f32 1.0, %v2877_v39  ;;  %2088 = vmatprep.mubr.bf16.mxu0 %v2055_v33  ;;  %2129 = vmatprep.mubr.bf16.mxu1 %v2055_v33  ;;  %v2879_v30 = vpop.eup %2878  ;;  %v3093_v33 = vld [vmem:[#allocation6 + $0x8c] ss:$16 sps:$4 sm:$0xff]   ;;  %v3094_v39 = vld [vmem:[#allocation6 + $0x80] ss:$16 sps:$4 sm:$0xff]  }
 0x82b   :  { %2882 = vrcp.f32 %v2015_v47  ;;  %v2881_v63 = vpop.eup %2880  ;;  %v3092_v47 = vld [vmem:[#allocation6 + $0x84] ss:$16 sps:$4 sm:$0xff]  }
 0x82c   :  { %2884 = vrcp.f32 %v2016_v12  ;;  %v2017_v29 = vadd.f32 1.0, %v2881_v63  ;;  %v3095_v12 = vld [vmem:[#allocation6 + $0x88] ss:$16 sps:$4 sm:$0xff]   ;;  %v3097_v63 = vld [vmem:[#allocation6 + $0xac] ss:$16 sps:$4 sm:$0xff]  }
 0x82e   :  { %2886 = vrcp.f32 %v2017_v29  ;;  %v3102_v29 = vld [vmem:[#allocation6 + $0xc0] ss:$16 sps:$4 sm:$0xff]  }
 0x835   :  { %v2883_v27 = vpop.eup %2882 }
 0x836   :  { %v2026_v42 = vmul.f32 %v2883_v27, %v2879_v30  ;;  %v2885_v51 = vpop.eup %2884  ;;  %v3096_v30 = vld [vmem:[#allocation6 + $0xa4] ss:$16 sps:$4 sm:$0xff]   ;;  %v3098_v27 = vld [vmem:[#allocation6 + $0xa0] ss:$16 sps:$4 sm:$0xff]  }
 0x837   :  { %v2025_v24 = vmul.f32 %v2885_v51, %v4426_v22  ;;  %v3089_v22 = vld [vmem:[#allocation6 + $0x6c] ss:$16 sps:$4 sm:$0xff]  }
 0x838   :  { %v2887_v26 = vpop.eup %2886  ;;  %v3101_v51 = vld [vmem:[#allocation6 + $0xcc] ss:$16 sps:$4 sm:$0xff]  }
 0x839   :  { %v4644_v50 = vadd.f32 %v2026_v42, %v2025_v24  ;;  %v3099_v42 = vld [vmem:[#allocation6 + $0xa8] ss:$16 sps:$4 sm:$0xff]  }
 0x83a   :  { %v3103_v24 = vld [vmem:[#allocation6 + $0xc8] ss:$16 sps:$4 sm:$0xff]  }
 0x83b   :  { %2888 = vtanh.f32 %v4644_v50 }
 0x845   :  { %v2889_v43 = vpop.eup %2888 }
 0x846   :  { %v2029_v28 = vmul.f32 %v2889_v43, %v2887_v26  ;;  %v3104_v26 = vld [vmem:[#allocation6 + $0xe4] ss:$16 sps:$4 sm:$0xff]   ;;  %v3105_v43 = vld [vmem:[#allocation6 + $0xec] ss:$16 sps:$4 sm:$0xff]  }
 0x848   :  { %v4647_v61 = vpack.c.bf16 %v2029_v28, %v2029_v28  ;;  %v3106_v28 = vld [vmem:[#allocation6 + $0xe0] ss:$16 sps:$4 sm:$0xff]  }
 0x84a   :  { %2089 = vmatmul.mubr.bf16.vlgmr.msra.gmra.mrb[64].mxu0 %v4647_v61  ;;  %2130 = vmatmul.mubr.bf16.vlgmr.msra.gmra.mrb[64].mxu1 %v4647_v61 }
 0x84b   :  { %2143 = vmatpush1.bf16.msra.mxu0 %v3086_v55  ;;  %2184 = vmatpush1.bf16.msra.mxu1 %v3087_v44  ;;  %v3107_v55 = vld [vmem:[#allocation6 + $0xe8] ss:$16 sps:$4 sm:$0xff]   ;;  %v3108_v44 = vld [vmem:[#allocation6 + $0x104] ss:$16 sps:$4 sm:$0xff]  }
 0x84c   :  { %2144 = vmatprep.subr.bf16.mxu0 %v3088_v31  ;;  %2185 = vmatprep.subr.bf16.mxu1 %v3089_v22  ;;  %v3109_v31 = vld [vmem:[#allocation6 + $0x10c] ss:$16 sps:$4 sm:$0xff]   ;;  %v3110_v22 = vld [vmem:[#allocation6 + $0x100] ss:$16 sps:$4 sm:$0xff]  }
 0x84d   :  { %2174 = vmatprep.mubr.bf16.mxu0 %v5064_v9  ;;  %2215 = vmatprep.mubr.bf16.mxu1 %v5064_v9  ;;  %v3100_v9 = vld [vmem:[#allocation6 + $0xc4] ss:$16 sps:$4 sm:$0xff]  }
 0x84f   :  { %2145 = vmatpush1.bf16.msra.mxu0 %v3090_v25  ;;  %2186 = vmatpush1.bf16.msra.mxu1 %v3091_v3  ;;  %v3111_v25 = vld [vmem:[#allocation6 + $0x108] ss:$16 sps:$4 sm:$0xff]   ;;  %v3112_v3 = vld [vmem:[#allocation6 + $0x124] ss:$16 sps:$4 sm:$0xff]  }
 0x850   :  { %2146 = vmatprep.subr.bf16.mxu0 %v3092_v47  ;;  %2187 = vmatprep.subr.bf16.mxu1 %v3093_v33  ;;  %v3113_v47 = vld [vmem:[#allocation6 + $0x12c] ss:$16 sps:$4 sm:$0xff]   ;;  %v3114_v33 = vld [vmem:[#allocation6 + $0x120] ss:$16 sps:$4 sm:$0xff]  }
 0x853   :  { %2147 = vmatpush1.bf16.msra.mxu0 %v3094_v39  ;;  %2188 = vmatpush1.bf16.msra.mxu1 %v3095_v12  ;;  %v3115_v39 = vld [vmem:[#allocation6 + $0x128] ss:$16 sps:$4 sm:$0xff]  }
 0x854   :  { %2148 = vmatprep.subr.bf16.mxu0 %v3096_v30  ;;  %2189 = vmatprep.subr.bf16.mxu1 %v3097_v63 }
 0x857   :  { %2149 = vmatpush1.bf16.msra.mxu0 %v3098_v27  ;;  %2190 = vmatpush1.bf16.msra.mxu1 %v3099_v42 }
 0x858   :  { %2150 = vmatprep.subr.bf16.mxu0 %v3100_v9  ;;  %2191 = vmatprep.subr.bf16.mxu1 %v3101_v51 }
 0x85b   :  { %2151 = vmatpush1.bf16.msra.mxu0 %v3102_v29  ;;  %2192 = vmatpush1.bf16.msra.mxu1 %v3103_v24 }
 0x85c   :  { %2152 = vmatprep.subr.bf16.mxu0 %v3104_v26  ;;  %2193 = vmatprep.subr.bf16.mxu1 %v3105_v43 }
 0x85f   :  { %2153 = vmatpush1.bf16.msra.mxu0 %v3106_v28  ;;  %2194 = vmatpush1.bf16.msra.mxu1 %v3107_v55 }
 0x860   :  { %2154 = vmatprep.subr.bf16.mxu0 %v3108_v44  ;;  %2195 = vmatprep.subr.bf16.mxu1 %v3109_v31 }
 0x863   :  { %2155 = vmatpush1.bf16.msra.mxu0 %v3110_v22  ;;  %2196 = vmatpush1.bf16.msra.mxu1 %v3111_v25  ;;  %v5315_v25 = vld [vmem:[#allocation48_spill] sm:$0xff] }
 0x864   :  { %2156 = vmatprep.subr.bf16.mxu0 %v3112_v3  ;;  %2197 = vmatprep.subr.bf16.mxu1 %v3113_v47 }
 0x867   :  { %2157 = vmatpush1.bf16.msra.mxu0 %v3114_v33  ;;  %2198 = vmatpush1.bf16.msra.mxu1 %v3115_v39  ;;  %v5316_v39 = vld [vmem:[#allocation50_spill] sm:$0xff] }
 0x868   :  { %2278 = vmatprep.subr.bf16.mxu0 %v4461_v13  ;;  %2319 = vmatprep.subr.bf16.mxu1 %v4464_v18  ;;  %v5299_v13 = vld [vmem:[#allocation33_spill] sm:$0xff]  ;;  %v5300_v18 = vld [vmem:[#allocation35_spill] sm:$0xff] }
 0x86a   :  { %2175 = vmatmul.mubr.bf16.vlgmr.msra.gmra.mrb[68].mxu0 %v4647_v61  ;;  %2216 = vmatmul.mubr.bf16.vlgmr.msra.gmra.mrb[68].mxu1 %v4647_v61  ;;  %v5314_v61 = vld [vmem:[#allocation25_spill] sm:$0xff] }
 0x86b   :  { %2279 = vmatpush1.bf16.msra.mxu0 %v4467_v5  ;;  %2320 = vmatpush1.bf16.msra.mxu1 %v4470_v56  ;;  %v5301_v5 = vld [vmem:[#allocation93_spill] sm:$0xff]  ;;  %v5302_v56 = vld [vmem:[#allocation94_spill] sm:$0xff] }
 0x86c   :  { %2280 = vmatprep.subr.bf16.mxu0 %v4473_v23  ;;  %2321 = vmatprep.subr.bf16.mxu1 %v4476_v10  ;;  %v5303_v23 = vld [vmem:[#allocation96_spill] sm:$0xff]  ;;  %v5304_v10 = vld [vmem:[#allocation86_spill] sm:$0xff] }
 0x86f   :  { %2281 = vmatpush1.bf16.msra.mxu0 %v4479_v48  ;;  %2322 = vmatpush1.bf16.msra.mxu1 %v4482_v2  ;;  %v5305_v48 = vld [vmem:[#allocation32_spill] sm:$0xff]  ;;  %v5306_v2 = vld [vmem:[#allocation34_spill] sm:$0xff] }
 0x870   :  { %2282 = vmatprep.subr.bf16.mxu0 %v4485_v34  ;;  %2323 = vmatprep.subr.bf16.mxu1 %v4488_v41  ;;  %v5307_v34 = vld [vmem:[#allocation36_spill] sm:$0xff]  ;;  %v5308_v41 = vld [vmem:[#allocation37_spill] sm:$0xff] }
 0x873   :  { %2283 = vmatpush1.bf16.msra.mxu0 %v4491_v21  ;;  %2324 = vmatpush1.bf16.msra.mxu1 %v4494_v15  ;;  %v5309_v21 = vld [vmem:[#allocation38_spill] sm:$0xff]  ;;  %v3116_v15 = vld [vmem:[#allocation3 + $0x190] sm:$0xff] }
 0x874   :  { %2284 = vmatprep.subr.bf16.mxu0 %v4497_v20  ;;  %2325 = vmatprep.subr.bf16.mxu1 %v4500_v52  ;;  %v5310_v20 = vld [vmem:[#allocation39_spill] sm:$0xff]  ;;  %v3117_v52 = vld [vmem:[#allocation3 + $0x1b8] sm:$0xff] }
 0x877   :  { %2285 = vmatpush1.bf16.msra.mxu0 %v4503_v62  ;;  %2326 = vmatpush1.bf16.msra.mxu1 %v4506_v49  ;;  %v3118_v62 = vld [vmem:[#allocation3 + $0x1a0] sm:$0xff]  ;;  %v3119_v49 = vld [vmem:[#allocation3 + $0x1b0] sm:$0xff] }
 0x878   :  { %2286 = vmatprep.subr.bf16.mxu0 %v4509_v1  ;;  %2327 = vmatprep.subr.bf16.mxu1 %v4512_v58  ;;  %v3120_v1 = vld [vmem:[#allocation3 + $0x1c8] sm:$0xff]  ;;  %v3121_v58 = vld [vmem:[#allocation3 + $0x1d8] sm:$0xff] }
 0x87b   :  { %2287 = vmatpush1.bf16.msra.mxu0 %v4515_v4  ;;  %2328 = vmatpush1.bf16.msra.mxu1 %v4518_v16  ;;  %v3122_v4 = vld [vmem:[#allocation3 + $0x1c0] sm:$0xff]  ;;  %v3123_v16 = vld [vmem:[#allocation3 + $0x1d0] sm:$0xff] }
 0x87c   :  { %2288 = vmatprep.subr.bf16.mxu0 %v4521_v7  ;;  %2329 = vmatprep.subr.bf16.mxu1 %v4524_v60  ;;  %v3124_v7 = vld [vmem:[#allocation3 + $0x1e8] sm:$0xff]  ;;  %v3125_v60 = vld [vmem:[#allocation3 + $0x1f8] sm:$0xff] }
 0x87f   :  { %2289 = vmatpush1.bf16.msra.mxu0 %v4527_v6  ;;  %2330 = vmatpush1.bf16.msra.mxu1 %v4530_v11  ;;  %v3126_v6 = vld [vmem:[#allocation3 + $0x1e0] sm:$0xff]  ;;  %v3127_v11 = vld [vmem:[#allocation3 + $0x1f0] sm:$0xff] }
 0x880   :  { %2290 = vmatprep.subr.bf16.mxu0 %v4533_v40  ;;  %2331 = vmatprep.subr.bf16.mxu1 %v4536_v8 }
 0x883   :  { %2291 = vmatpush1.bf16.msra.mxu0 %v4539_v36  ;;  %2332 = vmatpush1.bf16.msra.mxu1 %v4542_v46  ;;  %v5311_v36 = vld [vmem:[#allocation22_spill] sm:$0xff] }
 0x884   :  { %2292 = vmatprep.subr.bf16.mxu0 %v4545_v38  ;;  %2333 = vmatprep.subr.bf16.mxu1 %v4548_v14 }
 0x887   :  { %2293 = vmatpush1.bf16.msra.mxu0 %v4551_v45  ;;  %2334 = vmatpush1.bf16.msra.mxu1 %v4554_v0  ;;  %v5312_v45 = vld [vmem:[#allocation23_spill] sm:$0xff] }
 0x888   :  { %2294 = vmatprep.subr.bf16.mxu0 %v4557_v32  ;;  %2335 = vmatprep.subr.bf16.mxu1 %v4560_v19 }
 0x88b   :  { %2295 = vmatpush1.bf16.msra.mxu0 %v4563_v59  ;;  %2336 = vmatpush1.bf16.msra.mxu1 %v4566_v37 }
 0x88c   :  { %2296 = vmatprep.subr.bf16.mxu0 %v4569_v17  ;;  %2337 = vmatprep.subr.bf16.mxu1 %v4572_v35 }
 0x88f   :  { %2297 = vmatpush1.bf16.msra.mxu0 %v4575_v54  ;;  %2338 = vmatpush1.bf16.msra.mxu1 %v4578_v57  ;;  %v5313_v54 = vld [vmem:[#allocation24_spill] sm:$0xff] }
 0x890   :  { %2298 = vmatprep.subr.bf16.mxu0 %v5299_v13  ;;  %2339 = vmatprep.subr.bf16.mxu1 %v5300_v18 }
 0x893   :  { %2299 = vmatpush1.bf16.msra.mxu0 %v5301_v5  ;;  %2340 = vmatpush1.bf16.msra.mxu1 %v5302_v56 }
 0x894   :  { %2300 = vmatprep.subr.bf16.mxu0 %v5303_v23  ;;  %2341 = vmatprep.subr.bf16.mxu1 %v5304_v10 }
 0x897   :  { %2301 = vmatpush1.bf16.msra.mxu0 %v5305_v48  ;;  %2342 = vmatpush1.bf16.msra.mxu1 %v5306_v2 }
 0x898   :  { %2302 = vmatprep.subr.bf16.mxu0 %v5307_v34  ;;  %2343 = vmatprep.subr.bf16.mxu1 %v5308_v41  ;;  %v5318_v41 = vld [vmem:[#allocation53_spill] sm:$0xff] }
 0x89b   :  { %2303 = vmatpush1.bf16.msra.mxu0 %v5309_v21  ;;  %2344 = vmatpush1.bf16.msra.mxu1 %v3116_v15 }
 0x89c   :  { %2304 = vmatprep.subr.bf16.mxu0 %v5310_v20  ;;  %2345 = vmatprep.subr.bf16.mxu1 %v3117_v52 }
 0x89f   :  { %2305 = vmatpush1.bf16.msra.mxu0 %v3118_v62  ;;  %2346 = vmatpush1.bf16.msra.mxu1 %v3119_v49 }
 0x8a0   :  { %2306 = vmatprep.subr.bf16.mxu0 %v3120_v1  ;;  %2347 = vmatprep.subr.bf16.mxu1 %v3121_v58 }
 0x8a3   :  { %2307 = vmatpush1.bf16.msra.mxu0 %v3122_v4  ;;  %2348 = vmatpush1.bf16.msra.mxu1 %v3123_v16 }
 0x8a4   :  { %2308 = vmatprep.subr.bf16.mxu0 %v3124_v7  ;;  %2349 = vmatprep.subr.bf16.mxu1 %v3125_v60 }
 0x8a7   :  { %2309 = vmatpush1.bf16.msra.mxu0 %v3126_v6  ;;  %2350 = vmatpush1.bf16.msra.mxu1 %v3127_v11 }
 0x91d   :  { %v2090_v40 = vpop.f32.mrb[64].mxu0  ;;  %v2131_v8 = vpop.f32.mrb[64].mxu1 }
 0x91e   :  { %v2091_v46 = vadd.f32 %v2090_v40, %v5311_v36  ;;  %v2092_v38 = vpop.f32.mrb[65].mxu0  ;;  %v2133_v14 = vpop.f32.mrb[65].mxu1  ;;  %v2132_v57 = vadd.f32 %v2131_v8, %v5313_v54 }
 0x91f   :  { %v2093_v0 = vadd.f32 %v2092_v38, %v5312_v45  ;;  %v2094_v32 = vpop.f32.mrb[66].mxu0  ;;  %v2135_v19 = vpop.f32.mrb[66].mxu1  ;;  %v2134_v12 = vadd.f32 %v2133_v14, %v5314_v61 }
 0x920   :  { %v2566_v59 = vmul.f32 -1.442695, %v2091_v46  ;;  %v2095_v37 = vpop.f32.mrb[67].mxu0  ;;  %v2136_v17 = vpop.f32.mrb[67].mxu1  ;;  %v2568_v30 = vmul.f32 -1.442695, %v2132_v57 }
 0x921   :  { %v2567_v35 = vmul.f32 -1.442695, %v2093_v0 }
 0x922   :  { %2890 = vpow2.f32 %v2566_v59 }
 0x923   :  { %2892 = vpow2.f32 %v2567_v35 }
 0x924   :  { %2894 = vtanh.f32 %v2134_v12 }
 0x925   :  { %2896 = vpow2.f32 %v2568_v30 }
 0x92c   :  { %v2891_v63 = vpop.eup %2890 }
 0x92d   :  { %v2262_v27 = vadd.f32 1.0, %v2891_v63  ;;  %v2893_v42 = vpop.eup %2892 }
 0x92e   :  { %v2263_v9 = vadd.f32 1.0, %v2893_v42  ;;  %v2895_v51 = vpop.eup %2894 }
 0x92f   :  { %2898 = vrcp.f32 %v2262_v27  ;;  %v2897_v29 = vpop.eup %2896 }
 0x930   :  { %2900 = vrcp.f32 %v2263_v9  ;;  %v2264_v28 = vadd.f32 1.0, %v2897_v29 }
 0x932   :  { %2902 = vrcp.f32 %v2264_v28 }
 0x939   :  { %v2899_v24 = vpop.eup %2898 }
 0x93a   :  { %v2273_v26 = vmul.f32 %v2899_v24, %v2895_v51  ;;  %v2901_v43 = vpop.eup %2900 }
 0x93b   :  { %v2272_v55 = vmul.f32 %v2901_v43, %v4636_v53  ;;  %v5317_v53 = vld [vmem:[#allocation52_spill] sm:$0xff] }
 0x93c   :  { %v2903_v34 = vpop.eup %2902 }
 0x93d   :  { %v2176_v44 = vpop.f32.mrb[68].mxu0  ;;  %v2217_v31 = vpop.f32.mrb[68].mxu1  ;;  %v4712_v22 = vadd.f32 %v2273_v26, %v2272_v55 }
 0x93e   :  { %v2224_v3 = vadd.f32 %v2176_v44, %v5315_v25  ;;  %v2178_v47 = vpop.f32.mrb[69].mxu0  ;;  %v2219_v33 = vpop.f32.mrb[69].mxu1  ;;  %v2226_v2 = vadd.f32 %v2217_v31, %v5317_v53 }
 0x93f   :  { %v2225_v13 = vadd.f32 %v2178_v47, %v5316_v39  ;;  %v2180_v18 = vpop.f32.mrb[70].mxu0  ;;  %v2221_v5 = vpop.f32.mrb[70].mxu1  ;;  %2904 = vtanh.f32 %v4712_v22  ;;  %v2227_v21 = vadd.f32 %v2219_v33, %v5318_v41 }
 0x940   :  { %v2563_v56 = vmul.f32 -1.442695, %v2224_v3  ;;  %v2181_v23 = vpop.f32.mrb[71].mxu0  ;;  %v2222_v10 = vpop.f32.mrb[71].mxu1  ;;  %v2565_v20 = vmul.f32 -1.442695, %v2226_v2 }
 0x941   :  { %v2564_v48 = vmul.f32 -1.442695, %v2225_v13 }
 0x942   :  { %2906 = vpow2.f32 %v2563_v56 }
 0x943   :  { %2908 = vpow2.f32 %v2564_v48 }
 0x944   :  { %2910 = vtanh.f32 %v2227_v21 }
 0x945   :  { %2912 = vpow2.f32 %v2565_v20 }
 0x949   :  { %v2905_v15 = vpop.eup %2904 }
 0x94a   :  { %v2276_v52 = vmul.f32 %v2905_v15, %v2903_v34 }
 0x94c   :  { %v2907_v62 = vpop.eup %2906  ;;  %v2277_v1 = vpack.c.bf16 %v2276_v52, %v2276_v52 }
 0x94d   :  { %v2237_v49 = vadd.f32 1.0, %v2907_v62  ;;  %v2909_v58 = vpop.eup %2908 }
 0x94e   :  { %v2238_v4 = vadd.f32 1.0, %v2909_v58  ;;  %2310 = vmatprep.mubr.bf16.mxu0 %v2277_v1  ;;  %2351 = vmatprep.mubr.bf16.mxu1 %v2277_v1  ;;  %v2911_v16 = vpop.eup %2910 }
 0x94f   :  { %2914 = vrcp.f32 %v2237_v49  ;;  %v2913_v7 = vpop.eup %2912 }
 0x950   :  { %2916 = vrcp.f32 %v2238_v4  ;;  %v2239_v40 = vadd.f32 1.0, %v2913_v7 }
 0x952   :  { %2918 = vrcp.f32 %v2239_v40 }
 0x959   :  { %v2915_v60 = vpop.eup %2914 }
 0x95a   :  { %v2248_v6 = vmul.f32 %v2915_v60, %v2911_v16  ;;  %v2917_v11 = vpop.eup %2916 }
 0x95b   :  { %v2247_v8 = vmul.f32 %v2917_v11, %v4644_v50 }
 0x95c   :  { %v2919_v38 = vpop.eup %2918 }
 0x95d   :  { %v2249_v46 = vadd.f32 %v2248_v6, %v2247_v8 }
 0x95f   :  { %2920 = vtanh.f32 %v2249_v46 }
 0x969   :  { %v2921_v14 = vpop.eup %2920 }
 0x96a   :  { %v2251_v0 = vmul.f32 %v2921_v14, %v2919_v38 }
 0x96c   :  { %v2252_v32 = vpack.c.bf16 %v2251_v0, %v2251_v0 }
 0x96e   :  { %2311 = vmatmul.mubr.bf16.vlgmr.msra.gmra.mrb[72].mxu0 %v2252_v32  ;;  %2352 = vmatmul.mubr.bf16.vlgmr.msra.gmra.mrb[72].mxu1 %v2252_v32 }
 0xa41   :  { %v2312_v19 = vpop.f32.mrb[72].mxu0  ;;  %v2353_v59 = vpop.f32.mrb[72].mxu1 }
 0xa42   :  { %v2313_v37 = vadd.f32 %v2312_v19, %v5311_v36  ;;  %v2314_v17 = vpop.f32.mrb[73].mxu0  ;;  %v2355_v35 = vpop.f32.mrb[73].mxu1  ;;  %v2354_v9 = vadd.f32 %v2353_v59, %v5313_v54 }
 0xa43   :  { %v2315_v57 = vadd.f32 %v2314_v17, %v5312_v45  ;;  %v2316_v12 = vpop.f32.mrb[74].mxu0  ;;  %v2357_v30 = vpop.f32.mrb[74].mxu1  ;;  %v2356_v51 = vadd.f32 %v2355_v35, %v5314_v61 }
 0xa44   :  { %v2569_v50 = vmul.f32 -1.442695, %v2313_v37  ;;  %v2317_v63 = vpop.f32.mrb[75].mxu0  ;;  %v2358_v27 = vpop.f32.mrb[75].mxu1  ;;  %v2571_v29 = vmul.f32 -1.442695, %v2354_v9 }
 0xa45   :  { %v2570_v42 = vmul.f32 -1.442695, %v2315_v57 }
 0xa46   :  { %2922 = vpow2.f32 %v2569_v50 }
 0xa47   :  { %2924 = vpow2.f32 %v2570_v42 }
 0xa48   :  { %2926 = vtanh.f32 %v2356_v51 }
 0xa49   :  { %2928 = vpow2.f32 %v2571_v29 }
 0xa50   :  { %v2923_v24 = vpop.eup %2922 }
 0xa51   :  { %v2369_v26 = vadd.f32 1.0, %v2923_v24  ;;  %v2925_v36 = vpop.eup %2924 }
 0xa52   :  { %v2370_v45 = vadd.f32 1.0, %v2925_v36  ;;  %v2927_v43 = vpop.eup %2926 }
 0xa53   :  { %2930 = vrcp.f32 %v2369_v26  ;;  %v2929_v28 = vpop.eup %2928 }
 0xa54   :  { %2932 = vrcp.f32 %v2370_v45  ;;  %v2371_v25 = vadd.f32 1.0, %v2929_v28 }
 0xa56   :  { %2934 = vrcp.f32 %v2371_v25 }
 0xa5d   :  { %v2931_v55 = vpop.eup %2930 }
 0xa5e   :  { %v2380_v44 = vmul.f32 %v2931_v55, %v2927_v43  ;;  %v2933_v31 = vpop.eup %2932 }
 0xa5f   :  { %v2379_v3 = vmul.f32 %v2933_v31, %v4712_v22 }
 0xa60   :  { %v2935_v61 = vpop.eup %2934 }
 0xa61   :  { %v2381_v54 = vadd.f32 %v2380_v44, %v2379_v3 }
 0xa63   :  { %2936 = vtanh.f32 %v2381_v54 }
 0xa6d   :  { %v2937_v47 = vpop.eup %2936 }
 0xa6e   :  { %v2383_v33 = vmul.f32 %v2937_v47, %v2935_v61 }
 0xa6f   :  { %3154 = dma.done.wait [#allocation5 + $0x1], 1024 }
 0xa70   :  { %3155 = vsyncadd [#allocation5 + $0x1], 4294966272  ;;  %v3168_v39 = vmov 0.0   ;;  %vm3169_vm1 = vmmov 0   ;;  %v5319_v13 = vld [vmem:[#allocation14_spill] sm:$0xff]  ;;  %v5320_v18 = vld [vmem:[#allocation15_spill] sm:$0xff]  ;;  %v2388_v48 = vpack.c.bf16 %v2383_v33, %v2383_v33 }
 0xa71   :  { %2584 = vmatprep.subr.bf16.mxu0 %v3168_v39  ;;  %2600 = vmatprep.mubr.msk.bf16.mxu0 %vm3169_vm1, %v3168_v39  ;;  %v5321_v5 = vld [vmem:[#allocation16_spill] sm:$0xff]  ;;  %v5322_v22 = vld [vmem:[#allocation17_spill] sm:$0xff]  ;;  %v5323_v56 = vld [vmem:[#allocation18_spill] sm:$0xff] }
 0xa72   :  { %2585 = vmatpush3.bf16.msra.mxu0 %v5319_v13  ;;  %v5324_v23 = vld [vmem:[#allocation19_spill] sm:$0xff]  ;;  %v5325_v10 = vld [vmem:[#allocation20_spill] sm:$0xff]  ;;  %v5326_v53 = vld [vmem:[#allocation21_spill] sm:$0xff] }
 0xa73   :  { %2586 = vmatprep.subr.bf16.mxu0 %v3168_v39  ;;  %v2572_v2 = vld [vmem:[%s4741_s2 + $0x2] ss:$0 sm:$0xff] }
 0xa76   :  { %2587 = vmatpush3.bf16.msra.mxu0 %v5320_v18 }
 0xa77   :  { %2588 = vmatprep.subr.bf16.mxu0 %v3168_v39 }
 0xa7a   :  { %2589 = vmatpush3.bf16.msra.mxu0 %v5321_v5 }
 0xa7b   :  { %2590 = vmatprep.subr.bf16.mxu0 %v3168_v39 }
 0xa7e   :  { %2591 = vmatpush3.bf16.msra.mxu0 %v5322_v22 }
 0xa7f   :  { %2592 = vmatprep.subr.bf16.mxu0 %v3168_v39 }
 0xa82   :  { %2593 = vmatpush3.bf16.msra.mxu0 %v5323_v56 }
 0xa83   :  { %2594 = vmatprep.subr.bf16.mxu0 %v3168_v39 }
 0xa86   :  { %2595 = vmatpush3.bf16.msra.mxu0 %v5324_v23 }
 0xa87   :  { %2596 = vmatprep.subr.bf16.mxu0 %v3168_v39 }
 0xa8a   :  { %2597 = vmatpush3.bf16.msra.mxu0 %v5325_v10 }
 0xa8b   :  { %2598 = vmatprep.subr.bf16.mxu0 %v3168_v39 }
 0xa8e   :  { %2599 = vmatpush3.bf16.msra.mxu0 %v5326_v53 }
 0xa91   :  { %2601 = vmatmul.mubr.bf16.vlgmr.msra.gmra.mrb[76].mxu0 %v2388_v48 }
 0xb64   :  { %v2436_v34 = vpop.f32.mrb[76].mxu0 }
 0xb65   :  { %v2437_v41 = vadd.f32 %v2572_v2, %v2436_v34  ;;  %v2602_v21 = vpop.f32.mrb[77].mxu0 }
 0xb66   :  { %v2439_v15 = vpop.f32.mrb[78].mxu0 }
 0xb67   :  { %2442 = vst [vmem:[%s4744_s5] sm:$0xff] %v2437_v41  ;;  %v2603_v20 = vpop.f32.mrb[79].mxu0 }
 0xb68   :  { %2447 = vsyncpa [#allocation7], 1 }
 0xb69   :  { %2448 = vsyncmov [#allocation5] }
 0xb6c   :  { %s2449_s23 = vpop.sfrf %2448 }
 0xb6d   :  { %p2573_p8 = scmp.ne.s32.totalorder %s2449_s23, 0 }
 0xb6f   :  { %2453 = shalt.err (%p2573_p8)  }
 0xb70   :  { %2455 = vsyncmov [#allocation5 + $0x1] }
 0xb73   :  { %s2456_s24 = vpop.sfrf %2455 }
 0xb74   :  { %p2574_p9 = scmp.ne.s32.totalorder %s2456_s24, 0 }
 0xb76   :  { %2460 = shalt.err (%p2574_p9)  }

</bundles_post_ra>
